<compile_context>
chip_gen: v5e
topology: v5e:2x2
jax: 0.10.0
libtpu: 0.0.40
codegen_flags: <defaults>
</compile_context>

<pallas_src>
import functools

import jax
import jax.numpy as jnp
import numpy as np
from jax.experimental import pallas as pl
from jax.experimental.pallas import tpu as pltpu

# ---- model hyperparameters (from the PyTorch module) ------------------------
INPUT_SIZE = 20
HIDDEN_SIZE = 64
NUM_LAYERS = 2
OUTPUT_SIZE = 4

# small test shapes
BATCH = 2
SEQ = 8

BP = 8          # batch padded to the f32 sublane granule
OUT_PAD = 128   # lane-dense FC output width


# ---- Pallas kernel -----------------------------------------------------------
def lstm_kernel(x_ref, st_ref, wa_ref, wb_ref, wc_ref,
                out_ref, stn_ref,
                xproj_scr, h1_scr):
    """Single invocation: full 2-layer LSTM sequence (wavefront-fused) + FC head.

    x_ref   : (T*Bp, D+1)   time-major, batch-padded, ones-column appended
    st_ref  : (4, Bp, H)    [h0_l0, h0_l1, c0_l0, c0_l1]
    wa_ref  : (D+1, 8H)     [W0x;b0] in layer-0 gate columns, [0;b1] in layer-1 cols
    wb_ref  : (2H, 8H)      combined recurrent weight [[W0h, W1_ih],[0, W1_hh]]
                            (gate columns interleaved: i0 i1 f0 f1 o0 o1 g0 g1)
    wc_ref  : (2H+1, 128)   rows 0:H zero, rows H:2H = wfc (padded), row 2H = bfc
    out_ref : (T*Bp, 128)
    stn_ref : (4, Bp, H)    [hn_l0, hn_l1, cn_l0, cn_l1]
    """
    H = HIDDEN_SIZE
    H2 = 2 * H
    Bp = st_ref.shape[1]
    T = x_ref.shape[0] // Bp

    # Layer-0 input projection (+b0) and broadcast b1, for every timestep, one matmul.
    xproj_scr[...] = jnp.dot(x_ref[...], wa_ref[...],
                             preferred_element_type=jnp.float32)       # (T*Bp, 8H)

    # Wavefront carries: hbuf = [h0 | h1], cbuf = [c0 | c1]  -- (Bp, 2H), one vreg each.
    hbuf = jnp.concatenate([st_ref[0], st_ref[1]], axis=-1)
    cbuf = jnp.concatenate([st_ref[2], st_ref[3]], axis=-1)

    # Lane mask selecting the layer-0 half (used only at wavefront step 0).
    left_mask = jax.lax.broadcasted_iota(jnp.int32, (Bp, H2), 1) < H

    # Wavefront steps s = 0..T (T is small & static -> fully unrolled):
    #   step s produces layer-0 state for time s and layer-1 state for time s-1.
    for s in range(T + 1):
        idx = s if s < T else T - 1  # at s==T only the layer-1 (b1) half matters
        gates = jnp.dot(hbuf, wb_ref[...],
                        preferred_element_type=jnp.float32)            # (Bp, 8H)
        gates = gates + xproj_scr[pl.ds(idx * Bp, Bp), :]

        # Activations on 128-lane-aligned tiles: sigmoid over [I|F|O], tanh over [G].
        sg = jax.nn.sigmoid(gates[:, 0:3 * H2])
        g_t = jnp.tanh(gates[:, 3 * H2:4 * H2])
        i_g = sg[:, 0:H2]
        f_g = sg[:, H2:2 * H2]
        o_g = sg[:, 2 * H2:3 * H2]

        c_new = f_g * cbuf + i_g * g_t
        h_new = o_g * jnp.tanh(c_new)

        if s == 0:
            # Layer-1 half is bogus at the first wavefront step; keep its init state.
            hbuf = jnp.where(left_mask, h_new, hbuf)
            cbuf = jnp.where(left_mask, c_new, cbuf)
        elif s < T:
            h1_scr[pl.ds((s - 1) * Bp, Bp), :] = h_new   # full (8,128) aligned store
            hbuf = h_new
            cbuf = c_new
        else:  # s == T : only the layer-1 half (time T-1) is real
            h1_scr[pl.ds((T - 1) * Bp, Bp), :] = h_new
            stn_ref[0] = hbuf[:, 0:H]       # h_n layer 0  (= h0_{T-1}, pre-step)
            stn_ref[1] = h_new[:, H:H2]     # h_n layer 1
            stn_ref[2] = cbuf[:, 0:H]       # c_n layer 0
            stn_ref[3] = c_new[:, H:H2]     # c_n layer 1

    # FC head hoisted out of the loop: one matmul + one lane-dense store.
    # Rows 0:H of wc are zero, so the h0 half of the scratch contributes nothing.
    out_ref[...] = (jnp.dot(h1_scr[...], wc_ref[0:H2, :],
                            preferred_element_type=jnp.float32)
                    + wc_ref[H2:H2 + 1, :])


# ---- one-time weight packing (outside the per-call jit path) ------------------
def prepare_params(params):
    """Pack PyTorch-layout weights into the 3 kernel buffers."""
    (wih0, whh0, b0), (wih1, whh1, b1), (wfc, bfc) = params
    H, D, O = HIDDEN_SIZE, INPUT_SIZE, OUTPUT_SIZE
    zD = jnp.zeros((D, H), jnp.float32)
    zH = jnp.zeros((H, H), jnp.float32)

    blocks_a, blocks_b = [], []
    # PyTorch gate order is (i, f, g, o); kernel column order is i, f, o, g with the
    # two layers interleaved inside each 128-wide gate block.
    for k in (0, 1, 3, 2):
        sl = slice(k * H, (k + 1) * H)
        # layer-0 sub-block, then layer-1 sub-block
        blocks_a.append(jnp.concatenate([wih0[:, sl], b0[:, sl]], axis=0))      # (D+1, H)
        blocks_a.append(jnp.concatenate([zD, b1[:, sl]], axis=0))               # (D+1, H)
        blocks_b.append(jnp.concatenate([whh0[:, sl], zH], axis=0))             # (2H, H)
        blocks_b.append(jnp.concatenate([wih1[:, sl], whh1[:, sl]], axis=0))    # (2H, H)

    w_a = jnp.concatenate(blocks_a, axis=1)          # (D+1, 8H)
    w_b = jnp.concatenate(blocks_b, axis=1)          # (2H, 8H)

    w_c = jnp.zeros((2 * H + 1, OUT_PAD), jnp.float32)
    w_c = w_c.at[H:2 * H, :O].set(wfc)               # rows 0:H stay zero (kill h0 half)
    w_c = w_c.at[2 * H, :O].set(bfc[0])
    return (w_a, w_b, w_c)


# ---- wrapper -------------------------------------------------------------------
def lstm_model_forward(x, hidden_state, prepped):
    """x: (B, T, input_size); hidden_state: (h0, c0) each (L, B, H).

    Returns (out, (h_n, c_n)) matching the PyTorch module.
    """
    w_a, w_b, w_c = prepped
    h0, c0 = hidden_state
    B, T, D = x.shape
    L, _, H = h0.shape
    O = OUTPUT_SIZE
    Bp = BP

    # Time-major, batch-padded to the sublane granule, ones column folds the biases.
    xt = jnp.transpose(x, (1, 0, 2))                                   # (T, B, D)
    xt = jnp.pad(xt, ((0, 0), (0, Bp - B), (0, 0)))                    # (T, Bp, D)
    ones = jnp.ones((T, Bp, 1), x.dtype)
    x_aug = jnp.concatenate([xt, ones], axis=-1).reshape(T * Bp, D + 1)

    st = jnp.concatenate([h0, c0], axis=0)                             # (2L, B, H)
    st = jnp.pad(st, ((0, 0), (0, Bp - B), (0, 0)))                    # (2L, Bp, H)

    vmem = pl.BlockSpec(memory_space=pltpu.MemorySpace.VMEM)
    out_flat, stn = pl.pallas_call(
        lstm_kernel,
        out_shape=(
            jax.ShapeDtypeStruct((T * Bp, OUT_PAD), jnp.float32),
            jax.ShapeDtypeStruct((2 * L, Bp, H), jnp.float32),
        ),
        in_specs=[vmem] * 5,
        out_specs=(vmem, vmem),
        scratch_shapes=[
            pltpu.VMEM((T * Bp, 8 * H), jnp.float32),   # xproj (+ biases) per step
            pltpu.VMEM((T * Bp, 2 * H), jnp.float32),   # per-step [h0|h1] rows
        ],
    )(x_aug, st, w_a, w_b, w_c)

    out = out_flat.reshape(T, Bp, OUT_PAD)[:, :B, :O]                  # (T, B, O)
    out = jnp.transpose(out, (1, 0, 2))                                # (B, T, O)
    h_n = stn[0:L, :B, :]
    c_n = stn[L:2 * L, :B, :]
    return out, (h_n, c_n)


# ---- pure-JAX reference (for correctness check) ------------------------------
def lstm_model_ref(x, hidden_state, params):
    h0, c0 = hidden_state
    layer_params = params[:2]
    wfc, bfc = params[2]
    H = HIDDEN_SIZE
    h = [h0[l] for l in range(NUM_LAYERS)]
    c = [c0[l] for l in range(NUM_LAYERS)]
    outs = []
    for t in range(x.shape[1]):
        inp = x[:, t, :]
        for l, (wih, whh, b) in enumerate(layer_params):
            gates = inp @ wih + h[l] @ whh + b
            i = jax.nn.sigmoid(gates[:, 0:H])
            f = jax.nn.sigmoid(gates[:, H:2 * H])
            g = jnp.tanh(gates[:, 2 * H:3 * H])
            o = jax.nn.sigmoid(gates[:, 3 * H:4 * H])
            c[l] = f * c[l] + i * g
            h[l] = o * jnp.tanh(c[l])
            inp = h[l]
        outs.append(inp @ wfc + bfc)
    out = jnp.stack(outs, axis=1)
    return out, (jnp.stack(h, axis=0), jnp.stack(c, axis=0))


# ---- deterministic parameter init (PyTorch-style uniform(-1/sqrt(H), 1/sqrt(H)))
def init_params(key):
    H, D, O = HIDDEN_SIZE, INPUT_SIZE, OUTPUT_SIZE
    bound = 1.0 / np.sqrt(H)
    ks = jax.random.split(key, 8)
    u = lambda k, shape: jax.random.uniform(k, shape, jnp.float32, -bound, bound)
    # layer 0 (gate order i, f, g, o — PyTorch convention); biases folded (b_ih+b_hh)
    wih0 = u(ks[0], (D, 4 * H))
    whh0 = u(ks[1], (H, 4 * H))
    b0 = u(ks[2], (1, 4 * H))
    # layer 1
    wih1 = u(ks[3], (H, 4 * H))
    whh1 = u(ks[4], (H, 4 * H))
    b1 = u(ks[5], (1, 4 * H))
    # fc
    wfc = u(ks[6], (H, O))
    bfc = u(ks[7], (1, O))
    return ((wih0, whh0, b0), (wih1, whh1, b1), (wfc, bfc))


if __name__ == "__main__":
    key = jax.random.PRNGKey(0)
    k_param, k_x = jax.random.split(key)

    params = init_params(k_param)
    prepped = prepare_params(params)          # one-time packing, outside the jit path
    x = jax.random.normal(k_x, (BATCH, SEQ, INPUT_SIZE), jnp.float32)

    # init_hidden equivalent
    h0 = jnp.zeros((NUM_LAYERS, BATCH, HIDDEN_SIZE), jnp.float32)
    c0 = jnp.zeros((NUM_LAYERS, BATCH, HIDDEN_SIZE), jnp.float32)

    fwd = jax.jit(functools.partial(lstm_model_forward, prepped=prepped))
    out, (h_n, c_n) = jax.block_until_ready(fwd(x, (h0, c0)))

    out_ref, (h_ref, c_ref) = lstm_model_ref(x, (h0, c0), params)

    assert out.shape == (BATCH, SEQ, OUTPUT_SIZE)
    assert h_n.shape == (NUM_LAYERS, BATCH, HIDDEN_SIZE)
    assert c_n.shape == (NUM_LAYERS, BATCH, HIDDEN_SIZE)
    np.testing.assert_allclose(np.asarray(out), np.asarray(out_ref), atol=1e-4, rtol=1e-4)
    np.testing.assert_allclose(np.asarray(h_n), np.asarray(h_ref), atol=1e-4, rtol=1e-4)
    np.testing.assert_allclose(np.asarray(c_n), np.asarray(c_ref), atol=1e-4, rtol=1e-4)

    print("KERNEL_OK")
</pallas_src>

<mosaic_0001>
module attributes {stable_mosaic.version = 11 : i64} {
  func.func @lstm_kernel(%arg0: memref<64x21xf32, #tpu.memory_space<vmem>>, %arg1: memref<4x8x64xf32, #tpu.memory_space<vmem>>, %arg2: memref<21x512xf32, #tpu.memory_space<vmem>>, %arg3: memref<128x512xf32, #tpu.memory_space<vmem>>, %arg4: memref<129x128xf32, #tpu.memory_space<vmem>>, %arg5: memref<64x128xf32, #tpu.memory_space<vmem>>, %arg6: memref<4x8x64xf32, #tpu.memory_space<vmem>>, %arg7: memref<64x512xf32, #tpu.memory_space<vmem>>, %arg8: memref<64x128xf32, #tpu.memory_space<vmem>>) attributes {dimension_semantics = [], scalar_prefetch = 0 : i64, scratch_operands = 2 : i64, tpu.core_type = #tpu.core_type<tc>} {
    %c0 = arith.constant 0 : index
    %c0_0 = arith.constant 0 : index
    %0 = vector.load %arg0[%c0, %c0_0] : memref<64x21xf32, #tpu.memory_space<vmem>>, vector<64x21xf32>
    %c0_1 = arith.constant 0 : index
    %c0_2 = arith.constant 0 : index
    %1 = vector.load %arg2[%c0_1, %c0_2] : memref<21x512xf32, #tpu.memory_space<vmem>>, vector<21x512xf32>
    %cst = arith.constant dense<0.000000e+00> : vector<64x512xf32>
    %2 = tpu.matmul %0, %1, %cst {dimension_numbers = #tpu.dot_dimension_numbers<[1], [0], [0], [1], [0, 0, 1, 1], [], []>} : vector<64x21xf32>, vector<21x512xf32>, vector<64x512xf32> -> vector<64x512xf32>
    %c0_3 = arith.constant 0 : index
    %c0_4 = arith.constant 0 : index
    %3 = vector.load %arg7[%c0_3, %c0_4] : memref<64x512xf32, #tpu.memory_space<vmem>>, vector<64x512xf32>
    tpu.vector_store %arg7[%c0_3, %c0_4], %2 {strides = array<i32>} : memref<64x512xf32, #tpu.memory_space<vmem>>, vector<64x512xf32>,
    %c0_5 = arith.constant 0 : index
    %c0_6 = arith.constant 0 : index
    %c0_7 = arith.constant 0 : index
    %4 = vector.load %arg1[%c0_5, %c0_6, %c0_7] : memref<4x8x64xf32, #tpu.memory_space<vmem>>, vector<1x8x64xf32>
    %5 = vector.shape_cast %4 : vector<1x8x64xf32> to vector<8x64xf32>
    %c1 = arith.constant 1 : index
    %c0_8 = arith.constant 0 : index
    %c0_9 = arith.constant 0 : index
    %6 = vector.load %arg1[%c1, %c0_8, %c0_9] : memref<4x8x64xf32, #tpu.memory_space<vmem>>, vector<1x8x64xf32>
    %7 = vector.shape_cast %6 : vector<1x8x64xf32> to vector<8x64xf32>
    %8 = tpu.concatenate %5, %7 in 1 : vector<8x64xf32>, vector<8x64xf32> -> vector<8x128xf32>
    %c2 = arith.constant 2 : index
    %c0_10 = arith.constant 0 : index
    %c0_11 = arith.constant 0 : index
    %9 = vector.load %arg1[%c2, %c0_10, %c0_11] : memref<4x8x64xf32, #tpu.memory_space<vmem>>, vector<1x8x64xf32>
    %10 = vector.shape_cast %9 : vector<1x8x64xf32> to vector<8x64xf32>
    %c3 = arith.constant 3 : index
    %c0_12 = arith.constant 0 : index
    %c0_13 = arith.constant 0 : index
    %11 = vector.load %arg1[%c3, %c0_12, %c0_13] : memref<4x8x64xf32, #tpu.memory_space<vmem>>, vector<1x8x64xf32>
    %12 = vector.shape_cast %11 : vector<1x8x64xf32> to vector<8x64xf32>
    %13 = tpu.concatenate %10, %12 in 1 : vector<8x64xf32>, vector<8x64xf32> -> vector<8x128xf32>
    %14 = tpu.iota {dimensions = array<i32: 1>} : vector<8x128xi32>
    %c64_i32 = arith.constant 64 : i32
    %15 = vector.broadcast %c64_i32 : i32 to vector<8x128xi32>
    %16 = arith.cmpi slt, %14, %15 : vector<8x128xi32>
    %c0_14 = arith.constant 0 : index
    %c0_15 = arith.constant 0 : index
    %17 = vector.load %arg3[%c0_14, %c0_15] : memref<128x512xf32, #tpu.memory_space<vmem>>, vector<128x512xf32>
    %cst_16 = arith.constant dense<0.000000e+00> : vector<8x512xf32>
    %18 = tpu.matmul %8, %17, %cst_16 {dimension_numbers = #tpu.dot_dimension_numbers<[1], [0], [0], [1], [0, 0, 1, 1], [], []>} : vector<8x128xf32>, vector<128x512xf32>, vector<8x512xf32> -> vector<8x512xf32>
    %c0_17 = arith.constant 0 : index
    %c0_18 = arith.constant 0 : index
    %19 = vector.load %arg7[%c0_17, %c0_18] : memref<64x512xf32, #tpu.memory_space<vmem>>, vector<8x512xf32>
    %20 = arith.addf %18, %19 : vector<8x512xf32>
    %21 = vector.extract_strided_slice %20 {offsets = [0, 0], sizes = [8, 384], strides = [1, 1]} : vector<8x512xf32> to vector<8x384xf32>
    %22 = arith.negf %21 : vector<8x384xf32>
    %23 = math.exp %22 : vector<8x384xf32>
    %cst_19 = arith.constant 1.000000e+00 : f32
    %24 = vector.broadcast %cst_19 : f32 to vector<8x384xf32>
    %25 = arith.addf %24, %23 : vector<8x384xf32>
    %26 = arith.divf %24, %25 : vector<8x384xf32>
    %27 = vector.extract_strided_slice %20 {offsets = [0, 384], sizes = [8, 128], strides = [1, 1]} : vector<8x512xf32> to vector<8x128xf32>
    %28 = math.tanh %27 : vector<8x128xf32>
    %29 = vector.extract_strided_slice %26 {offsets = [0, 0], sizes = [8, 128], strides = [1, 1]} : vector<8x384xf32> to vector<8x128xf32>
    %30 = vector.extract_strided_slice %26 {offsets = [0, 128], sizes = [8, 128], strides = [1, 1]} : vector<8x384xf32> to vector<8x128xf32>
    %31 = vector.extract_strided_slice %26 {offsets = [0, 256], sizes = [8, 128], strides = [1, 1]} : vector<8x384xf32> to vector<8x128xf32>
    %32 = arith.mulf %30, %13 : vector<8x128xf32>
    %33 = arith.mulf %29, %28 : vector<8x128xf32>
    %34 = arith.addf %32, %33 : vector<8x128xf32>
    %35 = math.tanh %34 : vector<8x128xf32>
    %36 = arith.mulf %31, %35 : vector<8x128xf32>
    %37 = arith.select %16, %36, %8 : vector<8x128xi1>, vector<8x128xf32>
    %38 = arith.select %16, %34, %13 : vector<8x128xi1>, vector<8x128xf32>
    %c0_20 = arith.constant 0 : index
    %c0_21 = arith.constant 0 : index
    %39 = vector.load %arg3[%c0_20, %c0_21] : memref<128x512xf32, #tpu.memory_space<vmem>>, vector<128x512xf32>
    %cst_22 = arith.constant dense<0.000000e+00> : vector<8x512xf32>
    %40 = tpu.matmul %37, %39, %cst_22 {dimension_numbers = #tpu.dot_dimension_numbers<[1], [0], [0], [1], [0, 0, 1, 1], [], []>} : vector<8x128xf32>, vector<128x512xf32>, vector<8x512xf32> -> vector<8x512xf32>
    %c8 = arith.constant 8 : index
    %c0_23 = arith.constant 0 : index
    %41 = vector.load %arg7[%c8, %c0_23] : memref<64x512xf32, #tpu.memory_space<vmem>>, vector<8x512xf32>
    %42 = arith.addf %40, %41 : vector<8x512xf32>
    %43 = vector.extract_strided_slice %42 {offsets = [0, 0], sizes = [8, 384], strides = [1, 1]} : vector<8x512xf32> to vector<8x384xf32>
    %44 = arith.negf %43 : vector<8x384xf32>
    %45 = math.exp %44 : vector<8x384xf32>
    %cst_24 = arith.constant 1.000000e+00 : f32
    %46 = vector.broadcast %cst_24 : f32 to vector<8x384xf32>
    %47 = arith.addf %46, %45 : vector<8x384xf32>
    %48 = arith.divf %46, %47 : vector<8x384xf32>
    %49 = vector.extract_strided_slice %42 {offsets = [0, 384], sizes = [8, 128], strides = [1, 1]} : vector<8x512xf32> to vector<8x128xf32>
    %50 = math.tanh %49 : vector<8x128xf32>
    %51 = vector.extract_strided_slice %48 {offsets = [0, 0], sizes = [8, 128], strides = [1, 1]} : vector<8x384xf32> to vector<8x128xf32>
    %52 = vector.extract_strided_slice %48 {offsets = [0, 128], sizes = [8, 128], strides = [1, 1]} : vector<8x384xf32> to vector<8x128xf32>
    %53 = vector.extract_strided_slice %48 {offsets = [0, 256], sizes = [8, 128], strides = [1, 1]} : vector<8x384xf32> to vector<8x128xf32>
    %54 = arith.mulf %52, %38 : vector<8x128xf32>
    %55 = arith.mulf %51, %50 : vector<8x128xf32>
    %56 = arith.addf %54, %55 : vector<8x128xf32>
    %57 = math.tanh %56 : vector<8x128xf32>
    %58 = arith.mulf %53, %57 : vector<8x128xf32>
    %c0_25 = arith.constant 0 : index
    %c0_26 = arith.constant 0 : index
    %59 = vector.load %arg8[%c0_25, %c0_26] : memref<64x128xf32, #tpu.memory_space<vmem>>, vector<8x128xf32>
    tpu.vector_store %arg8[%c0_25, %c0_26], %58 {strides = array<i32>} : memref<64x128xf32, #tpu.memory_space<vmem>>, vector<8x128xf32>,
    %c0_27 = arith.constant 0 : index
    %c0_28 = arith.constant 0 : index
    %60 = vector.load %arg3[%c0_27, %c0_28] : memref<128x512xf32, #tpu.memory_space<vmem>>, vector<128x512xf32>
    %cst_29 = arith.constant dense<0.000000e+00> : vector<8x512xf32>
    %61 = tpu.matmul %58, %60, %cst_29 {dimension_numbers = #tpu.dot_dimension_numbers<[1], [0], [0], [1], [0, 0, 1, 1], [], []>} : vector<8x128xf32>, vector<128x512xf32>, vector<8x512xf32> -> vector<8x512xf32>
    %c16 = arith.constant 16 : index
    %c0_30 = arith.constant 0 : index
    %62 = vector.load %arg7[%c16, %c0_30] : memref<64x512xf32, #tpu.memory_space<vmem>>, vector<8x512xf32>
    %63 = arith.addf %61, %62 : vector<8x512xf32>
    %64 = vector.extract_strided_slice %63 {offsets = [0, 0], sizes = [8, 384], strides = [1, 1]} : vector<8x512xf32> to vector<8x384xf32>
    %65 = arith.negf %64 : vector<8x384xf32>
    %66 = math.exp %65 : vector<8x384xf32>
    %cst_31 = arith.constant 1.000000e+00 : f32
    %67 = vector.broadcast %cst_31 : f32 to vector<8x384xf32>
    %68 = arith.addf %67, %66 : vector<8x384xf32>
    %69 = arith.divf %67, %68 : vector<8x384xf32>
    %70 = vector.extract_strided_slice %63 {offsets = [0, 384], sizes = [8, 128], strides = [1, 1]} : vector<8x512xf32> to vector<8x128xf32>
    %71 = math.tanh %70 : vector<8x128xf32>
    %72 = vector.extract_strided_slice %69 {offsets = [0, 0], sizes = [8, 128], strides = [1, 1]} : vector<8x384xf32> to vector<8x128xf32>
    %73 = vector.extract_strided_slice %69 {offsets = [0, 128], sizes = [8, 128], strides = [1, 1]} : vector<8x384xf32> to vector<8x128xf32>
    %74 = vector.extract_strided_slice %69 {offsets = [0, 256], sizes = [8, 128], strides = [1, 1]} : vector<8x384xf32> to vector<8x128xf32>
    %75 = arith.mulf %73, %56 : vector<8x128xf32>
    %76 = arith.mulf %72, %71 : vector<8x128xf32>
    %77 = arith.addf %75, %76 : vector<8x128xf32>
    %78 = math.tanh %77 : vector<8x128xf32>
    %79 = arith.mulf %74, %78 : vector<8x128xf32>
    %c8_32 = arith.constant 8 : index
    %c0_33 = arith.constant 0 : index
    %80 = vector.load %arg8[%c8_32, %c0_33] : memref<64x128xf32, #tpu.memory_space<vmem>>, vector<8x128xf32>
    tpu.vector_store %arg8[%c8_32, %c0_33], %79 {strides = array<i32>} : memref<64x128xf32, #tpu.memory_space<vmem>>, vector<8x128xf32>,
    %c0_34 = arith.constant 0 : index
    %c0_35 = arith.constant 0 : index
    %81 = vector.load %arg3[%c0_34, %c0_35] : memref<128x512xf32, #tpu.memory_space<vmem>>, vector<128x512xf32>
    %cst_36 = arith.constant dense<0.000000e+00> : vector<8x512xf32>
    %82 = tpu.matmul %79, %81, %cst_36 {dimension_numbers = #tpu.dot_dimension_numbers<[1], [0], [0], [1], [0, 0, 1, 1], [], []>} : vector<8x128xf32>, vector<128x512xf32>, vector<8x512xf32> -> vector<8x512xf32>
    %c24 = arith.constant 24 : index
    %c0_37 = arith.constant 0 : index
    %83 = vector.load %arg7[%c24, %c0_37] : memref<64x512xf32, #tpu.memory_space<vmem>>, vector<8x512xf32>
    %84 = arith.addf %82, %83 : vector<8x512xf32>
    %85 = vector.extract_strided_slice %84 {offsets = [0, 0], sizes = [8, 384], strides = [1, 1]} : vector<8x512xf32> to vector<8x384xf32>
    %86 = arith.negf %85 : vector<8x384xf32>
    %87 = math.exp %86 : vector<8x384xf32>
    %cst_38 = arith.constant 1.000000e+00 : f32
    %88 = vector.broadcast %cst_38 : f32 to vector<8x384xf32>
    %89 = arith.addf %88, %87 : vector<8x384xf32>
    %90 = arith.divf %88, %89 : vector<8x384xf32>
    %91 = vector.extract_strided_slice %84 {offsets = [0, 384], sizes = [8, 128], strides = [1, 1]} : vector<8x512xf32> to vector<8x128xf32>
    %92 = math.tanh %91 : vector<8x128xf32>
    %93 = vector.extract_strided_slice %90 {offsets = [0, 0], sizes = [8, 128], strides = [1, 1]} : vector<8x384xf32> to vector<8x128xf32>
    %94 = vector.extract_strided_slice %90 {offsets = [0, 128], sizes = [8, 128], strides = [1, 1]} : vector<8x384xf32> to vector<8x128xf32>
    %95 = vector.extract_strided_slice %90 {offsets = [0, 256], sizes = [8, 128], strides = [1, 1]} : vector<8x384xf32> to vector<8x128xf32>
    %96 = arith.mulf %94, %77 : vector<8x128xf32>
    %97 = arith.mulf %93, %92 : vector<8x128xf32>
    %98 = arith.addf %96, %97 : vector<8x128xf32>
    %99 = math.tanh %98 : vector<8x128xf32>
    %100 = arith.mulf %95, %99 : vector<8x128xf32>
    %c16_39 = arith.constant 16 : index
    %c0_40 = arith.constant 0 : index
    %101 = vector.load %arg8[%c16_39, %c0_40] : memref<64x128xf32, #tpu.memory_space<vmem>>, vector<8x128xf32>
    tpu.vector_store %arg8[%c16_39, %c0_40], %100 {strides = array<i32>} : memref<64x128xf32, #tpu.memory_space<vmem>>, vector<8x128xf32>,
    %c0_41 = arith.constant 0 : index
    %c0_42 = arith.constant 0 : index
    %102 = vector.load %arg3[%c0_41, %c0_42] : memref<128x512xf32, #tpu.memory_space<vmem>>, vector<128x512xf32>
    %cst_43 = arith.constant dense<0.000000e+00> : vector<8x512xf32>
    %103 = tpu.matmul %100, %102, %cst_43 {dimension_numbers = #tpu.dot_dimension_numbers<[1], [0], [0], [1], [0, 0, 1, 1], [], []>} : vector<8x128xf32>, vector<128x512xf32>, vector<8x512xf32> -> vector<8x512xf32>
    %c32 = arith.constant 32 : index
    %c0_44 = arith.constant 0 : index
    %104 = vector.load %arg7[%c32, %c0_44] : memref<64x512xf32, #tpu.memory_space<vmem>>, vector<8x512xf32>
    %105 = arith.addf %103, %104 : vector<8x512xf32>
    %106 = vector.extract_strided_slice %105 {offsets = [0, 0], sizes = [8, 384], strides = [1, 1]} : vector<8x512xf32> to vector<8x384xf32>
    %107 = arith.negf %106 : vector<8x384xf32>
    %108 = math.exp %107 : vector<8x384xf32>
    %cst_45 = arith.constant 1.000000e+00 : f32
    %109 = vector.broadcast %cst_45 : f32 to vector<8x384xf32>
    %110 = arith.addf %109, %108 : vector<8x384xf32>
    %111 = arith.divf %109, %110 : vector<8x384xf32>
    %112 = vector.extract_strided_slice %105 {offsets = [0, 384], sizes = [8, 128], strides = [1, 1]} : vector<8x512xf32> to vector<8x128xf32>
    %113 = math.tanh %112 : vector<8x128xf32>
    %114 = vector.extract_strided_slice %111 {offsets = [0, 0], sizes = [8, 128], strides = [1, 1]} : vector<8x384xf32> to vector<8x128xf32>
    %115 = vector.extract_strided_slice %111 {offsets = [0, 128], sizes = [8, 128], strides = [1, 1]} : vector<8x384xf32> to vector<8x128xf32>
    %116 = vector.extract_strided_slice %111 {offsets = [0, 256], sizes = [8, 128], strides = [1, 1]} : vector<8x384xf32> to vector<8x128xf32>
    %117 = arith.mulf %115, %98 : vector<8x128xf32>
    %118 = arith.mulf %114, %113 : vector<8x128xf32>
    %119 = arith.addf %117, %118 : vector<8x128xf32>
    %120 = math.tanh %119 : vector<8x128xf32>
    %121 = arith.mulf %116, %120 : vector<8x128xf32>
    %c24_46 = arith.constant 24 : index
    %c0_47 = arith.constant 0 : index
    %122 = vector.load %arg8[%c24_46, %c0_47] : memref<64x128xf32, #tpu.memory_space<vmem>>, vector<8x128xf32>
    tpu.vector_store %arg8[%c24_46, %c0_47], %121 {strides = array<i32>} : memref<64x128xf32, #tpu.memory_space<vmem>>, vector<8x128xf32>,
    %c0_48 = arith.constant 0 : index
    %c0_49 = arith.constant 0 : index
    %123 = vector.load %arg3[%c0_48, %c0_49] : memref<128x512xf32, #tpu.memory_space<vmem>>, vector<128x512xf32>
    %cst_50 = arith.constant dense<0.000000e+00> : vector<8x512xf32>
    %124 = tpu.matmul %121, %123, %cst_50 {dimension_numbers = #tpu.dot_dimension_numbers<[1], [0], [0], [1], [0, 0, 1, 1], [], []>} : vector<8x128xf32>, vector<128x512xf32>, vector<8x512xf32> -> vector<8x512xf32>
    %c40 = arith.constant 40 : index
    %c0_51 = arith.constant 0 : index
    %125 = vector.load %arg7[%c40, %c0_51] : memref<64x512xf32, #tpu.memory_space<vmem>>, vector<8x512xf32>
    %126 = arith.addf %124, %125 : vector<8x512xf32>
    %127 = vector.extract_strided_slice %126 {offsets = [0, 0], sizes = [8, 384], strides = [1, 1]} : vector<8x512xf32> to vector<8x384xf32>
    %128 = arith.negf %127 : vector<8x384xf32>
    %129 = math.exp %128 : vector<8x384xf32>
    %cst_52 = arith.constant 1.000000e+00 : f32
    %130 = vector.broadcast %cst_52 : f32 to vector<8x384xf32>
    %131 = arith.addf %130, %129 : vector<8x384xf32>
    %132 = arith.divf %130, %131 : vector<8x384xf32>
    %133 = vector.extract_strided_slice %126 {offsets = [0, 384], sizes = [8, 128], strides = [1, 1]} : vector<8x512xf32> to vector<8x128xf32>
    %134 = math.tanh %133 : vector<8x128xf32>
    %135 = vector.extract_strided_slice %132 {offsets = [0, 0], sizes = [8, 128], strides = [1, 1]} : vector<8x384xf32> to vector<8x128xf32>
    %136 = vector.extract_strided_slice %132 {offsets = [0, 128], sizes = [8, 128], strides = [1, 1]} : vector<8x384xf32> to vector<8x128xf32>
    %137 = vector.extract_strided_slice %132 {offsets = [0, 256], sizes = [8, 128], strides = [1, 1]} : vector<8x384xf32> to vector<8x128xf32>
    %138 = arith.mulf %136, %119 : vector<8x128xf32>
    %139 = arith.mulf %135, %134 : vector<8x128xf32>
    %140 = arith.addf %138, %139 : vector<8x128xf32>
    %141 = math.tanh %140 : vector<8x128xf32>
    %142 = arith.mulf %137, %141 : vector<8x128xf32>
    %c32_53 = arith.constant 32 : index
    %c0_54 = arith.constant 0 : index
    %143 = vector.load %arg8[%c32_53, %c0_54] : memref<64x128xf32, #tpu.memory_space<vmem>>, vector<8x128xf32>
    tpu.vector_store %arg8[%c32_53, %c0_54], %142 {strides = array<i32>} : memref<64x128xf32, #tpu.memory_space<vmem>>, vector<8x128xf32>,
    %c0_55 = arith.constant 0 : index
    %c0_56 = arith.constant 0 : index
    %144 = vector.load %arg3[%c0_55, %c0_56] : memref<128x512xf32, #tpu.memory_space<vmem>>, vector<128x512xf32>
    %cst_57 = arith.constant dense<0.000000e+00> : vector<8x512xf32>
    %145 = tpu.matmul %142, %144, %cst_57 {dimension_numbers = #tpu.dot_dimension_numbers<[1], [0], [0], [1], [0, 0, 1, 1], [], []>} : vector<8x128xf32>, vector<128x512xf32>, vector<8x512xf32> -> vector<8x512xf32>
    %c48 = arith.constant 48 : index
    %c0_58 = arith.constant 0 : index
    %146 = vector.load %arg7[%c48, %c0_58] : memref<64x512xf32, #tpu.memory_space<vmem>>, vector<8x512xf32>
    %147 = arith.addf %145, %146 : vector<8x512xf32>
    %148 = vector.extract_strided_slice %147 {offsets = [0, 0], sizes = [8, 384], strides = [1, 1]} : vector<8x512xf32> to vector<8x384xf32>
    %149 = arith.negf %148 : vector<8x384xf32>
    %150 = math.exp %149 : vector<8x384xf32>
    %cst_59 = arith.constant 1.000000e+00 : f32
    %151 = vector.broadcast %cst_59 : f32 to vector<8x384xf32>
    %152 = arith.addf %151, %150 : vector<8x384xf32>
    %153 = arith.divf %151, %152 : vector<8x384xf32>
    %154 = vector.extract_strided_slice %147 {offsets = [0, 384], sizes = [8, 128], strides = [1, 1]} : vector<8x512xf32> to vector<8x128xf32>
    %155 = math.tanh %154 : vector<8x128xf32>
    %156 = vector.extract_strided_slice %153 {offsets = [0, 0], sizes = [8, 128], strides = [1, 1]} : vector<8x384xf32> to vector<8x128xf32>
    %157 = vector.extract_strided_slice %153 {offsets = [0, 128], sizes = [8, 128], strides = [1, 1]} : vector<8x384xf32> to vector<8x128xf32>
    %158 = vector.extract_strided_slice %153 {offsets = [0, 256], sizes = [8, 128], strides = [1, 1]} : vector<8x384xf32> to vector<8x128xf32>
    %159 = arith.mulf %157, %140 : vector<8x128xf32>
    %160 = arith.mulf %156, %155 : vector<8x128xf32>
    %161 = arith.addf %159, %160 : vector<8x128xf32>
    %162 = math.tanh %161 : vector<8x128xf32>
    %163 = arith.mulf %158, %162 : vector<8x128xf32>
    %c40_60 = arith.constant 40 : index
    %c0_61 = arith.constant 0 : index
    %164 = vector.load %arg8[%c40_60, %c0_61] : memref<64x128xf32, #tpu.memory_space<vmem>>, vector<8x128xf32>
    tpu.vector_store %arg8[%c40_60, %c0_61], %163 {strides = array<i32>} : memref<64x128xf32, #tpu.memory_space<vmem>>, vector<8x128xf32>,
    %c0_62 = arith.constant 0 : index
    %c0_63 = arith.constant 0 : index
    %165 = vector.load %arg3[%c0_62, %c0_63] : memref<128x512xf32, #tpu.memory_space<vmem>>, vector<128x512xf32>
    %cst_64 = arith.constant dense<0.000000e+00> : vector<8x512xf32>
    %166 = tpu.matmul %163, %165, %cst_64 {dimension_numbers = #tpu.dot_dimension_numbers<[1], [0], [0], [1], [0, 0, 1, 1], [], []>} : vector<8x128xf32>, vector<128x512xf32>, vector<8x512xf32> -> vector<8x512xf32>
    %c56 = arith.constant 56 : index
    %c0_65 = arith.constant 0 : index
    %167 = vector.load %arg7[%c56, %c0_65] : memref<64x512xf32, #tpu.memory_space<vmem>>, vector<8x512xf32>
    %168 = arith.addf %166, %167 : vector<8x512xf32>
    %169 = vector.extract_strided_slice %168 {offsets = [0, 0], sizes = [8, 384], strides = [1, 1]} : vector<8x512xf32> to vector<8x384xf32>
    %170 = arith.negf %169 : vector<8x384xf32>
    %171 = math.exp %170 : vector<8x384xf32>
    %cst_66 = arith.constant 1.000000e+00 : f32
    %172 = vector.broadcast %cst_66 : f32 to vector<8x384xf32>
    %173 = arith.addf %172, %171 : vector<8x384xf32>
    %174 = arith.divf %172, %173 : vector<8x384xf32>
    %175 = vector.extract_strided_slice %168 {offsets = [0, 384], sizes = [8, 128], strides = [1, 1]} : vector<8x512xf32> to vector<8x128xf32>
    %176 = math.tanh %175 : vector<8x128xf32>
    %177 = vector.extract_strided_slice %174 {offsets = [0, 0], sizes = [8, 128], strides = [1, 1]} : vector<8x384xf32> to vector<8x128xf32>
    %178 = vector.extract_strided_slice %174 {offsets = [0, 128], sizes = [8, 128], strides = [1, 1]} : vector<8x384xf32> to vector<8x128xf32>
    %179 = vector.extract_strided_slice %174 {offsets = [0, 256], sizes = [8, 128], strides = [1, 1]} : vector<8x384xf32> to vector<8x128xf32>
    %180 = arith.mulf %178, %161 : vector<8x128xf32>
    %181 = arith.mulf %177, %176 : vector<8x128xf32>
    %182 = arith.addf %180, %181 : vector<8x128xf32>
    %183 = math.tanh %182 : vector<8x128xf32>
    %184 = arith.mulf %179, %183 : vector<8x128xf32>
    %c48_67 = arith.constant 48 : index
    %c0_68 = arith.constant 0 : index
    %185 = vector.load %arg8[%c48_67, %c0_68] : memref<64x128xf32, #tpu.memory_space<vmem>>, vector<8x128xf32>
    tpu.vector_store %arg8[%c48_67, %c0_68], %184 {strides = array<i32>} : memref<64x128xf32, #tpu.memory_space<vmem>>, vector<8x128xf32>,
    %c0_69 = arith.constant 0 : index
    %c0_70 = arith.constant 0 : index
    %186 = vector.load %arg3[%c0_69, %c0_70] : memref<128x512xf32, #tpu.memory_space<vmem>>, vector<128x512xf32>
    %cst_71 = arith.constant dense<0.000000e+00> : vector<8x512xf32>
    %187 = tpu.matmul %184, %186, %cst_71 {dimension_numbers = #tpu.dot_dimension_numbers<[1], [0], [0], [1], [0, 0, 1, 1], [], []>} : vector<8x128xf32>, vector<128x512xf32>, vector<8x512xf32> -> vector<8x512xf32>
    %c56_72 = arith.constant 56 : index
    %c0_73 = arith.constant 0 : index
    %188 = vector.load %arg7[%c56_72, %c0_73] : memref<64x512xf32, #tpu.memory_space<vmem>>, vector<8x512xf32>
    %189 = arith.addf %187, %188 : vector<8x512xf32>
    %190 = vector.extract_strided_slice %189 {offsets = [0, 0], sizes = [8, 384], strides = [1, 1]} : vector<8x512xf32> to vector<8x384xf32>
    %191 = arith.negf %190 : vector<8x384xf32>
    %192 = math.exp %191 : vector<8x384xf32>
    %cst_74 = arith.constant 1.000000e+00 : f32
    %193 = vector.broadcast %cst_74 : f32 to vector<8x384xf32>
    %194 = arith.addf %193, %192 : vector<8x384xf32>
    %195 = arith.divf %193, %194 : vector<8x384xf32>
    %196 = vector.extract_strided_slice %189 {offsets = [0, 384], sizes = [8, 128], strides = [1, 1]} : vector<8x512xf32> to vector<8x128xf32>
    %197 = math.tanh %196 : vector<8x128xf32>
    %198 = vector.extract_strided_slice %195 {offsets = [0, 0], sizes = [8, 128], strides = [1, 1]} : vector<8x384xf32> to vector<8x128xf32>
    %199 = vector.extract_strided_slice %195 {offsets = [0, 128], sizes = [8, 128], strides = [1, 1]} : vector<8x384xf32> to vector<8x128xf32>
    %200 = vector.extract_strided_slice %195 {offsets = [0, 256], sizes = [8, 128], strides = [1, 1]} : vector<8x384xf32> to vector<8x128xf32>
    %201 = arith.mulf %199, %182 : vector<8x128xf32>
    %202 = arith.mulf %198, %197 : vector<8x128xf32>
    %203 = arith.addf %201, %202 : vector<8x128xf32>
    %204 = math.tanh %203 : vector<8x128xf32>
    %205 = arith.mulf %200, %204 : vector<8x128xf32>
    %c56_75 = arith.constant 56 : index
    %c0_76 = arith.constant 0 : index
    %206 = vector.load %arg8[%c56_75, %c0_76] : memref<64x128xf32, #tpu.memory_space<vmem>>, vector<8x128xf32>
    tpu.vector_store %arg8[%c56_75, %c0_76], %205 {strides = array<i32>} : memref<64x128xf32, #tpu.memory_space<vmem>>, vector<8x128xf32>,
    %207 = vector.extract_strided_slice %184 {offsets = [0, 0], sizes = [8, 64], strides = [1, 1]} : vector<8x128xf32> to vector<8x64xf32>
    %c0_77 = arith.constant 0 : index
    %c0_78 = arith.constant 0 : index
    %c0_79 = arith.constant 0 : index
    %208 = vector.load %arg6[%c0_77, %c0_78, %c0_79] : memref<4x8x64xf32, #tpu.memory_space<vmem>>, vector<1x8x64xf32>
    %209 = vector.shape_cast %208 : vector<1x8x64xf32> to vector<8x64xf32>
    %210 = vector.shape_cast %207 : vector<8x64xf32> to vector<1x8x64xf32>
    tpu.vector_store %arg6[%c0_77, %c0_78, %c0_79], %210 {strides = array<i32>} : memref<4x8x64xf32, #tpu.memory_space<vmem>>, vector<1x8x64xf32>,
    %211 = vector.extract_strided_slice %205 {offsets = [0, 64], sizes = [8, 64], strides = [1, 1]} : vector<8x128xf32> to vector<8x64xf32>
    %c1_80 = arith.constant 1 : index
    %c0_81 = arith.constant 0 : index
    %c0_82 = arith.constant 0 : index
    %212 = vector.load %arg6[%c1_80, %c0_81, %c0_82] : memref<4x8x64xf32, #tpu.memory_space<vmem>>, vector<1x8x64xf32>
    %213 = vector.shape_cast %212 : vector<1x8x64xf32> to vector<8x64xf32>
    %214 = vector.shape_cast %211 : vector<8x64xf32> to vector<1x8x64xf32>
    tpu.vector_store %arg6[%c1_80, %c0_81, %c0_82], %214 {strides = array<i32>} : memref<4x8x64xf32, #tpu.memory_space<vmem>>, vector<1x8x64xf32>,
    %215 = vector.extract_strided_slice %182 {offsets = [0, 0], sizes = [8, 64], strides = [1, 1]} : vector<8x128xf32> to vector<8x64xf32>
    %c2_83 = arith.constant 2 : index
    %c0_84 = arith.constant 0 : index
    %c0_85 = arith.constant 0 : index
    %216 = vector.load %arg6[%c2_83, %c0_84, %c0_85] : memref<4x8x64xf32, #tpu.memory_space<vmem>>, vector<1x8x64xf32>
    %217 = vector.shape_cast %216 : vector<1x8x64xf32> to vector<8x64xf32>
    %218 = vector.shape_cast %215 : vector<8x64xf32> to vector<1x8x64xf32>
    tpu.vector_store %arg6[%c2_83, %c0_84, %c0_85], %218 {strides = array<i32>} : memref<4x8x64xf32, #tpu.memory_space<vmem>>, vector<1x8x64xf32>,
    %219 = vector.extract_strided_slice %203 {offsets = [0, 64], sizes = [8, 64], strides = [1, 1]} : vector<8x128xf32> to vector<8x64xf32>
    %c3_86 = arith.constant 3 : index
    %c0_87 = arith.constant 0 : index
    %c0_88 = arith.constant 0 : index
    %220 = vector.load %arg6[%c3_86, %c0_87, %c0_88] : memref<4x8x64xf32, #tpu.memory_space<vmem>>, vector<1x8x64xf32>
    %221 = vector.shape_cast %220 : vector<1x8x64xf32> to vector<8x64xf32>
    %222 = vector.shape_cast %219 : vector<8x64xf32> to vector<1x8x64xf32>
    tpu.vector_store %arg6[%c3_86, %c0_87, %c0_88], %222 {strides = array<i32>} : memref<4x8x64xf32, #tpu.memory_space<vmem>>, vector<1x8x64xf32>,
    %c0_89 = arith.constant 0 : index
    %c0_90 = arith.constant 0 : index
    %223 = vector.load %arg8[%c0_89, %c0_90] : memref<64x128xf32, #tpu.memory_space<vmem>>, vector<64x128xf32>
    %c0_91 = arith.constant 0 : index
    %c0_92 = arith.constant 0 : index
    %224 = vector.load %arg4[%c0_91, %c0_92] : memref<129x128xf32, #tpu.memory_space<vmem>>, vector<128x128xf32>
    %cst_93 = arith.constant dense<0.000000e+00> : vector<64x128xf32>
    %225 = tpu.matmul %223, %224, %cst_93 {dimension_numbers = #tpu.dot_dimension_numbers<[1], [0], [0], [1], [0, 0, 1, 1], [], []>} : vector<64x128xf32>, vector<128x128xf32>, vector<64x128xf32> -> vector<64x128xf32>
    %c128 = arith.constant 128 : index
    %c0_94 = arith.constant 0 : index
    %226 = vector.load %arg4[%c128, %c0_94] : memref<129x128xf32, #tpu.memory_space<vmem>>, vector<1x128xf32>
    %227 = vector.broadcast %226 : vector<1x128xf32> to vector<64x128xf32>
    %228 = arith.addf %225, %227 : vector<64x128xf32>
    %c0_95 = arith.constant 0 : index
    %c0_96 = arith.constant 0 : index
    %229 = vector.load %arg5[%c0_95, %c0_96] : memref<64x128xf32, #tpu.memory_space<vmem>>, vector<64x128xf32>
    tpu.vector_store %arg5[%c0_95, %c0_96], %228 {strides = array<i32>} : memref<64x128xf32, #tpu.memory_space<vmem>>, vector<64x128xf32>,
    return
  }
}

</mosaic_0001>

<bundles_post_ra>
// kernel: lstm_model_forward.1
= control target key start
LH: loop header
LB: loop body
LE: loop exit
PB: predicated region body
PF: predicated region fallthrough
CT: control target
= control target key end

     0   :  { %12 = vsyncpa [#allocation5], 0  ;;  %s4020_s0 = inlined_call_operand.vmem [shape: f32[64,21], index: 0, kind: input, shape index: {}]   ;;  %s4021_s1 = inlined_call_operand.vmem [shape: f32[4,8,64], index: 1, kind: input, shape index: {}]   ;;  %s4022_s2 = inlined_call_operand.hbm [shape: f32[21,512], index: 2, kind: input, shape index: {}]   ;;  %s4023_s3 = inlined_call_operand.hbm [shape: f32[128,512], index: 3, kind: input, shape index: {}]   ;;  %s4024_s4 = inlined_call_operand.vmem [shape: f32[129,128], index: 4, kind: input, shape index: {}]   ;;  %s4025_s5 = inlined_call_operand.vmem [shape: f32[64,128], index: 5, kind: output, shape index: {0}]   ;;  %s4026_s6 = inlined_call_operand.vmem [shape: f32[4,8,64], index: 6, kind: output, shape index: {1}]  }
   0x1   :  { %s22_s23 = sshll.u32 %s4022_s2, 4  ;;  %s23_s23 = int_to_ptr.hbm [resolvable:$true] %s22_s23 }
   0x2   :  { %13 = vsyncpa [#allocation7], 0  ;;  %s2551_s24 = smov [#allocation4]   ;;  %s35_s28 = sshll.u32 %s4023_s3, 4  ;;  %s36_s28 = int_to_ptr.hbm [resolvable:$true] %s35_s28 }
   0x3   :  { %s24_s25 = sshll.u32 %s2551_s24, 4  ;;  %s2552_s29 = smov 512   ;;  %s25_s25 = int_to_ptr.vmem [resolvable:$true] %s24_s25 }
   0x4   :  { %s2553_s30 = smov 32   ;;  %s2554_s7 = smov [#allocation6]  }
   0x5   :  { %30 = dma.hbm_to_vmem [thread:$0]  %s23_s23, 1536, %s25_s25, [#allocation5], %s2552_s29, %s2552_s29, %s2553_s30  }
   0x6   :  { %s37_s8 = sshll.u32 %s2554_s7, 4  ;;  %s38_s8 = int_to_ptr.vmem [resolvable:$true] %s37_s8 }
   0x7   :  { %43 = dma.hbm_to_vmem [thread:$0]  %s36_s28, 8192, %s38_s8, [#allocation7], %s2552_s29, %s2552_s29, %s2553_s30  }
   0x8   :  { %2547 = dma.done.wait [#allocation5], 1536  }
   0x9   :  { %2548 = vsyncadd [#allocation5], 4294965760 }
   0xa   :  { %2549 = dma.done.wait [#allocation7], 8192  }
   0xb   :  { %2550 = vsyncadd [#allocation7], 4294959104  ;;  %vm99_vm0 = vcmask 1044480   ;;  %v2310_v0 = vld [vmem:[%s4021_s1 + $0x8] sm:$0xff]  ;;  %v70_v1 = vld [vmem:[#allocation4 + $0x40] sm:$0x1f] }
   0xc   :  { %v66_v2 = vld [vmem:[#allocation4 + $0x20] sm:$0xff]  ;;  %s2555_s3 = smov 64   ;;  %2344 = vmatpush.msk.msra.mxu3 %vm99_vm0, %v70_v1  ;;  %2343 = vmatpush.msk.msra.mxu1 %vm99_vm0, %v70_v1  ;;  %v2607_v4 = vld [vmem:[%s4020_s0 + $0x28] sm:$0xff]  ;;  %vm74_vm1 = vcmask 171008   ;;  %v72_v5 = vld [vmem:[#allocation4 + $0x50] sm:$0x1f] }
   0xd   :  { %312 = vrot.lane.b32.xlu0 %v2310_v0, %s2555_s3  ;;  %v62_v3 = vld [vmem:[#allocation4] sm:$0xff]  ;;  %2274 = vmatpush.msk.msra.mxu0 %vm99_vm0, %v70_v1  ;;  %v73_v7 = vld [vmem:[#allocation4 + $0x58] sm:$0x1f]  ;;  %v71_v8 = vld [vmem:[#allocation4 + $0x48] sm:$0x1f]  ;;  %vm315_vm2 = vcmask 523264  }
   0xe   :  { %2346 = vmatpush.msra.mxu3 %v66_v2  ;;  %2345 = vmatpush.msra.mxu1 %v66_v2  ;;  %v2612_v6 = vld [vmem:[%s4020_s0 + $0x20] sm:$0xff]  ;;  %v68_v9 = vld [vmem:[#allocation4 + $0x30] sm:$0xff]  ;;  %v69_v10 = vld [vmem:[#allocation4 + $0x38] sm:$0xff] }
   0xf   :  { %2292 = vmatpush.msk.msra.mxu2 %vm99_vm0, %v72_v5  ;;  %126 = vmatpush.msra.mxu0 %v66_v2  ;;  %v67_v11 = vld [vmem:[#allocation4 + $0x28] sm:$0xff]  ;;  %v64_v12 = vld [vmem:[#allocation4 + $0x10] sm:$0xff]  ;;  %v65_v13 = vld [vmem:[#allocation4 + $0x18] sm:$0xff] }
  0x10   :  { %2348 = vmatpush.msra.mxu3 %v62_v3  ;;  %2347 = vmatpush.msra.mxu1 %v62_v3  ;;  %v2624_v14 = vld [vmem:[%s4020_s0] sm:$0xff]  ;;  %v63_v15 = vld [vmem:[#allocation4 + $0x8] sm:$0xff]  ;;  %v2633_v18 = vld [vmem:[%s4020_s0 + $0x30] sm:$0xff] }
  0x11   :  { %2280 = vmatmul.msk.f32.vlgmr.msra.gmra.mxu3 %vm74_vm1, %v2607_v4  ;;  %2279 = vmatmul.msk.f32.vlgmr.msra.gmra.mxu1 %vm74_vm1, %v2612_v6  ;;  %v2626_v16 = vld [vmem:[#allocation6 + $0x1e0] sm:$0xff]  ;;  %v2628_v17 = vld [vmem:[#allocation6 + $0x1e8] sm:$0xff]  ;;  %v2656_v24 = vld [vmem:[#allocation6 + $0x1f8] sm:$0xff] }
  0x12   :  { %2301 = vmatpush.msk.msrb.mxu3 %vm99_vm0, %v73_v7  ;;  %2283 = vmatpush.msk.msrb.mxu1 %vm99_vm0, %v71_v8  ;;  %v2637_v19 = vld [vmem:[#allocation6 + $0x1c0] sm:$0xff]  ;;  %v2643_v21 = vld [vmem:[#allocation6 + $0x1c8] sm:$0xff]  ;;  %v2677_v28 = vld [vmem:[%s4020_s0 + $0x38] sm:$0xff] }
  0x13   :  { %208 = vmatpush.msra.mxu2 %v68_v9  ;;  %127 = vmatpush.msra.mxu0 %v62_v3  ;;  %v2641_v20 = vld [vmem:[#allocation6 + $0x1a0] sm:$0xff]  ;;  %v2654_v23 = vld [vmem:[#allocation6 + $0x1a8] sm:$0xff]  ;;  %v2694_v32 = vld [vmem:[#allocation6 + $0x1d8] sm:$0xff] }
  0x14   :  { %249 = vmatpush.msrb.mxu3 %v69_v10  ;;  %167 = vmatpush.msrb.mxu1 %v67_v11  ;;  %v2652_v22 = vld [vmem:[#allocation6 + $0x180] sm:$0xff]  ;;  %v2662_v25 = vld [vmem:[%s4020_s0 + $0x8] sm:$0xff]  ;;  %v2703_v35 = vld [vmem:[#allocation6 + $0x1b8] sm:$0xff] }
  0x15   :  { %209 = vmatpush.msra.mxu2 %v64_v12  ;;  %2275 = vmatmul.msk.f32.vlgmr.msra.gmra.mxu0 %vm74_vm1, %v2624_v14  ;;  %v2666_v26 = vld [vmem:[#allocation6 + $0x160] sm:$0xff]  ;;  %v2668_v27 = vld [vmem:[#allocation6 + $0x188] sm:$0xff]  ;;  %v2708_v36 = vld [vmem:[%s4020_s0 + $0x10] sm:$0xff] }
  0x16   :  { %250 = vmatpush.msrb.mxu3 %v65_v13  ;;  %2293 = vmatmul.msk.f32.vlgmr.msra.gmra.mxu2 %vm74_vm1, %v2624_v14  ;;  %v2681_v29 = vld [vmem:[#allocation6 + $0x140] sm:$0xff]  ;;  %v2688_v31 = vld [vmem:[#allocation6 + $0x168] sm:$0xff]  ;;  %v2734_v41 = vld [vmem:[#allocation6 + $0x198] sm:$0xff] }
  0x17   :  { %168 = vmatpush.msrb.mxu1 %v63_v15  ;;  %397 = vmatpush.msrb.mxu2 %v2626_v16  ;;  %v2686_v30 = vld [vmem:[#allocation6 + $0x120] sm:$0xff]  ;;  %v2701_v34 = vld [vmem:[#allocation6 + $0x148] sm:$0xff]  ;;  %v2743_v44 = vld [vmem:[#allocation6 + $0x178] sm:$0xff] }
  0x18   :  { %546 = vmatpush.msrb.mxu0 %v2626_v16  ;;  %457 = vmatpush.msra.mxu3 %v2656_v24  ;;  %v2698_v33 = vld [vmem:[#allocation6 + $0x100] sm:$0xff]  ;;  %v2715_v38 = vld [vmem:[#allocation6 + $0x128] sm:$0xff]  ;;  %v2748_v45 = vld [vmem:[%s4020_s0 + $0x18] sm:$0xff] }
  0x19   :  { %417 = vmatpush.msra.mxu1 %v2628_v17  ;;  %2281 = vmatmul.msk.f32.gmra.mxu3 %vm74_vm1, %v2633_v18  ;;  %v2712_v37 = vld [vmem:[#allocation6 + $0xe0] sm:$0xff]  ;;  %v2741_v43 = vld [vmem:[#allocation6 + $0x108] sm:$0xff]  ;;  %v2774_v50 = vld [vmem:[#allocation6 + $0x158] sm:$0xff] }
  0x1a   :  { %398 = vmatpush.msrb.mxu2 %v2637_v19  ;;  %2284 = vmatmul.msk.f32.vlgmr.msrb.gmra.mxu1 %vm74_vm1, %v2624_v14  ;;  %v2723_v39 = vld [vmem:[#allocation6 + $0xc0] sm:$0xff]  ;;  %v2752_v46 = vld [vmem:[#allocation6 + $0xe8] sm:$0xff]  ;;  %v2785_v53 = vld [vmem:[#allocation6 + $0x138] sm:$0xff] }
  0x1b   :  { %418 = vmatpush.msra.mxu1 %v2643_v21  ;;  %547 = vmatpush.msrb.mxu0 %v2637_v19  ;;  %v2728_v40 = vld [vmem:[#allocation6 + $0xa0] sm:$0xff]  ;;  %v2781_v52 = vld [vmem:[#allocation6 + $0xc8] sm:$0xff]  ;;  %v2789_v55 = vld [vmem:[#allocation6 + $0x1f0] sm:$0xff] }
  0x1c   :  { %399 = vmatpush.msrb.mxu2 %v2641_v20  ;;  %458 = vmatpush.msra.mxu3 %v2694_v32  ;;  %v2738_v42 = vld [vmem:[#allocation6 + $0x80] sm:$0xff]  ;;  %v2787_v54 = vld [vmem:[#allocation6 + $0xa8] sm:$0xff]  ;;  %v2792_v56 = vld [vmem:[#allocation6 + $0x118] sm:$0xff] }
  0x1d   :  { %419 = vmatpush.msra.mxu1 %v2654_v23  ;;  %548 = vmatpush.msrb.mxu0 %v2641_v20  ;;  %v2754_v47 = vld [vmem:[#allocation6 + $0x60] sm:$0xff]  ;;  %v2799_v57 = vld [vmem:[#allocation6 + $0x1d0] sm:$0xff]  ;;  %v2811_v59 = vld [vmem:[#allocation6 + $0xf8] sm:$0xff] }
  0x1e   :  { %400 = vmatpush.msrb.mxu2 %v2652_v22  ;;  %459 = vmatpush.msra.mxu3 %v2703_v35  ;;  %v2762_v48 = vld [vmem:[#allocation6 + $0x40] sm:$0xff]  ;;  %v2804_v58 = vld [vmem:[#allocation6 + $0x1b0] sm:$0xff]  ;;  %v2813_v60 = vld [vmem:[#allocation6 + $0x88] sm:$0xff] }
  0x1f   :  { %2294 = vmatmul.msk.f32.gmra.mxu2 %vm74_vm1, %v2662_v25  ;;  %420 = vmatpush.msra.mxu1 %v2668_v27  ;;  %v2768_v49 = vld [vmem:[#allocation6 + $0x20] sm:$0xff]  ;;  %v2817_v61 = vld [vmem:[#allocation6 + $0x190] sm:$0xff]  ;;  %v2820_v62 = vld [vmem:[#allocation6 + $0xd8] sm:$0xff] }
  0x20   :  { %401 = vmatpush.msrb.mxu2 %v2666_v26  ;;  %549 = vmatpush.msrb.mxu0 %v2652_v22  ;;  %v2778_v51 = vld [vmem:[#allocation6] sm:$0xff]  ;;  %v2824_v63 = vld [vmem:[#allocation6 + $0xb8] sm:$0xff]  ;;  %v2826_v0 = vld [vmem:[#allocation6 + $0x68] sm:$0xff] }
  0x21   :  { %2282 = vmatmul.msk.f32.gmra.mxu3 %vm74_vm1, %v2677_v28  ;;  %421 = vmatpush.msra.mxu1 %v2688_v31  ;;  %v2828_v1 = vld [vmem:[#allocation6 + $0x170] sm:$0xff]  ;;  %v2834_v2 = vld [vmem:[#allocation6 + $0x98] sm:$0xff]  ;;  %v2851_v8 = vld [vmem:[#allocation6 + $0x48] sm:$0xff] }
  0x22   :  { %402 = vmatpush.msrb.mxu2 %v2681_v29  ;;  %2285 = vmatmul.msk.f32.gmra.mxu1 %vm74_vm1, %v2662_v25  ;;  %v2838_v3 = vld [vmem:[#allocation6 + $0x150] sm:$0xff]  ;;  %v2849_v7 = vld [vmem:[#allocation6 + $0x78] sm:$0xff]  ;;  %v2860_v11 = vld [vmem:[#allocation6 + $0x28] sm:$0xff] }
  0x23   :  { %2276 = vmatmul.msk.f32.gmra.mxu0 %vm74_vm1, %v2662_v25  ;;  %422 = vmatpush.msra.mxu1 %v2701_v34  ;;  %v2843_v5 = vld [vmem:[#allocation6 + $0x130] sm:$0xff]  ;;  %v2858_v10 = vld [vmem:[#allocation6 + $0x58] sm:$0xff] }
  0x24   :  { %403 = vmatpush.msrb.mxu2 %v2686_v30  ;;  %550 = vmatpush.msrb.mxu0 %v2666_v26  ;;  %v2855_v9 = vld [vmem:[#allocation6 + $0x110] sm:$0xff]  ;;  %v2864_v12 = vld [vmem:[#allocation6 + $0x38] sm:$0xff] }
  0x25   :  { %423 = vmatpush.msra.mxu1 %v2715_v38  ;;  %460 = vmatpush.msra.mxu3 %v2734_v41  ;;  %v2866_v13 = vld [vmem:[#allocation6 + $0xf0] sm:$0xff] }
  0x26   :  { %404 = vmatpush.msrb.mxu2 %v2698_v33  ;;  %551 = vmatpush.msrb.mxu0 %v2681_v29  ;;  %v2879_v15 = vld [vmem:[#allocation6 + $0xb0] sm:$0xff] }
  0x27   :  { %2295 = vmatmul.msk.f32.gmra.mxu2 %vm74_vm1, %v2708_v36  ;;  %424 = vmatpush.msra.mxu1 %v2741_v43 }
  0x28   :  { %405 = vmatpush.msrb.mxu2 %v2712_v37  ;;  %461 = vmatpush.msra.mxu3 %v2743_v44 }
  0x29   :  { %2302 = vmatmul.msk.f32.vlgmr.msrb.gmra.mxu3 %vm74_vm1, %v2624_v14  ;;  %552 = vmatpush.msrb.mxu0 %v2686_v30  ;;  %v2874_v14 = vld [vmem:[#allocation6 + $0xd0] sm:$0xff] }
  0x2a   :  { %406 = vmatpush.msrb.mxu2 %v2723_v39  ;;  %2286 = vmatmul.msk.f32.gmra.mxu1 %vm74_vm1, %v2708_v36 }
  0x2b   :  { %425 = vmatpush.msra.mxu1 %v2752_v46  ;;  %553 = vmatpush.msrb.mxu0 %v2698_v33 }
  0x2c   :  { %407 = vmatpush.msrb.mxu2 %v2728_v40  ;;  %2277 = vmatmul.msk.f32.gmra.mxu0 %vm74_vm1, %v2708_v36 }
  0x2d   :  { %554 = vmatpush.msrb.mxu0 %v2712_v37  ;;  %462 = vmatpush.msra.mxu3 %v2774_v50 }
  0x2e   :  { %408 = vmatpush.msrb.mxu2 %v2738_v42  ;;  %426 = vmatpush.msra.mxu1 %v2781_v52 }
  0x2f   :  { %2296 = vmatmul.msk.f32.gmra.mxu2 %vm74_vm1, %v2748_v45  ;;  %463 = vmatpush.msra.mxu3 %v2785_v53 }
  0x30   :  { %409 = vmatpush.msrb.mxu2 %v2754_v47  ;;  %555 = vmatpush.msrb.mxu0 %v2723_v39 }
  0x31   :  { %2303 = vmatmul.msk.f32.gmra.mxu3 %vm74_vm1, %v2662_v25  ;;  %427 = vmatpush.msra.mxu1 %v2787_v54  ;;  %v2312_v25 = vld [vmem:[%s4021_s1 + $0x18] sm:$0xff] }
  0x32   :  { %410 = vmatpush.msrb.mxu2 %v2762_v48  ;;  %2287 = vmatmul.msk.f32.gmra.mxu1 %vm74_vm1, %v2748_v45 }
  0x33   :  { %464 = vmatpush.msra.mxu3 %v2792_v56  ;;  %556 = vmatpush.msrb.mxu0 %v2728_v40 }
  0x34   :  { %411 = vmatpush.msrb.mxu2 %v2768_v49  ;;  %2278 = vmatmul.msk.f32.gmra.mxu0 %vm74_vm1, %v2748_v45 }
  0x35   :  { %465 = vmatpush.msra.mxu3 %v2811_v59  ;;  %428 = vmatpush.msra.mxu1 %v2813_v60 }
  0x36   :  { %412 = vmatpush.msrb.mxu2 %v2778_v51  ;;  %557 = vmatpush.msrb.mxu0 %v2738_v42 }
  0x37   :  { %2297 = vmatmul.msk.f32.gmra.mxu2 %vm74_vm1, %v2612_v6  ;;  %466 = vmatpush.msra.mxu3 %v2820_v62 }
  0x38   :  { %437 = vmatpush.msra.mxu2 %v2789_v55  ;;  %429 = vmatpush.msra.mxu1 %v2826_v0 }
  0x39   :  { %2304 = vmatmul.msk.f32.gmra.mxu3 %vm74_vm1, %v2708_v36  ;;  %558 = vmatpush.msrb.mxu0 %v2754_v47 }
  0x3a   :  { %438 = vmatpush.msra.mxu2 %v2799_v57  ;;  %2288 = vmatmul.msk.f32.gmra.mxu1 %vm74_vm1, %v2612_v6 }
  0x3b   :  { %467 = vmatpush.msra.mxu3 %v2824_v63  ;;  %430 = vmatpush.msra.mxu1 %v2851_v8 }
  0x3c   :  { %439 = vmatpush.msra.mxu2 %v2804_v58  ;;  %559 = vmatpush.msrb.mxu0 %v2762_v48 }
  0x3d   :  { %468 = vmatpush.msra.mxu3 %v2834_v2  ;;  %431 = vmatpush.msra.mxu1 %v2860_v11 }
  0x3e   :  { %440 = vmatpush.msra.mxu2 %v2817_v61  ;;  %560 = vmatpush.msrb.mxu0 %v2768_v49 }
  0x3f   :  { %2298 = vmatmul.msk.f32.gmra.mxu2 %vm74_vm1, %v2607_v4  ;;  %469 = vmatpush.msra.mxu3 %v2849_v7 }
  0x40   :  { %441 = vmatpush.msra.mxu2 %v2828_v1  ;;  %561 = vmatpush.msrb.mxu0 %v2778_v51 }
  0x41   :  { %2305 = vmatmul.msk.f32.gmra.mxu3 %vm74_vm1, %v2748_v45  ;;  %322 = vrot.lane.b32.xlu0 %v2312_v25, %s2555_s3 }
  0x42   :  { %442 = vmatpush.msra.mxu2 %v2838_v3  ;;  %2289 = vmatmul.msk.f32.gmra.mxu1 %vm74_vm1, %v2607_v4 }
  0x43   :  { %470 = vmatpush.msra.mxu3 %v2858_v10  ;;  %758 = vmatpush.msra.mxu0 %v2626_v16  ;;  %v2912_v16 = vld [vmem:[#allocation6 + $0x18] sm:$0xff] }
  0x44   :  { %443 = vmatpush.msra.mxu2 %v2843_v5 }
  0x45   :  { %471 = vmatpush.msra.mxu3 %v2864_v12  ;;  %759 = vmatpush.msra.mxu0 %v2637_v19  ;;  %v2920_v19 = vld [vmem:[#allocation6 + $0x50] sm:$0xff] }
  0x46   :  { %444 = vmatpush.msra.mxu2 %v2855_v9 }
  0x47   :  { %2299 = vmatmul.msk.f32.gmra.mxu2 %vm74_vm1, %v2633_v18  ;;  %760 = vmatpush.msra.mxu0 %v2641_v20  ;;  %v2925_v20 = vld [vmem:[#allocation6 + $0x30] sm:$0xff] }
  0x48   :  { %445 = vmatpush.msra.mxu2 %v2866_v13  ;;  %472 = vmatpush.msra.mxu3 %v2912_v16 }
  0x49   :  { %2306 = vmatmul.msk.f32.gmra.mxu3 %vm74_vm1, %v2612_v6  ;;  %761 = vmatpush.msra.mxu0 %v2652_v22  ;;  %v2908_v6 = vld [vmem:[#allocation6 + $0x90] sm:$0xff] }
  0x4a   :  { %446 = vmatpush.msra.mxu2 %v2874_v14  ;;  %2290 = vmatmul.msk.f32.gmra.mxu1 %vm74_vm1, %v2633_v18  ;;  %v2931_v22 = vld [vmem:[#allocation6 + $0x10] sm:$0xff] }
  0x4b   :  { %762 = vmatpush.msra.mxu0 %v2666_v26  ;;  %606 = vmatpush.msrb.mxu3 %v2656_v24  ;;  %v308_v26 = vld [vmem:[%s4021_s1] sm:$0xff] }
  0x4c   :  { %447 = vmatpush.msra.mxu2 %v2879_v15 }
  0x4d   :  { %763 = vmatpush.msra.mxu0 %v2681_v29  ;;  %607 = vmatpush.msrb.mxu3 %v2694_v32 }
  0x4e   :  { %448 = vmatpush.msra.mxu2 %v2908_v6 }
  0x4f   :  { %2300 = vmatmul.msk.f32.gmra.mxu2 %vm74_vm1, %v2677_v28  ;;  %764 = vmatpush.msra.mxu0 %v2686_v30 }
  0x50   :  { %608 = vmatpush.msrb.mxu3 %v2703_v35 }
  0x51   :  { %2307 = vmatmul.msk.f32.gmra.mxu3 %vm74_vm1, %v2607_v4  ;;  %765 = vmatpush.msra.mxu0 %v2698_v33  ;;  %v2906_v4 = vld [vmem:[#allocation6 + $0x8] sm:$0xff] }
  0x52   :  { %2291 = vmatmul.msk.f32.gmra.mxu1 %vm74_vm1, %v2677_v28  ;;  %609 = vmatpush.msrb.mxu3 %v2734_v41 }
  0x53   :  { %766 = vmatpush.msra.mxu0 %v2712_v37  ;;  %432 = vmatpush.msra.mxu1 %v2906_v4 }
  0x54   :  { %610 = vmatpush.msrb.mxu3 %v2743_v44 }
  0x55   :  { %767 = vmatpush.msra.mxu0 %v2723_v39  ;;  %566 = vmatpush.msrb.mxu1 %v2628_v17 }
  0x56   :  { %611 = vmatpush.msrb.mxu3 %v2774_v50 }
  0x57   :  { %768 = vmatpush.msra.mxu0 %v2728_v40  ;;  %567 = vmatpush.msrb.mxu1 %v2643_v21 }
  0x58   :  { %612 = vmatpush.msrb.mxu3 %v2785_v53 }
  0x59   :  { %2308 = vmatmul.msk.f32.gmra.mxu3 %vm74_vm1, %v2633_v18  ;;  %v2918_v18 = vld [vmem:[#allocation6 + $0x70] sm:$0xff]  ;;  %769 = vmatpush.msra.mxu0 %v2738_v42 }
  0x5a   :  { %449 = vmatpush.msra.mxu2 %v2918_v18  ;;  %568 = vmatpush.msrb.mxu1 %v2654_v23 }
  0x5b   :  { %770 = vmatpush.msra.mxu0 %v2754_v47  ;;  %613 = vmatpush.msrb.mxu3 %v2792_v56 }
  0x5c   :  { %450 = vmatpush.msra.mxu2 %v2920_v19  ;;  %569 = vmatpush.msrb.mxu1 %v2668_v27 }
  0x5d   :  { %771 = vmatpush.msra.mxu0 %v2762_v48  ;;  %614 = vmatpush.msrb.mxu3 %v2811_v59 }
  0x5e   :  { %451 = vmatpush.msra.mxu2 %v2925_v20  ;;  %570 = vmatpush.msrb.mxu1 %v2688_v31 }
  0x5f   :  { %772 = vmatpush.msra.mxu0 %v2768_v49  ;;  %615 = vmatpush.msrb.mxu3 %v2820_v62 }
  0x60   :  { %452 = vmatpush.msra.mxu2 %v2931_v22  ;;  %571 = vmatpush.msrb.mxu1 %v2701_v34 }
  0x61   :  { %2309 = vmatmul.msk.f32.gmra.mxu3 %vm74_vm1, %v2677_v28  ;;  %773 = vmatpush.msra.mxu0 %v2778_v51 }
  0x62   :  { %572 = vmatpush.msrb.mxu1 %v2715_v38  ;;  %616 = vmatpush.msrb.mxu3 %v2824_v63 }
  0x64   :  { %573 = vmatpush.msrb.mxu1 %v2741_v43  ;;  %617 = vmatpush.msrb.mxu3 %v2834_v2 }
  0x66   :  { %574 = vmatpush.msrb.mxu1 %v2752_v46  ;;  %618 = vmatpush.msrb.mxu3 %v2849_v7 }
  0x68   :  { %575 = vmatpush.msrb.mxu1 %v2781_v52  ;;  %619 = vmatpush.msrb.mxu3 %v2858_v10 }
  0x6a   :  { %576 = vmatpush.msrb.mxu1 %v2787_v54  ;;  %620 = vmatpush.msrb.mxu3 %v2864_v12 }
  0x6c   :  { %577 = vmatpush.msrb.mxu1 %v2813_v60  ;;  %621 = vmatpush.msrb.mxu3 %v2912_v16 }
  0x6e   :  { %578 = vmatpush.msrb.mxu1 %v2826_v0 }
  0x70   :  { %579 = vmatpush.msrb.mxu1 %v2851_v8 }
  0x72   :  { %580 = vmatpush.msrb.mxu1 %v2860_v11 }
  0x74   :  { %581 = vmatpush.msrb.mxu1 %v2906_v4 }
  0x7f   :  { %v313_v28 = vpop.permute.xlu0 %312 }
  0x80   :  { %v2973_v29 = vsel %vm315_vm2, %v308_v26, %v313_v28 }
  0x81   :  { %413 = vmatmul.f32.vlgmr.msrb.gmra.mxu2 %v2973_v29  ;;  %433 = vmatmul.f32.vlgmr.msra.gmra.mxu1 %v2973_v29 }
  0x82   :  { %473 = vmatmul.f32.vlgmr.msra.gmra.mxu3 %v2973_v29  ;;  %586 = vmatpush.msrb.mxu2 %v2789_v55 }
  0x83   :  { %778 = vmatpush.msra.mxu1 %v2628_v17  ;;  %818 = vmatpush.msra.mxu3 %v2656_v24 }
  0x84   :  { %587 = vmatpush.msrb.mxu2 %v2799_v57 }
  0x85   :  { %779 = vmatpush.msra.mxu1 %v2643_v21  ;;  %819 = vmatpush.msra.mxu3 %v2694_v32 }
  0x86   :  { %588 = vmatpush.msrb.mxu2 %v2804_v58 }
  0x87   :  { %780 = vmatpush.msra.mxu1 %v2654_v23  ;;  %820 = vmatpush.msra.mxu3 %v2703_v35 }
  0x88   :  { %589 = vmatpush.msrb.mxu2 %v2817_v61 }
  0x89   :  { %453 = vmatmul.f32.vlgmr.msra.gmra.mxu2 %v2973_v29  ;;  %781 = vmatpush.msra.mxu1 %v2668_v27 }
  0x8a   :  { %590 = vmatpush.msrb.mxu2 %v2828_v1  ;;  %821 = vmatpush.msra.mxu3 %v2734_v41 }
  0x8b   :  { %782 = vmatpush.msra.mxu1 %v2688_v31 }
  0x8c   :  { %591 = vmatpush.msrb.mxu2 %v2838_v3  ;;  %822 = vmatpush.msra.mxu3 %v2743_v44 }
  0x8d   :  { %783 = vmatpush.msra.mxu1 %v2701_v34 }
  0x8e   :  { %592 = vmatpush.msrb.mxu2 %v2843_v5  ;;  %823 = vmatpush.msra.mxu3 %v2774_v50  ;;  %v3031_v17 = vpop.f32.mrf.mxu1 }
  0x8f   :  { %784 = vmatpush.msra.mxu1 %v2715_v38  ;;  %4088 = vst [vmem:[#allocation10_spill] sm:$0xff] %v3031_v17  ;;  %v3287_v17 = vld [vmem:[#allocation6 + $0x50] sm:$0xff] }
  0x90   :  { %593 = vmatpush.msrb.mxu2 %v2855_v9  ;;  %824 = vmatpush.msra.mxu3 %v2785_v53 }
  0x91   :  { %785 = vmatpush.msra.mxu1 %v2741_v43 }
  0x92   :  { %594 = vmatpush.msrb.mxu2 %v2866_v13  ;;  %825 = vmatpush.msra.mxu3 %v2792_v56 }
  0x93   :  { %786 = vmatpush.msra.mxu1 %v2752_v46 }
  0x94   :  { %595 = vmatpush.msrb.mxu2 %v2874_v14  ;;  %826 = vmatpush.msra.mxu3 %v2811_v59  ;;  %v3034_v21 = vpop.f32.mrf.mxu3 }
  0x95   :  { %787 = vmatpush.msra.mxu1 %v2781_v52  ;;  %4089 = vst [vmem:[#allocation11_spill] sm:$0xff] %v3034_v21  ;;  %v3277_v21 = vld [vmem:[#allocation6 + $0x70] sm:$0xff] }
  0x96   :  { %596 = vmatpush.msrb.mxu2 %v2879_v15  ;;  %827 = vmatpush.msra.mxu3 %v2820_v62  ;;  %4127 = vst [vmem:[#allocation47_spill] sm:$0xff] %v3277_v21 }
  0x97   :  { %788 = vmatpush.msra.mxu1 %v2787_v54  ;;  %v170_v23 = vpop.f32.mrf.mxu1 }
  0x98   :  { %597 = vmatpush.msrb.mxu2 %v2908_v6  ;;  %828 = vmatpush.msra.mxu3 %v2824_v63 }
  0x99   :  { %789 = vmatpush.msra.mxu1 %v2813_v60  ;;  %v211_v27 = vpop.f32.mrf.mxu2 }
  0x9a   :  { %598 = vmatpush.msrb.mxu2 %v2918_v18  ;;  %829 = vmatpush.msra.mxu3 %v2834_v2 }
  0x9b   :  { %790 = vmatpush.msra.mxu1 %v2826_v0 }
  0x9c   :  { %599 = vmatpush.msrb.mxu2 %v2920_v19  ;;  %830 = vmatpush.msra.mxu3 %v2849_v7  ;;  %v3041_v24 = vpop.f32.mrf.mxu3 }
  0x9d   :  { %791 = vmatpush.msra.mxu1 %v2851_v8  ;;  %4090 = vst [vmem:[#allocation12_spill] sm:$0xff] %v3041_v24  ;;  %v3253_v24 = vld [vmem:[#allocation6 + $0xb0] sm:$0xff] }
  0x9e   :  { %600 = vmatpush.msrb.mxu2 %v2925_v20  ;;  %831 = vmatpush.msra.mxu3 %v2858_v10 }
  0x9f   :  { %792 = vmatpush.msra.mxu1 %v2860_v11  ;;  %v3047_v30 = vpop.f32.mrf.mxu1 }
  0xa0   :  { %601 = vmatpush.msrb.mxu2 %v2931_v22  ;;  %832 = vmatpush.msra.mxu3 %v2864_v12 }
  0xa1   :  { %793 = vmatpush.msra.mxu1 %v2906_v4 }
  0xa2   :  { %798 = vmatpush.msra.mxu2 %v2789_v55  ;;  %833 = vmatpush.msra.mxu3 %v2912_v16  ;;  %v3054_v32 = vpop.f32.mrf.mxu2  ;;  %v129_v55 = vpop.f32.mrf.mxu0 }
  0xa4   :  { %799 = vmatpush.msra.mxu2 %v2799_v57  ;;  %v3050_v31 = vpop.f32.mrf.mxu3 }
  0xa5   :  { %4091 = vst [vmem:[#allocation13_spill] sm:$0xff] %v3050_v31 }
  0xa6   :  { %800 = vmatpush.msra.mxu2 %v2804_v58 }
  0xa7   :  { %v3057_v33 = vpop.f32.mrf.mxu1 }
  0xa8   :  { %801 = vmatpush.msra.mxu2 %v2817_v61 }
  0xaa   :  { %802 = vmatpush.msra.mxu2 %v2828_v1  ;;  %v3059_v35 = vpop.f32.mrf.mxu2 }
  0xac   :  { %803 = vmatpush.msra.mxu2 %v2838_v3  ;;  %v252_v34 = vpop.f32.mrf.mxu3 }
  0xae   :  { %804 = vmatpush.msra.mxu2 %v2843_v5 }
  0xaf   :  { %v3061_v36 = vpop.f32.mrf.mxu1 }
  0xb0   :  { %805 = vmatpush.msra.mxu2 %v2855_v9  ;;  %4092 = vst [vmem:[#allocation14_spill] sm:$0xff] %v3061_v36  ;;  %v3296_v36 = vld [vmem:[#allocation6 + $0x28] sm:$0xff] }
  0xb2   :  { %806 = vmatpush.msra.mxu2 %v2866_v13  ;;  %v3065_v38 = vpop.f32.mrf.mxu2 }
  0xb3   :  { %4093 = vst [vmem:[#allocation15_spill] sm:$0xff] %v3065_v38  ;;  %v323_v25 = vpop.permute.xlu0 %322  ;;  %v3294_v38 = vld [vmem:[#allocation6 + $0x20] sm:$0xff] }
  0xb4   :  { %807 = vmatpush.msra.mxu2 %v2874_v14  ;;  %v3063_v37 = vpop.f32.mrf.mxu3 }
  0xb6   :  { %808 = vmatpush.msra.mxu2 %v2879_v15 }
  0xb7   :  { %v3067_v39 = vpop.f32.mrf.mxu1 }
  0xb8   :  { %809 = vmatpush.msra.mxu2 %v2908_v6  ;;  %4094 = vst [vmem:[#allocation16_spill] sm:$0xff] %v3067_v39  ;;  %v3285_v39 = vld [vmem:[#allocation6 + $0x48] sm:$0xff] }
  0xb9   :  { %4130 = vst [vmem:[#allocation50_spill] sm:$0xff] %v3285_v39 }
  0xba   :  { %810 = vmatpush.msra.mxu2 %v2918_v18  ;;  %v3071_v41 = vpop.f32.mrf.mxu2  ;;  %v326_v18 = vlaneseq }
  0xbb   :  { %4095 = vst [vmem:[#allocation17_spill] sm:$0xff] %v3071_v41 }
  0xbc   :  { %811 = vmatpush.msra.mxu2 %v2920_v19  ;;  %v3069_v40 = vpop.f32.mrf.mxu3 }
  0xbe   :  { %812 = vmatpush.msra.mxu2 %v2925_v20 }
  0xbf   :  { %v3073_v42 = vpop.f32.mrf.mxu1 }
  0xc0   :  { %813 = vmatpush.msra.mxu2 %v2931_v22  ;;  %4096 = vst [vmem:[#allocation18_spill] sm:$0xff] %v3073_v42  ;;  %v2311_v22 = vld [vmem:[%s4021_s1 + $0x10] sm:$0xff]  ;;  %v3273_v42 = vld [vmem:[#allocation6 + $0x68] sm:$0xff] }
  0xc1   :  { %4126 = vst [vmem:[#allocation46_spill] sm:$0xff] %v3273_v42 }
  0xc2   :  { %v3077_v44 = vpop.f32.mrf.mxu2 }
  0xc3   :  { %4098 = vst [vmem:[#allocation20_spill] sm:$0xff] %v3077_v44  ;;  %v3265_v44 = vld [vmem:[#allocation6 + $0x90] sm:$0xff] }
  0xc4   :  { %v3075_v43 = vpop.f32.mrf.mxu3 }
  0xc5   :  { %4097 = vst [vmem:[#allocation19_spill] sm:$0xff] %v3075_v43 }
  0xc7   :  { %v3079_v45 = vpop.f32.mrf.mxu1 }
  0xc8   :  { %4099 = vst [vmem:[#allocation21_spill] sm:$0xff] %v3079_v45  ;;  %v3251_v45 = vld [vmem:[#allocation6 + $0xa8] sm:$0xff] }
  0xca   :  { %v3083_v47 = vpop.f32.mrf.mxu2 }
  0xcb   :  { %4101 = vst [vmem:[#allocation23_spill] sm:$0xff] %v3083_v47  ;;  %v3249_v47 = vld [vmem:[#allocation6 + $0xa0] sm:$0xff] }
  0xcc   :  { %v3081_v46 = vpop.f32.mrf.mxu3 }
  0xcd   :  { %4100 = vst [vmem:[#allocation22_spill] sm:$0xff] %v3081_v46  ;;  %v3279_v46 = vld [vmem:[#allocation6 + $0x78] sm:$0xff] }
  0xce   :  { %4128 = vst [vmem:[#allocation48_spill] sm:$0xff] %v3279_v46 }
  0xcf   :  { %v3085_v48 = vpop.f32.mrf.mxu1 }
  0xd0   :  { %4102 = vst [vmem:[#allocation24_spill] sm:$0xff] %v3085_v48 }
  0xd2   :  { %v3089_v50 = vpop.f32.mrf.mxu2 }
  0xd3   :  { %4104 = vst [vmem:[#allocation26_spill] sm:$0xff] %v3089_v50  ;;  %v3239_v50 = vld [vmem:[#allocation6 + $0xd0] sm:$0xff] }
  0xd4   :  { %v3087_v49 = vpop.f32.mrf.mxu3 }
  0xd5   :  { %4103 = vst [vmem:[#allocation25_spill] sm:$0xff] %v3087_v49 }
  0xdc   :  { %v3091_v53 = vpop.f32.mrf.mxu3 }
  0xdd   :  { %4105 = vst [vmem:[#allocation27_spill] sm:$0xff] %v3091_v53  ;;  %v3245_v53 = vld [vmem:[#allocation6 + $0xd8] sm:$0xff] }
  0xe4   :  { %v3093_v61 = vpop.f32.mrf.mxu3 }
  0xe5   :  { %4106 = vst [vmem:[#allocation28_spill] sm:$0xff] %v3093_v61  ;;  %v3237_v61 = vld [vmem:[#allocation6 + $0xc8] sm:$0xff] }
  0xfe   :  { %v434_v51 = vpop.f32.mrf.mxu1 }
  0xff   :  { %v435_v52 = vadd.f32 %v434_v51, %v170_v23 }
 0x101   :  { %v2314_v54 = vmul.f32 -1.442695, %v435_v52  ;;  %v327_v52 = vand.u32 127, %v326_v18 }
 0x103   :  { %2355 = vpow2.f32 %v2314_v54  ;;  %v325_v54 = vsel %vm315_vm2, %v2311_v22, %v323_v25  ;;  %vm328_vm11 = vcmp.lt.s32.totalorder %v327_v52, 64 }
 0x104   :  { %v414_v56 = vpop.f32.mrf.mxu2 }
 0x105   :  { %v415_v57 = vadd.f32 %v414_v56, %v129_v55  ;;  %v474_v7 = vpop.f32.mrf.mxu3 }
 0x106   :  { %v475_v12 = vadd.f32 %v474_v7, %v252_v34 }
 0x107   :  { %v2313_v58 = vmul.f32 -1.442695, %v415_v57 }
 0x109   :  { %v2356_v59 = vpop.eup %2355  ;;  %2357 = vpow2.f32 %v2313_v58 }
 0x10a   :  { %v487_v60 = vadd.f32 1.0, %v2356_v59 }
 0x10c   :  { %2359 = vrcp.f32 %v487_v60  ;;  %v454_v62 = vpop.f32.mrf.mxu2  ;;  %v515_v4 = vand.u32 2147483648, %v487_v60  ;;  %vm509_vm4 = vweird.f32 %v487_v60  ;;  %v513_v16 = vand.u32 2147483647, %v487_v60 }
 0x10d   :  { %v455_v63 = vadd.f32 %v454_v62, %v211_v27 }
 0x10e   :  { %v516_v27 = vor.u32 1.1754944e-38, %v515_v4  ;;  %vm514_vm8 = vcmp.eq.f32.partialorder %v513_v16, 8.507059e+37  ;;  %v132_v4 = vpop.f32.mrf.mxu0 }
 0x10f   :  { %v2358_v0 = vpop.eup %2357  ;;  %v2315_v1 = vmul.f32 -1.442695, %v455_v63 }
 0x110   :  { %v486_v2 = vadd.f32 1.0, %v2358_v0 }
 0x111   :  { %2361 = vpow2.f32 %v2315_v1 }
 0x112   :  { %v2360_v3 = vpop.eup %2359  ;;  %2363 = vrcp.f32 %v486_v2  ;;  %v500_v19 = vand.u32 2147483648, %v486_v2  ;;  %v498_v28 = vand.u32 2147483647, %v486_v2  ;;  %vm494_vm7 = vweird.f32 %v486_v2 }
 0x113   :  { %v505_v5 = vmul.f32 %v2360_v3, %v487_v60  ;;  %vm510_vm3 = vweird.f32 %v2360_v3 }
 0x114   :  { %vm3095_vm5 = vmor %vm509_vm4, %vm510_vm3  ;;  %v501_v55 = vor.u32 1.1754944e-38, %v500_v19  ;;  %vm499_vm10 = vcmp.eq.f32.partialorder %v498_v28, 8.507059e+37 }
 0x115   :  { %v506_v8 = vsub.f32 1.0, %v505_v5 }
 0x117   :  { %v2362_v9 = vpop.eup %2361  ;;  %v507_v10 = vmul.f32 %v2360_v3, %v506_v8 }
 0x118   :  { %v2364_v11 = vpop.eup %2363  ;;  %v488_v13 = vadd.f32 1.0, %v2362_v9 }
 0x119   :  { %v490_v14 = vmul.f32 %v2364_v11, %v486_v2  ;;  %v508_v15 = vadd.f32 %v2360_v3, %v507_v10  ;;  %vm495_vm6 = vweird.f32 %v2364_v11 }
 0x11a   :  { %2365 = vrcp.f32 %v488_v13  ;;  %vm496_vm9 = vmor %vm494_vm7, %vm495_vm6  ;;  %v530_v7 = vand.u32 2147483648, %v488_v13  ;;  %vm524_vm13 = vweird.f32 %v488_v13  ;;  %v528_v8 = vand.u32 2147483647, %v488_v13 }
 0x11b   :  { %v491_v6 = vsub.f32 1.0, %v490_v14  ;;  %2367 = vtanh.f32 %v475_v12  ;;  %v512_v23 = vsel %vm3095_vm5, %v2360_v3, %v508_v15 }
 0x11c   :  { %v517_v56 = vsel %vm514_vm8, %v516_v27, %v512_v23  ;;  %v531_v10 = vor.u32 1.1754944e-38, %v530_v7  ;;  %vm529_vm15 = vcmp.eq.f32.partialorder %v528_v8, 8.507059e+37 }
 0x11d   :  { %v492_v26 = vmul.f32 %v2364_v11, %v491_v6  ;;  %v535_v63 = vmul.f32 %v517_v56, %v325_v54  ;;  %v3110_v6 = vpop.f32.mrf.mxu0 }
 0x11f   :  { %v493_v34 = vadd.f32 %v2364_v11, %v492_v26 }
 0x120   :  { %v2366_v51 = vpop.eup %2365 }
 0x121   :  { %v520_v57 = vmul.f32 %v2366_v51, %v488_v13  ;;  %v497_v58 = vsel %vm496_vm9, %v2364_v11, %v493_v34  ;;  %v2368_v59 = vpop.eup %2367  ;;  %vm525_vm12 = vweird.f32 %v2366_v51 }
 0x122   :  { %v502_v60 = vsel %vm499_vm10, %v501_v55, %v497_v58  ;;  %vm526_vm14 = vmor %vm524_vm13, %vm525_vm12 }
 0x123   :  { %v521_v62 = vsub.f32 1.0, %v520_v57  ;;  %v536_v0 = vmul.f32 %v2368_v59, %v502_v60 }
 0x125   :  { %v537_v1 = vadd.f32 %v536_v0, %v535_v63  ;;  %v522_v3 = vmul.f32 %v2366_v51, %v521_v62  ;;  %v3112_v16 = vpop.f32.mrf.mxu0 }
 0x126   :  { %4109 = vst [vmem:[#allocation29_spill] sm:$0xff] %v3112_v16  ;;  %v3300_v16 = vld [vmem:[#allocation6 + $0x30] sm:$0xff] }
 0x127   :  { %2369 = vtanh.f32 %v537_v1  ;;  %v3106_v2 = vsel %vm328_vm11, %v537_v1, %v325_v54  ;;  %v523_v5 = vadd.f32 %v2366_v51, %v522_v3 }
 0x129   :  { %v527_v9 = vsel %vm526_vm14, %v2366_v51, %v523_v5 }
 0x12a   :  { %v532_v12 = vsel %vm529_vm15, %v531_v10, %v527_v9 }
 0x12d   :  { %v2370_v11 = vpop.eup %2369 }
 0x12e   :  { %v539_v14 = vmul.f32 %v2370_v11, %v532_v12 }
 0x130   :  { %v540_v15 = vsel %vm328_vm11, %v539_v14, %v2973_v29 }
 0x131   :  { %562 = vmatmul.f32.vlgmr.msrb.gmra.mxu0 %v540_v15  ;;  %582 = vmatmul.f32.vlgmr.msrb.gmra.mxu1 %v540_v15 }
 0x132   :  { %602 = vmatmul.f32.vlgmr.msrb.gmra.mxu2 %v540_v15  ;;  %622 = vmatmul.f32.vlgmr.msrb.gmra.mxu3 %v540_v15 }
 0x1ae   :  { %v563_v13 = vpop.f32.mrf.mxu0  ;;  %v583_v18 = vpop.f32.mrf.mxu1 }
 0x1af   :  { %v564_v19 = vadd.f32 %v563_v13, %v132_v4  ;;  %v584_v20 = vadd.f32 %v583_v18, %v3047_v30 }
 0x1b1   :  { %v2316_v22 = vmul.f32 -1.442695, %v564_v19  ;;  %v2317_v25 = vmul.f32 -1.442695, %v584_v20 }
 0x1b3   :  { %2371 = vpow2.f32 %v2316_v22 }
 0x1b4   :  { %2373 = vpow2.f32 %v2317_v25 }
 0x1b5   :  { %v603_v26 = vpop.f32.mrf.mxu2  ;;  %v623_v52 = vpop.f32.mrf.mxu3 }
 0x1b6   :  { %v604_v29 = vadd.f32 %v603_v26, %v3054_v32  ;;  %v624_v30 = vadd.f32 %v623_v52, %v3063_v37 }
 0x1b8   :  { %v2318_v28 = vmul.f32 -1.442695, %v604_v29 }
 0x1b9   :  { %v2372_v23 = vpop.eup %2371 }
 0x1ba   :  { %v2374_v27 = vpop.eup %2373  ;;  %v635_v34 = vadd.f32 1.0, %v2372_v23  ;;  %2375 = vpow2.f32 %v2318_v28 }
 0x1bb   :  { %v636_v51 = vadd.f32 1.0, %v2374_v27 }
 0x1bc   :  { %2377 = vrcp.f32 %v635_v34  ;;  %v649_v62 = vand.u32 2147483648, %v635_v34  ;;  %v647_v1 = vand.u32 2147483647, %v635_v34  ;;  %vm643_vm3 = vweird.f32 %v635_v34 }
 0x1bd   :  { %2379 = vrcp.f32 %v636_v51  ;;  %v664_v63 = vand.u32 2147483648, %v636_v51  ;;  %v662_v5 = vand.u32 2147483647, %v636_v51  ;;  %vm658_vm4 = vweird.f32 %v636_v51 }
 0x1be   :  { %v650_v9 = vor.u32 1.1754944e-38, %v649_v62  ;;  %vm648_vm7 = vcmp.eq.f32.partialorder %v647_v1, 8.507059e+37  ;;  %v3155_v62 = vld [vmem:[#allocation6 + $0x1b0] sm:$0xff]  ;;  %v3165_v1 = vld [vmem:[#allocation6 + $0x188] sm:$0xff] }
 0x1bf   :  { %v665_v11 = vor.u32 1.1754944e-38, %v664_v63  ;;  %vm663_vm8 = vcmp.eq.f32.partialorder %v662_v5, 8.507059e+37  ;;  %v3159_v63 = vld [vmem:[#allocation6 + $0x1b8] sm:$0xff]  ;;  %4117 = vst [vmem:[#allocation37_spill] sm:$0xff] %v3165_v1 }
 0x1c0   :  { %v2376_v54 = vpop.eup %2375  ;;  %4115 = vst [vmem:[#allocation35_spill] sm:$0xff] %v3159_v63  ;;  %v3171_v5 = vld [vmem:[#allocation6 + $0x198] sm:$0xff] }
 0x1c1   :  { %v637_v55 = vadd.f32 1.0, %v2376_v54  ;;  %v3129_v54 = vld [vmem:[#allocation6 + $0x1e8] sm:$0xff] }
 0x1c2   :  { %v2378_v56 = vpop.eup %2377  ;;  %4111 = vst [vmem:[#allocation31_spill] sm:$0xff] %v3129_v54  ;;  %990 = vmatpush.msrb.mxu1 %v3129_v54 }
 0x1c3   :  { %v2380_v57 = vpop.eup %2379  ;;  %v639_v58 = vmul.f32 %v2378_v56, %v635_v34  ;;  %2381 = vrcp.f32 %v637_v55  ;;  %vm644_vm0 = vweird.f32 %v2378_v56  ;;  %v679_v29 = vand.u32 2147483648, %v637_v55 }
 0x1c4   :  { %v654_v59 = vmul.f32 %v2380_v57, %v636_v51  ;;  %2383 = vtanh.f32 %v624_v30  ;;  %vm659_vm1 = vweird.f32 %v2380_v57  ;;  %vm645_vm5 = vmor %vm643_vm3, %vm644_vm0  ;;  %vm673_vm10 = vweird.f32 %v637_v55  ;;  %v3139_v30 = vld [vmem:[#allocation6 + $0x1c0] sm:$0xff] }
 0x1c5   :  { %v640_v60 = vsub.f32 1.0, %v639_v58  ;;  %vm660_vm6 = vmor %vm658_vm4, %vm659_vm1  ;;  %v677_v28 = vand.u32 2147483647, %v637_v55  ;;  %v680_v27 = vor.u32 1.1754944e-38, %v679_v29  ;;  %4113 = vst [vmem:[#allocation33_spill] sm:$0xff] %v3139_v30  ;;  %v3143_v58 = vld [vmem:[#allocation6 + $0x1d0] sm:$0xff] }
 0x1c6   :  { %v655_v32 = vsub.f32 1.0, %v654_v59  ;;  %v3147_v59 = vld [vmem:[#allocation6 + $0x1d8] sm:$0xff]  ;;  %v3223_v29 = vld [vmem:[#allocation6 + $0xe0] sm:$0xff] }
 0x1c7   :  { %v641_v0 = vmul.f32 %v2378_v56, %v640_v60  ;;  %vm678_vm12 = vcmp.eq.f32.partialorder %v677_v28, 8.507059e+37  ;;  %v3151_v60 = vld [vmem:[#allocation6 + $0x1a0] sm:$0xff]  ;;  %v3225_v28 = vld [vmem:[#allocation6 + $0xe8] sm:$0xff] }
 0x1c8   :  { %v656_v3 = vmul.f32 %v2380_v57, %v655_v32  ;;  %v3153_v32 = vld [vmem:[#allocation6 + $0x1a8] sm:$0xff] }
 0x1c9   :  { %v2382_v7 = vpop.eup %2381  ;;  %v642_v8 = vadd.f32 %v2378_v56, %v641_v0  ;;  %v3163_v0 = vld [vmem:[#allocation6 + $0x180] sm:$0xff] }
 0x1ca   :  { %v669_v37 = vmul.f32 %v2382_v7, %v637_v55  ;;  %v657_v10 = vadd.f32 %v2380_v57, %v656_v3  ;;  %v2384_v14 = vpop.eup %2383  ;;  %vm674_vm9 = vweird.f32 %v2382_v7  ;;  %v3131_v55 = vld [vmem:[#allocation6 + $0x1f0] sm:$0xff]  ;;  %4116 = vst [vmem:[#allocation36_spill] sm:$0xff] %v3163_v0 }
 0x1cb   :  { %v646_v12 = vsel %vm645_vm5, %v2378_v56, %v642_v8  ;;  %vm675_vm11 = vmor %vm673_vm10, %vm674_vm9  ;;  %4112 = vst [vmem:[#allocation32_spill] sm:$0xff] %v3131_v55  ;;  %v3135_v56 = vld [vmem:[#allocation6 + $0x1f8] sm:$0xff]  ;;  %1010 = vmatpush.msrb.mxu2 %v3131_v55  ;;  %v3167_v3 = vld [vmem:[#allocation6 + $0x190] sm:$0xff] }
 0x1cc   :  { %v670_v15 = vsub.f32 1.0, %v669_v37  ;;  %v651_v4 = vsel %vm648_vm7, %v650_v9, %v646_v12  ;;  %v661_v13 = vsel %vm660_vm6, %v2380_v57, %v657_v10  ;;  %1030 = vmatpush.msrb.mxu3 %v3135_v56  ;;  %v3141_v57 = vld [vmem:[#allocation6 + $0x1c8] sm:$0xff]  ;;  %4118 = vst [vmem:[#allocation38_spill] sm:$0xff] %v3167_v3  ;;  %v3179_v37 = vld [vmem:[#allocation6 + $0x170] sm:$0xff]  ;;  %v3183_v9 = vld [vmem:[#allocation6 + $0x178] sm:$0xff] }
 0x1cd   :  { %v666_v18 = vsel %vm663_vm8, %v665_v11, %v661_v13  ;;  %v685_v19 = vmul.f32 %v2384_v14, %v651_v4  ;;  %4114 = vst [vmem:[#allocation34_spill] sm:$0xff] %v3141_v57  ;;  %991 = vmatpush.msrb.mxu1 %v3141_v57  ;;  %1011 = vmatpush.msrb.mxu2 %v3143_v58  ;;  %v3177_v8 = vld [vmem:[#allocation6 + $0x168] sm:$0xff]  ;;  %v3187_v10 = vld [vmem:[#allocation6 + $0x140] sm:$0xff]  ;;  %v3191_v12 = vld [vmem:[#allocation6 + $0x150] sm:$0xff] }
 0x1ce   :  { %v671_v20 = vmul.f32 %v2382_v7, %v670_v15  ;;  %v684_v22 = vmul.f32 %v666_v18, %v3106_v2  ;;  %v3127_v2 = vld [vmem:[#allocation6 + $0x1e0] sm:$0xff]  ;;  %1031 = vmatpush.msrb.mxu3 %v3147_v59  ;;  %4119 = vst [vmem:[#allocation39_spill] sm:$0xff] %v3183_v9  ;;  %v3189_v11 = vld [vmem:[#allocation6 + $0x148] sm:$0xff]  ;;  %v3195_v14 = vld [vmem:[#allocation6 + $0x158] sm:$0xff] }
 0x1cf   :  { %970 = vmatpush.msrb.mxu0 %v3127_v2  ;;  %992 = vmatpush.msrb.mxu1 %v3153_v32  ;;  %4120 = vst [vmem:[#allocation40_spill] sm:$0xff] %v3191_v12  ;;  %v3199_v15 = vld [vmem:[#allocation6 + $0x120] sm:$0xff]  ;;  %v3201_v4 = vld [vmem:[#allocation6 + $0x128] sm:$0xff]  ;;  %v3203_v13 = vld [vmem:[#allocation6 + $0x130] sm:$0xff] }
 0x1d0   :  { %v3118_v25 = vadd.f32 %v685_v19, %v684_v22  ;;  %v672_v26 = vadd.f32 %v2382_v7, %v671_v20  ;;  %1012 = vmatpush.msrb.mxu2 %v3155_v62  ;;  %1032 = vmatpush.msrb.mxu3 %v3159_v63  ;;  %4121 = vst [vmem:[#allocation41_spill] sm:$0xff] %v3195_v14  ;;  %v3207_v18 = vld [vmem:[#allocation6 + $0x138] sm:$0xff]  ;;  %v3211_v19 = vld [vmem:[#allocation6 + $0x100] sm:$0xff]  ;;  %v3213_v20 = vld [vmem:[#allocation6 + $0x108] sm:$0xff] }
 0x1d1   :  { %971 = vmatpush.msrb.mxu0 %v3139_v30  ;;  %993 = vmatpush.msrb.mxu1 %v3165_v1  ;;  %4122 = vst [vmem:[#allocation42_spill] sm:$0xff] %v3199_v15  ;;  %v3215_v22 = vld [vmem:[#allocation6 + $0x110] sm:$0xff] }
 0x1d2   :  { %2385 = vtanh.f32 %v3118_v25  ;;  %v676_v23 = vsel %vm675_vm11, %v2382_v7, %v672_v26  ;;  %1013 = vmatpush.msrb.mxu2 %v3167_v3  ;;  %1033 = vmatpush.msrb.mxu3 %v3171_v5  ;;  %v3175_v7 = vld [vmem:[#allocation6 + $0x160] sm:$0xff]  ;;  %4123 = vst [vmem:[#allocation43_spill] sm:$0xff] %v3201_v4  ;;  %v3219_v26 = vld [vmem:[#allocation6 + $0x118] sm:$0xff] }
 0x1d3   :  { %v681_v51 = vsel %vm678_vm12, %v680_v27, %v676_v23  ;;  %972 = vmatpush.msrb.mxu0 %v3151_v60  ;;  %994 = vmatpush.msrb.mxu1 %v3177_v8  ;;  %v3227_v23 = vld [vmem:[#allocation6 + $0xf0] sm:$0xff]  ;;  %v3231_v27 = vld [vmem:[#allocation6 + $0xf8] sm:$0xff] }
 0x1d4   :  { %1014 = vmatpush.msrb.mxu2 %v3179_v37  ;;  %1034 = vmatpush.msrb.mxu3 %v3183_v9 }
 0x1d5   :  { %973 = vmatpush.msrb.mxu0 %v3163_v0  ;;  %995 = vmatpush.msrb.mxu1 %v3189_v11 }
 0x1d6   :  { %1015 = vmatpush.msrb.mxu2 %v3191_v12  ;;  %1035 = vmatpush.msrb.mxu3 %v3195_v14 }
 0x1d7   :  { %974 = vmatpush.msrb.mxu0 %v3175_v7  ;;  %996 = vmatpush.msrb.mxu1 %v3201_v4 }
 0x1d8   :  { %v2386_v34 = vpop.eup %2385  ;;  %1016 = vmatpush.msrb.mxu2 %v3203_v13  ;;  %1036 = vmatpush.msrb.mxu3 %v3207_v18 }
 0x1d9   :  { %v3121_v52 = vmul.f32 %v2386_v34, %v681_v51  ;;  %975 = vmatpush.msrb.mxu0 %v3187_v10  ;;  %997 = vmatpush.msrb.mxu1 %v3213_v20 }
 0x1da   :  { %1017 = vmatpush.msrb.mxu2 %v3215_v22  ;;  %1037 = vmatpush.msrb.mxu3 %v3219_v26 }
 0x1db   :  { %4110 = vst [vmem:[#allocation30_spill] sm:$0xff] %v3121_v52  ;;  %774 = vmatmul.f32.vlgmr.msra.gmra.mxu0 %v3121_v52  ;;  %794 = vmatmul.f32.vlgmr.msra.gmra.mxu1 %v3121_v52 }
 0x1dc   :  { %814 = vmatmul.f32.vlgmr.msra.gmra.mxu2 %v3121_v52  ;;  %834 = vmatmul.f32.vlgmr.msra.gmra.mxu3 %v3121_v52  ;;  %v3235_v52 = vld [vmem:[#allocation6 + $0xc0] sm:$0xff] }
 0x1dd   :  { %976 = vmatpush.msrb.mxu0 %v3199_v15  ;;  %998 = vmatpush.msrb.mxu1 %v3225_v28 }
 0x1de   :  { %1018 = vmatpush.msrb.mxu2 %v3227_v23  ;;  %1038 = vmatpush.msrb.mxu3 %v3231_v27 }
 0x1df   :  { %977 = vmatpush.msrb.mxu0 %v3211_v19  ;;  %999 = vmatpush.msrb.mxu1 %v3237_v61 }
 0x1e0   :  { %1019 = vmatpush.msrb.mxu2 %v3239_v50  ;;  %1039 = vmatpush.msrb.mxu3 %v3245_v53 }
 0x1e1   :  { %978 = vmatpush.msrb.mxu0 %v3223_v29  ;;  %1000 = vmatpush.msrb.mxu1 %v3251_v45 }
 0x1e2   :  { %1020 = vmatpush.msrb.mxu2 %v3253_v24 }
 0x1e3   :  { %979 = vmatpush.msrb.mxu0 %v3235_v52 }
 0x1e4   :  { %1021 = vmatpush.msrb.mxu2 %v3265_v44 }
 0x1e5   :  { %980 = vmatpush.msrb.mxu0 %v3249_v47 }
 0x1e6   :  { %1022 = vmatpush.msrb.mxu2 %v3277_v21 }
 0x1e8   :  { %1023 = vmatpush.msrb.mxu2 %v3287_v17 }
 0x1ea   :  { %1024 = vmatpush.msrb.mxu2 %v3300_v16 }
 0x258   :  { %v775_v34 = vpop.f32.mrf.mxu0  ;;  %v795_v51 = vpop.f32.mrf.mxu1 }
 0x259   :  { %v776_v48 = vadd.f32 %v775_v34, %v3110_v6  ;;  %v796_v31 = vadd.f32 %v795_v51, %v3057_v33  ;;  %v3257_v33 = vld [vmem:[#allocation6 + $0xb8] sm:$0xff]  ;;  %v3261_v34 = vld [vmem:[#allocation6 + $0x80] sm:$0xff]  ;;  %v3263_v51 = vld [vmem:[#allocation6 + $0x88] sm:$0xff] }
 0x25a   :  { %1040 = vmatpush.msrb.mxu3 %v3257_v33  ;;  %981 = vmatpush.msrb.mxu0 %v3261_v34 }
 0x25b   :  { %v2319_v49 = vmul.f32 -1.442695, %v776_v48  ;;  %v2320_v6 = vmul.f32 -1.442695, %v796_v31  ;;  %1001 = vmatpush.msrb.mxu1 %v3263_v51  ;;  %v3269_v31 = vld [vmem:[#allocation6 + $0x98] sm:$0xff]  ;;  %v3271_v48 = vld [vmem:[#allocation6 + $0x60] sm:$0xff] }
 0x25c   :  { %4124 = vst [vmem:[#allocation44_spill] sm:$0xff] %v3269_v31  ;;  %1041 = vmatpush.msrb.mxu3 %v3269_v31  ;;  %982 = vmatpush.msrb.mxu0 %v3271_v48 }
 0x25d   :  { %2387 = vpow2.f32 %v2319_v49  ;;  %4125 = vst [vmem:[#allocation45_spill] sm:$0xff] %v3271_v48  ;;  %v3281_v49 = vld [vmem:[#allocation6 + $0x40] sm:$0xff]  ;;  %1002 = vmatpush.msrb.mxu1 %v3273_v42  ;;  %v3302_v42 = vld [vmem:[#allocation6 + $0x38] sm:$0xff] }
 0x25e   :  { %2389 = vpow2.f32 %v2320_v6  ;;  %4129 = vst [vmem:[#allocation49_spill] sm:$0xff] %v3281_v49  ;;  %v3289_v6 = vld [vmem:[#allocation6 + $0x58] sm:$0xff]  ;;  %1042 = vmatpush.msrb.mxu3 %v3279_v46  ;;  %983 = vmatpush.msrb.mxu0 %v3281_v49  ;;  %v3312_v49 = vld [vmem:[#allocation6 + $0x10] sm:$0xff] }
 0x25f   :  { %v815_v41 = vpop.f32.mrf.mxu2  ;;  %1003 = vmatpush.msrb.mxu1 %v3285_v39  ;;  %v3314_v39 = vld [vmem:[#allocation6 + $0x18] sm:$0xff]  ;;  %1025 = vmatpush.msrb.mxu2 %v3312_v49 }
 0x260   :  { %v816_v43 = vadd.f32 %v815_v41, %v3059_v35  ;;  %1043 = vmatpush.msrb.mxu3 %v3289_v6  ;;  %v3306_v35 = vld [vmem:[#allocation6] sm:$0xff]  ;;  %v3308_v41 = vld [vmem:[#allocation6 + $0x8] sm:$0xff]  ;;  %984 = vmatpush.msrb.mxu0 %v3294_v38 }
 0x261   :  { %1004 = vmatpush.msrb.mxu1 %v3296_v36  ;;  %1222 = vmatpush.msra.mxu2 %v3131_v55 }
 0x262   :  { %v2321_v48 = vmul.f32 -1.442695, %v816_v43  ;;  %1044 = vmatpush.msrb.mxu3 %v3302_v42  ;;  %985 = vmatpush.msrb.mxu0 %v3306_v35 }
 0x263   :  { %v2388_v46 = vpop.eup %2387  ;;  %1005 = vmatpush.msrb.mxu1 %v3308_v41  ;;  %1223 = vmatpush.msra.mxu2 %v3143_v58 }
 0x264   :  { %v2390_v21 = vpop.eup %2389  ;;  %v3316_v31 = vadd.f32 1.0, %v2388_v46  ;;  %2391 = vpow2.f32 %v2321_v48  ;;  %1045 = vmatpush.msrb.mxu3 %v3314_v39  ;;  %1182 = vmatpush.msra.mxu0 %v3127_v2 }
 0x265   :  { %v3320_v43 = vadd.f32 1.0, %v2390_v21  ;;  %1202 = vmatpush.msra.mxu1 %v3129_v54  ;;  %v835_v21 = vpop.f32.mrf.mxu3  ;;  %1224 = vmatpush.msra.mxu2 %v3155_v62 }
 0x266   :  { %2393 = vrcp.f32 %v3316_v31  ;;  %1242 = vmatpush.msra.mxu3 %v3135_v56  ;;  %1183 = vmatpush.msra.mxu0 %v3139_v30  ;;  %v836_v55 = vadd.f32 %v835_v21, %v3069_v40  ;;  %vm855_vm15 = vweird.f32 %v3316_v31 }
 0x267   :  { %2395 = vrcp.f32 %v3320_v43  ;;  %1203 = vmatpush.msra.mxu1 %v3141_v57  ;;  %1225 = vmatpush.msra.mxu2 %v3167_v3  ;;  %v859_v3 = vand.u32 2147483647, %v3316_v31  ;;  %vm870_vm0 = vweird.f32 %v3320_v43 }
 0x268   :  { %1243 = vmatpush.msra.mxu3 %v3147_v59  ;;  %1184 = vmatpush.msra.mxu0 %v3151_v60 }
 0x269   :  { %1204 = vmatpush.msra.mxu1 %v3153_v32  ;;  %1226 = vmatpush.msra.mxu2 %v3179_v37  ;;  %vm860_vm4 = vcmp.eq.f32.partialorder %v859_v3, 8.507059e+37 }
 0x26a   :  { %v2392_v46 = vpop.eup %2391  ;;  %1244 = vmatpush.msra.mxu3 %v3159_v63  ;;  %1185 = vmatpush.msra.mxu0 %v3163_v0  ;;  %v861_v63 = vand.u32 2147483648, %v3316_v31 }
 0x26b   :  { %v3336_v48 = vadd.f32 1.0, %v2392_v46  ;;  %1205 = vmatpush.msra.mxu1 %v3165_v1  ;;  %v876_v1 = vand.u32 2147483648, %v3320_v43  ;;  %1227 = vmatpush.msra.mxu2 %v3191_v12 }
 0x26c   :  { %v2394_v54 = vpop.eup %2393  ;;  %1245 = vmatpush.msra.mxu3 %v3171_v5  ;;  %1186 = vmatpush.msra.mxu0 %v3175_v7 }
 0x26d   :  { %v2396_v30 = vpop.eup %2395  ;;  %v851_v57 = vmul.f32 %v2394_v54, %v3316_v31  ;;  %2397 = vrcp.f32 %v3336_v48  ;;  %1206 = vmatpush.msra.mxu1 %v3177_v8  ;;  %vm856_vm13 = vweird.f32 %v2394_v54  ;;  %1228 = vmatpush.msra.mxu2 %v3203_v13  ;;  %vm885_vm7 = vweird.f32 %v3336_v48 }
 0x26e   :  { %v866_v46 = vmul.f32 %v2396_v30, %v3320_v43  ;;  %2399 = vtanh.f32 %v836_v55  ;;  %1246 = vmatpush.msra.mxu3 %v3183_v9  ;;  %1187 = vmatpush.msra.mxu0 %v3187_v10  ;;  %vm871_vm14 = vweird.f32 %v2396_v30  ;;  %vm857_vm1 = vmor %vm855_vm15, %vm856_vm13 }
 0x26f   :  { %v852_v40 = vsub.f32 1.0, %v851_v57  ;;  %1207 = vmatpush.msra.mxu1 %v3189_v11  ;;  %vm872_vm3 = vmor %vm870_vm0, %vm871_vm14  ;;  %1229 = vmatpush.msra.mxu2 %v3215_v22 }
 0x270   :  { %v867_v21 = vsub.f32 1.0, %v866_v46  ;;  %v874_v46 = vand.u32 2147483647, %v3320_v43  ;;  %1247 = vmatpush.msra.mxu3 %v3195_v14  ;;  %1188 = vmatpush.msra.mxu0 %v3199_v15 }
 0x271   :  { %v853_v0 = vmul.f32 %v2394_v54, %v852_v40  ;;  %1208 = vmatpush.msra.mxu1 %v3201_v4  ;;  %1230 = vmatpush.msra.mxu2 %v3227_v23 }
 0x272   :  { %v868_v57 = vmul.f32 %v2396_v30, %v867_v21  ;;  %v862_v21 = vor.u32 1.1754944e-38, %v861_v63  ;;  %1248 = vmatpush.msra.mxu3 %v3207_v18  ;;  %1189 = vmatpush.msra.mxu0 %v3211_v19  ;;  %vm875_vm5 = vcmp.eq.f32.partialorder %v874_v46, 8.507059e+37 }
 0x273   :  { %v3362_v55 = vpop.eup %2397  ;;  %v854_v9 = vadd.f32 %v2394_v54, %v853_v0  ;;  %v877_v0 = vor.u32 1.1754944e-38, %v876_v1  ;;  %1209 = vmatpush.msra.mxu1 %v3213_v20  ;;  %1231 = vmatpush.msra.mxu2 %v3239_v50 }
 0x274   :  { %v881_v40 = vmul.f32 %v3362_v55, %v3336_v48  ;;  %v869_v12 = vadd.f32 %v2396_v30, %v868_v57  ;;  %v2400_v43 = vpop.eup %2399  ;;  %1249 = vmatpush.msra.mxu3 %v3219_v26  ;;  %1190 = vmatpush.msra.mxu0 %v3223_v29  ;;  %vm886_vm6 = vweird.f32 %v3362_v55 }
 0x275   :  { %v858_v31 = vsel %vm857_vm1, %v2394_v54, %v854_v9  ;;  %1210 = vmatpush.msra.mxu1 %v3225_v28  ;;  %1232 = vmatpush.msra.mxu2 %v3253_v24  ;;  %v889_v9 = vand.u32 2147483647, %v3336_v48  ;;  %vm887_vm8 = vmor %vm885_vm7, %vm886_vm6 }
 0x276   :  { %v882_v4 = vsub.f32 1.0, %v881_v40  ;;  %v863_v15 = vsel %vm860_vm4, %v862_v21, %v858_v31  ;;  %v873_v14 = vsel %vm872_vm3, %v2396_v30, %v869_v12  ;;  %1250 = vmatpush.msra.mxu3 %v3231_v27  ;;  %1191 = vmatpush.msra.mxu0 %v3235_v52  ;;  %v4131_v12 = vld [vmem:[#allocation44_spill] sm:$0xff]  ;;  %v4134_v40 = vld [vmem:[#allocation47_spill] sm:$0xff] }
 0x277   :  { %v878_v63 = vsel %vm875_vm5, %v877_v0, %v873_v14  ;;  %v897_v57 = vmul.f32 %v2400_v43, %v863_v15  ;;  %1211 = vmatpush.msra.mxu1 %v3237_v61  ;;  %1233 = vmatpush.msra.mxu2 %v3265_v44  ;;  %v4132_v15 = vld [vmem:[#allocation45_spill] sm:$0xff]  ;;  %v4135_v21 = vld [vmem:[#allocation48_spill] sm:$0xff]  ;;  %vm890_vm9 = vcmp.eq.f32.partialorder %v889_v9, 8.507059e+37  ;;  %v4137_v0 = vld [vmem:[#allocation50_spill] sm:$0xff] }
 0x278   :  { %v883_v54 = vmul.f32 %v3362_v55, %v882_v4  ;;  %v896_v1 = vmul.f32 %v878_v63, %v3118_v25  ;;  %1251 = vmatpush.msra.mxu3 %v3245_v53  ;;  %1192 = vmatpush.msra.mxu0 %v3249_v47  ;;  %v891_v25 = vand.u32 2147483648, %v3336_v48  ;;  %v4133_v4 = vld [vmem:[#allocation46_spill] sm:$0xff]  ;;  %v4136_v48 = vld [vmem:[#allocation49_spill] sm:$0xff]  ;;  %v4139_v63 = vld [vmem:[#allocation31_spill] sm:$0xff] }
 0x279   :  { %1212 = vmatpush.msra.mxu1 %v3251_v45  ;;  %1234 = vmatpush.msra.mxu2 %v4134_v40 }
 0x27a   :  { %v3386_v30 = vadd.f32 %v897_v57, %v896_v1  ;;  %v884_v3 = vadd.f32 %v3362_v55, %v883_v54  ;;  %1252 = vmatpush.msra.mxu3 %v3257_v33  ;;  %1193 = vmatpush.msra.mxu0 %v3261_v34  ;;  %v892_v46 = vor.u32 1.1754944e-38, %v891_v25  ;;  %v4140_v57 = vld [vmem:[#allocation32_spill] sm:$0xff]  ;;  %v4141_v54 = vld [vmem:[#allocation33_spill] sm:$0xff]  ;;  %v4142_v1 = vld [vmem:[#allocation34_spill] sm:$0xff] }
 0x27b   :  { %1213 = vmatpush.msra.mxu1 %v3263_v51  ;;  %1235 = vmatpush.msra.mxu2 %v3287_v17  ;;  %v4145_v25 = vld [vmem:[#allocation37_spill] sm:$0xff] }
 0x27c   :  { %2401 = vtanh.f32 %v3386_v30  ;;  %1253 = vmatpush.msra.mxu3 %v4131_v12  ;;  %v888_v14 = vsel %vm887_vm8, %v3362_v55, %v884_v3  ;;  %1194 = vmatpush.msra.mxu0 %v4132_v15  ;;  %v4144_v3 = vld [vmem:[#allocation36_spill] sm:$0xff] }
 0x27d   :  { %1214 = vmatpush.msra.mxu1 %v4133_v4  ;;  %v893_v43 = vsel %vm890_vm9, %v892_v46, %v888_v14  ;;  %1236 = vmatpush.msra.mxu2 %v3300_v16 }
 0x27e   :  { %1254 = vmatpush.msra.mxu3 %v4135_v21  ;;  %1195 = vmatpush.msra.mxu0 %v4136_v48 }
 0x27f   :  { %1215 = vmatpush.msra.mxu1 %v4137_v0  ;;  %1237 = vmatpush.msra.mxu2 %v3312_v49 }
 0x280   :  { %1255 = vmatpush.msra.mxu3 %v3289_v6  ;;  %1196 = vmatpush.msra.mxu0 %v3294_v38 }
 0x281   :  { %1216 = vmatpush.msra.mxu1 %v3296_v36 }
 0x282   :  { %v2402_v31 = vpop.eup %2401  ;;  %1256 = vmatpush.msra.mxu3 %v3302_v42  ;;  %1197 = vmatpush.msra.mxu0 %v3306_v35 }
 0x283   :  { %v3413_v55 = vmul.f32 %v2402_v31, %v893_v43  ;;  %1217 = vmatpush.msra.mxu1 %v3308_v41 }
 0x284   :  { %1257 = vmatpush.msra.mxu3 %v3314_v39 }
 0x285   :  { %4138 = vst [vmem:[#allocation44_spill] sm:$0xff] %v3413_v55  ;;  %986 = vmatmul.f32.vlgmr.msrb.gmra.mxu0 %v3413_v55  ;;  %1006 = vmatmul.f32.vlgmr.msrb.gmra.mxu1 %v3413_v55 }
 0x286   :  { %1026 = vmatmul.f32.vlgmr.msrb.gmra.mxu2 %v3413_v55  ;;  %1046 = vmatmul.f32.vlgmr.msrb.gmra.mxu3 %v3413_v55  ;;  %v3694_v55 = vld [vmem:[#allocation6 + $0x38] sm:$0xff] }
 0x287   :  { %1394 = vmatpush.msrb.mxu0 %v3127_v2  ;;  %1414 = vmatpush.msrb.mxu1 %v4139_v63  ;;  %v4143_v2 = vld [vmem:[#allocation35_spill] sm:$0xff] }
 0x288   :  { %1434 = vmatpush.msrb.mxu2 %v4140_v57  ;;  %1454 = vmatpush.msrb.mxu3 %v3135_v56  ;;  %v4146_v56 = vld [vmem:[#allocation38_spill] sm:$0xff] }
 0x289   :  { %1395 = vmatpush.msrb.mxu0 %v4141_v54  ;;  %1415 = vmatpush.msrb.mxu1 %v4142_v1 }
 0x28a   :  { %1435 = vmatpush.msrb.mxu2 %v3143_v58  ;;  %1455 = vmatpush.msrb.mxu3 %v3147_v59  ;;  %v4147_v58 = vld [vmem:[#allocation39_spill] sm:$0xff]  ;;  %v4148_v59 = vld [vmem:[#allocation40_spill] sm:$0xff] }
 0x28b   :  { %1396 = vmatpush.msrb.mxu0 %v3151_v60  ;;  %1416 = vmatpush.msrb.mxu1 %v3153_v32  ;;  %v4149_v60 = vld [vmem:[#allocation41_spill] sm:$0xff]  ;;  %v4150_v32 = vld [vmem:[#allocation42_spill] sm:$0xff] }
 0x28c   :  { %1436 = vmatpush.msrb.mxu2 %v3155_v62  ;;  %1456 = vmatpush.msrb.mxu3 %v4143_v2  ;;  %v4151_v62 = vld [vmem:[#allocation43_spill] sm:$0xff] }
 0x28d   :  { %1397 = vmatpush.msrb.mxu0 %v4144_v3  ;;  %1417 = vmatpush.msrb.mxu1 %v4145_v25 }
 0x28e   :  { %1437 = vmatpush.msrb.mxu2 %v4146_v56  ;;  %1457 = vmatpush.msrb.mxu3 %v3171_v5 }
 0x28f   :  { %1398 = vmatpush.msrb.mxu0 %v3175_v7  ;;  %1418 = vmatpush.msrb.mxu1 %v3177_v8 }
 0x290   :  { %1438 = vmatpush.msrb.mxu2 %v3179_v37  ;;  %1458 = vmatpush.msrb.mxu3 %v4147_v58 }
 0x291   :  { %1399 = vmatpush.msrb.mxu0 %v3187_v10  ;;  %1419 = vmatpush.msrb.mxu1 %v3189_v11 }
 0x292   :  { %1439 = vmatpush.msrb.mxu2 %v4148_v59  ;;  %1459 = vmatpush.msrb.mxu3 %v4149_v60  ;;  %v4157_v59 = vld [vmem:[#allocation10_spill] sm:$0xff] }
 0x293   :  { %1400 = vmatpush.msrb.mxu0 %v4150_v32  ;;  %1420 = vmatpush.msrb.mxu1 %v4151_v62  ;;  %v4158_v32 = vld [vmem:[#allocation16_spill] sm:$0xff] }
 0x294   :  { %1440 = vmatpush.msrb.mxu2 %v3203_v13  ;;  %1460 = vmatpush.msrb.mxu3 %v3207_v18  ;;  %v4155_v13 = vld [vmem:[#allocation19_spill] sm:$0xff] }
 0x295   :  { %1401 = vmatpush.msrb.mxu0 %v3211_v19  ;;  %1421 = vmatpush.msrb.mxu1 %v3213_v20 }
 0x296   :  { %1441 = vmatpush.msrb.mxu2 %v3215_v22  ;;  %1461 = vmatpush.msrb.mxu3 %v3219_v26 }
 0x297   :  { %1402 = vmatpush.msrb.mxu0 %v3223_v29  ;;  %1422 = vmatpush.msrb.mxu1 %v3225_v28 }
 0x298   :  { %1442 = vmatpush.msrb.mxu2 %v3227_v23  ;;  %1462 = vmatpush.msrb.mxu3 %v3231_v27 }
 0x299   :  { %1403 = vmatpush.msrb.mxu0 %v3235_v52  ;;  %1423 = vmatpush.msrb.mxu1 %v3237_v61 }
 0x29a   :  { %1443 = vmatpush.msrb.mxu2 %v3239_v50  ;;  %1463 = vmatpush.msrb.mxu3 %v3245_v53 }
 0x29b   :  { %1404 = vmatpush.msrb.mxu0 %v3249_v47  ;;  %1424 = vmatpush.msrb.mxu1 %v3251_v45  ;;  %v4153_v47 = vld [vmem:[#allocation14_spill] sm:$0xff] }
 0x29c   :  { %1444 = vmatpush.msrb.mxu2 %v3253_v24  ;;  %1464 = vmatpush.msrb.mxu3 %v3257_v33 }
 0x29d   :  { %1405 = vmatpush.msrb.mxu0 %v3261_v34  ;;  %1425 = vmatpush.msrb.mxu1 %v3263_v51 }
 0x29e   :  { %1445 = vmatpush.msrb.mxu2 %v3265_v44  ;;  %1465 = vmatpush.msrb.mxu3 %v4131_v12  ;;  %v4152_v44 = vld [vmem:[#allocation29_spill] sm:$0xff] }
 0x29f   :  { %1406 = vmatpush.msrb.mxu0 %v4132_v15  ;;  %1426 = vmatpush.msrb.mxu1 %v4133_v4 }
 0x2a0   :  { %1446 = vmatpush.msrb.mxu2 %v4134_v40  ;;  %1466 = vmatpush.msrb.mxu3 %v4135_v21 }
 0x2a1   :  { %1407 = vmatpush.msrb.mxu0 %v4136_v48  ;;  %1427 = vmatpush.msrb.mxu1 %v4137_v0 }
 0x2a2   :  { %1447 = vmatpush.msrb.mxu2 %v3287_v17  ;;  %1467 = vmatpush.msrb.mxu3 %v3289_v6 }
 0x2a3   :  { %1408 = vmatpush.msrb.mxu0 %v3294_v38  ;;  %1428 = vmatpush.msrb.mxu1 %v3296_v36 }
 0x2a4   :  { %1448 = vmatpush.msrb.mxu2 %v3300_v16  ;;  %1468 = vmatpush.msrb.mxu3 %v3302_v42  ;;  %v4154_v42 = vld [vmem:[#allocation15_spill] sm:$0xff] }
 0x2a5   :  { %1409 = vmatpush.msrb.mxu0 %v3306_v35  ;;  %1429 = vmatpush.msrb.mxu1 %v3308_v41 }
 0x2a6   :  { %1449 = vmatpush.msrb.mxu2 %v3312_v49  ;;  %1469 = vmatpush.msrb.mxu3 %v3314_v39 }
 0x302   :  { %v987_v24 = vpop.f32.mrf.mxu0  ;;  %v1007_v17 = vpop.f32.mrf.mxu1 }
 0x303   :  { %v988_v45 = vadd.f32 %v987_v24, %v4152_v44  ;;  %v1008_v38 = vadd.f32 %v1007_v17, %v4153_v47 }
 0x305   :  { %v2322_v50 = vmul.f32 -1.442695, %v988_v45  ;;  %v2323_v36 = vmul.f32 -1.442695, %v1008_v38  ;;  %v4159_v45 = vld [vmem:[#allocation17_spill] sm:$0xff] }
 0x307   :  { %2403 = vpow2.f32 %v2322_v50 }
 0x308   :  { %2405 = vpow2.f32 %v2323_v36 }
 0x309   :  { %v1027_v53 = vpop.f32.mrf.mxu2  ;;  %v1047_v39 = vpop.f32.mrf.mxu3 }
 0x30a   :  { %v1028_v61 = vadd.f32 %v1027_v53, %v4154_v42  ;;  %v1048_v18 = vadd.f32 %v1047_v39, %v4155_v13 }
 0x30c   :  { %v2324_v16 = vmul.f32 -1.442695, %v1028_v61 }
 0x30d   :  { %v2404_v52 = vpop.eup %2403 }
 0x30e   :  { %v2406_v5 = vpop.eup %2405  ;;  %v1059_v7 = vadd.f32 1.0, %v2404_v52  ;;  %2407 = vpow2.f32 %v2324_v16 }
 0x30f   :  { %v1060_v8 = vadd.f32 1.0, %v2406_v5 }
 0x310   :  { %2409 = vrcp.f32 %v1059_v7  ;;  %v1073_v28 = vand.u32 2147483648, %v1059_v7  ;;  %v1071_v33 = vand.u32 2147483647, %v1059_v7  ;;  %vm1067_vm12 = vweird.f32 %v1059_v7 }
 0x311   :  { %2411 = vrcp.f32 %v1060_v8  ;;  %v1088_v23 = vand.u32 2147483648, %v1060_v8  ;;  %v1086_v51 = vand.u32 2147483647, %v1060_v8  ;;  %vm1082_vm13 = vweird.f32 %v1060_v8 }
 0x312   :  { %v1074_v41 = vor.u32 1.1754944e-38, %v1073_v28  ;;  %vm1072_vm0 = vcmp.eq.f32.partialorder %v1071_v33, 8.507059e+37 }
 0x313   :  { %v1089_v12 = vor.u32 1.1754944e-38, %v1088_v23  ;;  %vm1087_vm1 = vcmp.eq.f32.partialorder %v1086_v51, 8.507059e+37 }
 0x314   :  { %v2408_v37 = vpop.eup %2407 }
 0x315   :  { %v1061_v10 = vadd.f32 1.0, %v2408_v37 }
 0x316   :  { %v2410_v11 = vpop.eup %2409 }
 0x317   :  { %v2412_v19 = vpop.eup %2411  ;;  %v1063_v20 = vmul.f32 %v2410_v11, %v1059_v7  ;;  %2413 = vrcp.f32 %v1061_v10  ;;  %vm1068_vm10 = vweird.f32 %v2410_v11  ;;  %v1103_v57 = vand.u32 2147483648, %v1061_v10  ;;  %v4160_v7 = vld [vmem:[#allocation22_spill] sm:$0xff] }
 0x318   :  { %v1078_v22 = vmul.f32 %v2412_v19, %v1060_v8  ;;  %2415 = vtanh.f32 %v1048_v18  ;;  %vm1083_vm11 = vweird.f32 %v2412_v19  ;;  %vm1069_vm14 = vmor %vm1067_vm12, %vm1068_vm10  ;;  %vm1097_vm4 = vweird.f32 %v1061_v10 }
 0x319   :  { %v1064_v26 = vsub.f32 1.0, %v1063_v20  ;;  %vm1084_vm15 = vmor %vm1082_vm13, %vm1083_vm11  ;;  %v1101_v54 = vand.u32 2147483647, %v1061_v10  ;;  %v1104_v2 = vor.u32 1.1754944e-38, %v1103_v57 }
 0x31a   :  { %v1079_v29 = vsub.f32 1.0, %v1078_v22 }
 0x31b   :  { %v1065_v27 = vmul.f32 %v2410_v11, %v1064_v26  ;;  %vm1102_vm6 = vcmp.eq.f32.partialorder %v1101_v54, 8.507059e+37 }
 0x31c   :  { %v1080_v34 = vmul.f32 %v2412_v19, %v1079_v29 }
 0x31d   :  { %v2414_v49 = vpop.eup %2413  ;;  %v1066_v6 = vadd.f32 %v2410_v11, %v1065_v27 }
 0x31e   :  { %v1093_v35 = vmul.f32 %v2414_v49, %v1061_v10  ;;  %v1081_v9 = vadd.f32 %v2412_v19, %v1080_v34  ;;  %v2416_v15 = vpop.eup %2415  ;;  %vm1098_vm3 = vweird.f32 %v2414_v49 }
 0x31f   :  { %v1070_v14 = vsel %vm1069_vm14, %v2410_v11, %v1066_v6  ;;  %vm1099_vm5 = vmor %vm1097_vm4, %vm1098_vm3 }
 0x320   :  { %v1094_v4 = vsub.f32 1.0, %v1093_v35  ;;  %v1075_v46 = vsel %vm1072_vm0, %v1074_v41, %v1070_v14  ;;  %v1085_v40 = vsel %vm1084_vm15, %v2412_v19, %v1081_v9 }
 0x321   :  { %v1090_v21 = vsel %vm1087_vm1, %v1089_v12, %v1085_v40  ;;  %v1109_v48 = vmul.f32 %v2416_v15, %v1075_v46 }
 0x322   :  { %v1095_v0 = vmul.f32 %v2414_v49, %v1094_v4  ;;  %v1108_v31 = vmul.f32 %v1090_v21, %v3386_v30 }
 0x324   :  { %v3496_v43 = vadd.f32 %v1109_v48, %v1108_v31  ;;  %v1096_v63 = vadd.f32 %v2414_v49, %v1095_v0 }
 0x326   :  { %2417 = vtanh.f32 %v3496_v43  ;;  %v1100_v1 = vsel %vm1099_vm5, %v2414_v49, %v1096_v63 }
 0x327   :  { %v1105_v25 = vsel %vm1102_vm6, %v1104_v2, %v1100_v1  ;;  %v3521_v1 = vld [vmem:[#allocation6 + $0x1e8] sm:$0xff]  ;;  %v3523_v2 = vld [vmem:[#allocation6 + $0x1f0] sm:$0xff] }
 0x328   :  { %4163 = vst [vmem:[#allocation48_spill] sm:$0xff] %v3521_v1 }
 0x329   :  { %4164 = vst [vmem:[#allocation49_spill] sm:$0xff] %v3523_v2 }
 0x32c   :  { %v2418_v3 = vpop.eup %2417 }
 0x32d   :  { %v3499_v56 = vmul.f32 %v2418_v3, %v1105_v25  ;;  %v3527_v3 = vld [vmem:[#allocation6 + $0x1f8] sm:$0xff]  ;;  %v3531_v25 = vld [vmem:[#allocation6 + $0x1c0] sm:$0xff] }
 0x32e   :  { %4165 = vst [vmem:[#allocation50_spill] sm:$0xff] %v3531_v25 }
 0x32f   :  { %4156 = vst [vmem:[#allocation45_spill] sm:$0xff] %v3499_v56  ;;  %1198 = vmatmul.f32.vlgmr.msra.gmra.mxu0 %v3499_v56  ;;  %1218 = vmatmul.f32.vlgmr.msra.gmra.mxu1 %v3499_v56 }
 0x330   :  { %1238 = vmatmul.f32.vlgmr.msra.gmra.mxu2 %v3499_v56  ;;  %1258 = vmatmul.f32.vlgmr.msra.gmra.mxu3 %v3499_v56  ;;  %v3692_v56 = vld [vmem:[#allocation6 + $0x30] sm:$0xff] }
 0x331   :  { %1626 = vmatpush.msra.mxu1 %v3521_v1  ;;  %1646 = vmatpush.msra.mxu2 %v3523_v2 }
 0x332   :  { %1666 = vmatpush.msra.mxu3 %v3527_v3 }
 0x3ac   :  { %v1199_v30 = vpop.f32.mrf.mxu0  ;;  %v1219_v58 = vpop.f32.mrf.mxu1 }
 0x3ad   :  { %v1200_v60 = vadd.f32 %v1199_v30, %v4157_v59  ;;  %v1220_v62 = vadd.f32 %v1219_v58, %v4158_v32  ;;  %v3533_v30 = vld [vmem:[#allocation6 + $0x1c8] sm:$0xff]  ;;  %v3535_v58 = vld [vmem:[#allocation6 + $0x1d0] sm:$0xff]  ;;  %v3539_v59 = vld [vmem:[#allocation6 + $0x1d8] sm:$0xff] }
 0x3ae   :  { %4166 = vst [vmem:[#allocation31_spill] sm:$0xff] %v3533_v30  ;;  %1627 = vmatpush.msra.mxu1 %v3533_v30  ;;  %1647 = vmatpush.msra.mxu2 %v3535_v58  ;;  %v3545_v32 = vld [vmem:[#allocation6 + $0x1a8] sm:$0xff] }
 0x3af   :  { %v2325_v24 = vmul.f32 -1.442695, %v1200_v60  ;;  %v2326_v17 = vmul.f32 -1.442695, %v1220_v62  ;;  %1667 = vmatpush.msra.mxu3 %v3539_v59  ;;  %v3543_v60 = vld [vmem:[#allocation6 + $0x1a0] sm:$0xff]  ;;  %v3547_v62 = vld [vmem:[#allocation6 + $0x1b0] sm:$0xff] }
 0x3b0   :  { %1628 = vmatpush.msra.mxu1 %v3545_v32  ;;  %1648 = vmatpush.msra.mxu2 %v3547_v62 }
 0x3b1   :  { %2419 = vpow2.f32 %v2325_v24  ;;  %v3551_v24 = vld [vmem:[#allocation6 + $0x1b8] sm:$0xff] }
 0x3b2   :  { %2421 = vpow2.f32 %v2326_v17  ;;  %4167 = vst [vmem:[#allocation32_spill] sm:$0xff] %v3551_v24  ;;  %1668 = vmatpush.msra.mxu3 %v3551_v24  ;;  %v3555_v17 = vld [vmem:[#allocation6 + $0x180] sm:$0xff] }
 0x3b3   :  { %v1239_v44 = vpop.f32.mrf.mxu2  ;;  %v1259_v61 = vpop.f32.mrf.mxu3  ;;  %4168 = vst [vmem:[#allocation33_spill] sm:$0xff] %v3555_v17 }
 0x3b4   :  { %v1240_v47 = vadd.f32 %v1239_v44, %v4159_v45  ;;  %v1260_v8 = vadd.f32 %v1259_v61, %v4160_v7  ;;  %v3557_v44 = vld [vmem:[#allocation6 + $0x188] sm:$0xff]  ;;  %v3559_v45 = vld [vmem:[#allocation6 + $0x190] sm:$0xff] }
 0x3b5   :  { %4169 = vst [vmem:[#allocation34_spill] sm:$0xff] %v3557_v44  ;;  %1629 = vmatpush.msra.mxu1 %v3557_v44  ;;  %1649 = vmatpush.msra.mxu2 %v3559_v45  ;;  %v3581_v61 = vld [vmem:[#allocation6 + $0x148] sm:$0xff] }
 0x3b6   :  { %v2327_v38 = vmul.f32 -1.442695, %v1240_v47  ;;  %4170 = vst [vmem:[#allocation35_spill] sm:$0xff] %v3559_v45  ;;  %v3563_v47 = vld [vmem:[#allocation6 + $0x198] sm:$0xff]  ;;  %v3593_v7 = vld [vmem:[#allocation6 + $0x128] sm:$0xff] }
 0x3b7   :  { %v2420_v50 = vpop.eup %2419  ;;  %1669 = vmatpush.msra.mxu3 %v3563_v47  ;;  %4175 = vst [vmem:[#allocation40_spill] sm:$0xff] %v3593_v7 }
 0x3b8   :  { %v2422_v36 = vpop.eup %2421  ;;  %v1271_v53 = vadd.f32 1.0, %v2420_v50  ;;  %2423 = vpow2.f32 %v2327_v38  ;;  %v3567_v38 = vld [vmem:[#allocation6 + $0x160] sm:$0xff]  ;;  %v3569_v50 = vld [vmem:[#allocation6 + $0x168] sm:$0xff] }
 0x3b9   :  { %v1272_v42 = vadd.f32 1.0, %v2422_v36  ;;  %v3571_v36 = vld [vmem:[#allocation6 + $0x170] sm:$0xff]  ;;  %1630 = vmatpush.msra.mxu1 %v3569_v50 }
 0x3ba   :  { %2425 = vrcp.f32 %v1271_v53  ;;  %v1285_v18 = vand.u32 2147483648, %v1271_v53  ;;  %v1283_v22 = vand.u32 2147483647, %v1271_v53  ;;  %vm1279_vm9 = vweird.f32 %v1271_v53  ;;  %1650 = vmatpush.msra.mxu2 %v3571_v36 }
 0x3bb   :  { %2427 = vrcp.f32 %v1272_v42  ;;  %v1300_v19 = vand.u32 2147483648, %v1272_v42  ;;  %v1298_v29 = vand.u32 2147483647, %v1272_v42  ;;  %vm1294_vm10 = vweird.f32 %v1272_v42  ;;  %1631 = vmatpush.msra.mxu1 %v3581_v61 }
 0x3bc   :  { %v1286_v33 = vor.u32 1.1754944e-38, %v1285_v18  ;;  %vm1284_vm13 = vcmp.eq.f32.partialorder %v1283_v22, 8.507059e+37  ;;  %v3615_v18 = vld [vmem:[#allocation6 + $0xe0] sm:$0xff]  ;;  %v3623_v22 = vld [vmem:[#allocation6 + $0xf8] sm:$0xff] }
 0x3bd   :  { %v1301_v51 = vor.u32 1.1754944e-38, %v1300_v19  ;;  %vm1299_vm14 = vcmp.eq.f32.partialorder %v1298_v29, 8.507059e+37  ;;  %1632 = vmatpush.msra.mxu1 %v3593_v7  ;;  %v3617_v19 = vld [vmem:[#allocation6 + $0xe8] sm:$0xff] }
 0x3be   :  { %v2424_v16 = vpop.eup %2423 }
 0x3bf   :  { %v1273_v52 = vadd.f32 1.0, %v2424_v16  ;;  %v3583_v16 = vld [vmem:[#allocation6 + $0x150] sm:$0xff] }
 0x3c0   :  { %v2426_v5 = vpop.eup %2425  ;;  %4172 = vst [vmem:[#allocation37_spill] sm:$0xff] %v3583_v16  ;;  %1651 = vmatpush.msra.mxu2 %v3583_v16 }
 0x3c1   :  { %v2428_v39 = vpop.eup %2427  ;;  %v1275_v37 = vmul.f32 %v2426_v5, %v1271_v53  ;;  %2429 = vrcp.f32 %v1273_v52  ;;  %vm1280_vm7 = vweird.f32 %v2426_v5  ;;  %v1315_v21 = vand.u32 2147483648, %v1273_v52  ;;  %v3575_v53 = vld [vmem:[#allocation6 + $0x178] sm:$0xff] }
 0x3c2   :  { %v1290_v10 = vmul.f32 %v2428_v39, %v1272_v42  ;;  %2431 = vtanh.f32 %v1260_v8  ;;  %vm1295_vm8 = vweird.f32 %v2428_v39  ;;  %vm1281_vm11 = vmor %vm1279_vm9, %vm1280_vm7  ;;  %vm1309_vm0 = vweird.f32 %v1273_v52  ;;  %4171 = vst [vmem:[#allocation36_spill] sm:$0xff] %v3575_v53  ;;  %1670 = vmatpush.msra.mxu3 %v3575_v53  ;;  %v3579_v42 = vld [vmem:[#allocation6 + $0x140] sm:$0xff]  ;;  %v3595_v8 = vld [vmem:[#allocation6 + $0x130] sm:$0xff] }
 0x3c3   :  { %v1276_v11 = vsub.f32 1.0, %v1275_v37  ;;  %vm1296_vm12 = vmor %vm1294_vm10, %vm1295_vm8  ;;  %v1313_v48 = vand.u32 2147483647, %v1273_v52  ;;  %v1316_v31 = vor.u32 1.1754944e-38, %v1315_v21  ;;  %1652 = vmatpush.msra.mxu2 %v3595_v8  ;;  %v3603_v37 = vld [vmem:[#allocation6 + $0x100] sm:$0xff]  ;;  %v3657_v21 = vld [vmem:[#allocation6 + $0x90] sm:$0xff] }
 0x3c4   :  { %v1291_v13 = vsub.f32 1.0, %v1290_v10  ;;  %v3605_v10 = vld [vmem:[#allocation6 + $0x108] sm:$0xff] }
 0x3c5   :  { %v1277_v20 = vmul.f32 %v2426_v5, %v1276_v11  ;;  %vm1314_vm3 = vcmp.eq.f32.partialorder %v1313_v48, 8.507059e+37  ;;  %v3607_v11 = vld [vmem:[#allocation6 + $0x110] sm:$0xff]  ;;  %1633 = vmatpush.msra.mxu1 %v3605_v10  ;;  %v3661_v48 = vld [vmem:[#allocation6 + $0x98] sm:$0xff] }
 0x3c6   :  { %v1292_v26 = vmul.f32 %v2428_v39, %v1291_v13  ;;  %v3611_v13 = vld [vmem:[#allocation6 + $0x118] sm:$0xff]  ;;  %1653 = vmatpush.msra.mxu2 %v3607_v11 }
 0x3c7   :  { %v2430_v28 = vpop.eup %2429  ;;  %v1278_v23 = vadd.f32 %v2426_v5, %v1277_v20  ;;  %v3619_v20 = vld [vmem:[#allocation6 + $0xf0] sm:$0xff]  ;;  %1634 = vmatpush.msra.mxu1 %v3617_v19 }
 0x3c8   :  { %v1305_v27 = vmul.f32 %v2430_v28, %v1273_v52  ;;  %v1293_v34 = vadd.f32 %v2428_v39, %v1292_v26  ;;  %v2432_v6 = vpop.eup %2431  ;;  %vm1310_vm15 = vweird.f32 %v2430_v28  ;;  %v3587_v52 = vld [vmem:[#allocation6 + $0x158] sm:$0xff]  ;;  %1654 = vmatpush.msra.mxu2 %v3619_v20 }
 0x3c9   :  { %v1282_v49 = vsel %vm1281_vm11, %v2426_v5, %v1278_v23  ;;  %vm1311_vm1 = vmor %vm1309_vm0, %vm1310_vm15  ;;  %4173 = vst [vmem:[#allocation38_spill] sm:$0xff] %v3587_v52  ;;  %1671 = vmatpush.msra.mxu3 %v3587_v52  ;;  %v3591_v5 = vld [vmem:[#allocation6 + $0x120] sm:$0xff]  ;;  %v3629_v23 = vld [vmem:[#allocation6 + $0xc8] sm:$0xff] }
 0x3ca   :  { %v1306_v35 = vsub.f32 1.0, %v1305_v27  ;;  %v1287_v41 = vsel %vm1284_vm13, %v1286_v33, %v1282_v49  ;;  %v1297_v9 = vsel %vm1296_vm12, %v2428_v39, %v1293_v34  ;;  %4174 = vst [vmem:[#allocation39_spill] sm:$0xff] %v3591_v5  ;;  %v3599_v39 = vld [vmem:[#allocation6 + $0x138] sm:$0xff]  ;;  %v3631_v27 = vld [vmem:[#allocation6 + $0xd0] sm:$0xff]  ;;  %v4176_v33 = vld [vmem:[#allocation11_spill] sm:$0xff]  ;;  %1635 = vmatpush.msra.mxu1 %v3629_v23 }
 0x3cb   :  { %v1302_v12 = vsel %vm1299_vm14, %v1301_v51, %v1297_v9  ;;  %v1321_v14 = vmul.f32 %v2432_v6, %v1287_v41  ;;  %1672 = vmatpush.msra.mxu3 %v3599_v39  ;;  %v4177_v51 = vld [vmem:[#allocation18_spill] sm:$0xff]  ;;  %v3637_v6 = vld [vmem:[#allocation6 + $0xd8] sm:$0xff]  ;;  %1655 = vmatpush.msra.mxu2 %v3631_v27  ;;  %v3643_v41 = vld [vmem:[#allocation6 + $0xa8] sm:$0xff] }
 0x3cc   :  { %v1307_v15 = vmul.f32 %v2430_v28, %v1306_v35  ;;  %v1320_v4 = vmul.f32 %v1302_v12, %v3496_v43  ;;  %v3519_v43 = vld [vmem:[#allocation6 + $0x1e0] sm:$0xff]  ;;  %v3645_v9 = vld [vmem:[#allocation6 + $0xb0] sm:$0xff]  ;;  %1636 = vmatpush.msra.mxu1 %v3643_v41 }
 0x3cd   :  { %4162 = vst [vmem:[#allocation47_spill] sm:$0xff] %v3519_v43  ;;  %1606 = vmatpush.msra.mxu0 %v3519_v43  ;;  %1673 = vmatpush.msra.mxu3 %v3611_v13  ;;  %v3641_v35 = vld [vmem:[#allocation6 + $0xa0] sm:$0xff] }
 0x3ce   :  { %v3510_v46 = vadd.f32 %v1321_v14, %v1320_v4  ;;  %v1308_v40 = vadd.f32 %v2430_v28, %v1307_v15  ;;  %v3649_v15 = vld [vmem:[#allocation6 + $0xb8] sm:$0xff]  ;;  %1656 = vmatpush.msra.mxu2 %v3645_v9  ;;  %v3653_v4 = vld [vmem:[#allocation6 + $0x80] sm:$0xff] }
 0x3cf   :  { %1607 = vmatpush.msra.mxu0 %v3531_v25  ;;  %1674 = vmatpush.msra.mxu3 %v3623_v22 }
 0x3d0   :  { %2433 = vtanh.f32 %v3510_v46  ;;  %v1312_v0 = vsel %vm1311_vm1, %v2430_v28, %v1308_v40  ;;  %v3627_v28 = vld [vmem:[#allocation6 + $0xc0] sm:$0xff]  ;;  %v3655_v40 = vld [vmem:[#allocation6 + $0x88] sm:$0xff]  ;;  %1657 = vmatpush.msra.mxu2 %v3657_v21 }
 0x3d1   :  { %v1317_v57 = vsel %vm1314_vm3, %v1316_v31, %v1312_v0  ;;  %1608 = vmatpush.msra.mxu0 %v3543_v60  ;;  %1675 = vmatpush.msra.mxu3 %v3637_v6  ;;  %v3663_v0 = vld [vmem:[#allocation6 + $0x60] sm:$0xff]  ;;  %v3665_v31 = vld [vmem:[#allocation6 + $0x68] sm:$0xff] }
 0x3d2   :  { %1637 = vmatpush.msra.mxu1 %v3655_v40  ;;  %4178 = vst [vmem:[#allocation41_spill] sm:$0xff] %v3663_v0 }
 0x3d3   :  { %1609 = vmatpush.msra.mxu0 %v3555_v17  ;;  %1676 = vmatpush.msra.mxu3 %v3649_v15  ;;  %4179 = vst [vmem:[#allocation42_spill] sm:$0xff] %v3665_v31 }
 0x3d4   :  { %1638 = vmatpush.msra.mxu1 %v3665_v31 }
 0x3d5   :  { %1610 = vmatpush.msra.mxu0 %v3567_v38  ;;  %1677 = vmatpush.msra.mxu3 %v3661_v48 }
 0x3d6   :  { %v2434_v63 = vpop.eup %2433 }
 0x3d7   :  { %v3513_v54 = vmul.f32 %v2434_v63, %v1317_v57  ;;  %1611 = vmatpush.msra.mxu0 %v3579_v42  ;;  %v3669_v63 = vld [vmem:[#allocation6 + $0x70] sm:$0xff]  ;;  %v3671_v57 = vld [vmem:[#allocation6 + $0x78] sm:$0xff] }
 0x3d8   :  { %4180 = vst [vmem:[#allocation43_spill] sm:$0xff] %v3669_v63  ;;  %1658 = vmatpush.msra.mxu2 %v3669_v63  ;;  %1678 = vmatpush.msra.mxu3 %v3671_v57 }
 0x3d9   :  { %4161 = vst [vmem:[#allocation46_spill] sm:$0xff] %v3513_v54  ;;  %1410 = vmatmul.f32.vlgmr.msrb.gmra.mxu0 %v3513_v54  ;;  %1430 = vmatmul.f32.vlgmr.msrb.gmra.mxu1 %v3513_v54 }
 0x3da   :  { %1450 = vmatmul.f32.vlgmr.msrb.gmra.mxu2 %v3513_v54  ;;  %1470 = vmatmul.f32.vlgmr.msrb.gmra.mxu3 %v3513_v54  ;;  %4181 = vst [vmem:[#allocation29_spill] sm:$0xff] %v3671_v57  ;;  %v3688_v54 = vld [vmem:[#allocation6 + $0x28] sm:$0xff] }
 0x3db   :  { %1612 = vmatpush.msra.mxu0 %v3591_v5 }
 0x3dd   :  { %1613 = vmatpush.msra.mxu0 %v3603_v37 }
 0x3df   :  { %1614 = vmatpush.msra.mxu0 %v3615_v18 }
 0x3e1   :  { %1615 = vmatpush.msra.mxu0 %v3627_v28 }
 0x3e3   :  { %1616 = vmatpush.msra.mxu0 %v3641_v35 }
 0x3e5   :  { %1617 = vmatpush.msra.mxu0 %v3653_v4 }
 0x3e7   :  { %1618 = vmatpush.msra.mxu0 %v3663_v0 }
 0x456   :  { %v1411_v26 = vpop.f32.mrf.mxu0  ;;  %v1431_v29 = vpop.f32.mrf.mxu1 }
 0x457   :  { %v1412_v34 = vadd.f32 %v1411_v26, %v4176_v33  ;;  %v1432_v49 = vadd.f32 %v1431_v29, %v4177_v51  ;;  %v3673_v26 = vld [vmem:[#allocation6 + $0x40] sm:$0xff]  ;;  %v3677_v33 = vld [vmem:[#allocation6 + $0x48] sm:$0xff]  ;;  %v3681_v51 = vld [vmem:[#allocation6 + $0x58] sm:$0xff] }
 0x458   :  { %4182 = vst [vmem:[#allocation14_spill] sm:$0xff] %v3673_v26  ;;  %1619 = vmatpush.msra.mxu0 %v3673_v26  ;;  %1639 = vmatpush.msra.mxu1 %v3677_v33  ;;  %v3704_v26 = vld [vmem:[#allocation6 + $0x10] sm:$0xff] }
 0x459   :  { %v2328_v12 = vmul.f32 -1.442695, %v1412_v34  ;;  %v2329_v14 = vmul.f32 -1.442695, %v1432_v49  ;;  %4183 = vst [vmem:[#allocation15_spill] sm:$0xff] %v3677_v33  ;;  %v3679_v34 = vld [vmem:[#allocation6 + $0x50] sm:$0xff]  ;;  %1679 = vmatpush.msra.mxu3 %v3681_v51 }
 0x45a   :  { %v4184_v49 = vld [vmem:[#allocation20_spill] sm:$0xff]  ;;  %1659 = vmatpush.msra.mxu2 %v3679_v34  ;;  %1640 = vmatpush.msra.mxu1 %v3688_v54  ;;  %v3706_v33 = vld [vmem:[#allocation6 + $0x18] sm:$0xff] }
 0x45b   :  { %2435 = vpow2.f32 %v2328_v12  ;;  %1680 = vmatpush.msra.mxu3 %v3694_v55 }
 0x45c   :  { %2437 = vpow2.f32 %v2329_v14  ;;  %v3686_v14 = vld [vmem:[#allocation6 + $0x20] sm:$0xff]  ;;  %1660 = vmatpush.msra.mxu2 %v3692_v56 }
 0x45d   :  { %v1451_v29 = vpop.f32.mrf.mxu2  ;;  %1620 = vmatpush.msra.mxu0 %v3686_v14  ;;  %1681 = vmatpush.msra.mxu3 %v3706_v33 }
 0x45e   :  { %v1452_v12 = vadd.f32 %v1451_v29, %v4184_v49  ;;  %v3698_v29 = vld [vmem:[#allocation6] sm:$0xff]  ;;  %v3700_v49 = vld [vmem:[#allocation6 + $0x8] sm:$0xff]  ;;  %1661 = vmatpush.msra.mxu2 %v3704_v26 }
 0x45f   :  { %1621 = vmatpush.msra.mxu0 %v3698_v29  ;;  %1641 = vmatpush.msra.mxu1 %v3700_v49 }
 0x460   :  { %v2330_v31 = vmul.f32 -1.442695, %v1452_v12  ;;  %1858 = vmatpush.msrb.mxu2 %v3523_v2  ;;  %1878 = vmatpush.msrb.mxu3 %v3527_v3  ;;  %v4185_v2 = vld [vmem:[#allocation25_spill] sm:$0xff] }
 0x461   :  { %v2436_v57 = vpop.eup %2435  ;;  %1818 = vmatpush.msrb.mxu0 %v3519_v43  ;;  %1838 = vmatpush.msrb.mxu1 %v3521_v1 }
 0x462   :  { %v2438_v63 = vpop.eup %2437  ;;  %v3708_v0 = vadd.f32 1.0, %v2436_v57  ;;  %2439 = vpow2.f32 %v2330_v31  ;;  %v1471_v31 = vpop.f32.mrf.mxu3  ;;  %1859 = vmatpush.msrb.mxu2 %v3535_v58  ;;  %1879 = vmatpush.msrb.mxu3 %v3539_v59 }
 0x463   :  { %v3712_v12 = vadd.f32 1.0, %v2438_v63  ;;  %1819 = vmatpush.msrb.mxu0 %v3531_v25  ;;  %1839 = vmatpush.msrb.mxu1 %v3533_v30  ;;  %v1472_v43 = vadd.f32 %v1471_v31, %v4185_v2 }
 0x464   :  { %2441 = vrcp.f32 %v3708_v0  ;;  %1860 = vmatpush.msrb.mxu2 %v3547_v62  ;;  %1880 = vmatpush.msrb.mxu3 %v3551_v24  ;;  %v1497_v24 = vand.u32 2147483648, %v3708_v0  ;;  %vm1491_vm6 = vweird.f32 %v3708_v0 }
 0x465   :  { %2443 = vrcp.f32 %v3712_v12  ;;  %1820 = vmatpush.msrb.mxu0 %v3543_v60  ;;  %1840 = vmatpush.msrb.mxu1 %v3545_v32  ;;  %vm1506_vm7 = vweird.f32 %v3712_v12 }
 0x466   :  { %1861 = vmatpush.msrb.mxu2 %v3559_v45  ;;  %1881 = vmatpush.msrb.mxu3 %v3563_v47  ;;  %v1495_v45 = vand.u32 2147483647, %v3708_v0 }
 0x467   :  { %1821 = vmatpush.msrb.mxu0 %v3555_v17  ;;  %1841 = vmatpush.msrb.mxu1 %v3557_v44  ;;  %v1512_v44 = vand.u32 2147483648, %v3712_v12 }
 0x468   :  { %v2440_v63 = vpop.eup %2439  ;;  %1862 = vmatpush.msrb.mxu2 %v3571_v36  ;;  %1882 = vmatpush.msrb.mxu3 %v3575_v53  ;;  %vm1496_vm10 = vcmp.eq.f32.partialorder %v1495_v45, 8.507059e+37 }
 0x469   :  { %v3728_v57 = vadd.f32 1.0, %v2440_v63  ;;  %1822 = vmatpush.msrb.mxu0 %v3567_v38  ;;  %1842 = vmatpush.msrb.mxu1 %v3569_v50 }
 0x46a   :  { %v2442_v1 = vpop.eup %2441  ;;  %1863 = vmatpush.msrb.mxu2 %v3583_v16  ;;  %1883 = vmatpush.msrb.mxu3 %v3587_v52 }
 0x46b   :  { %v2444_v25 = vpop.eup %2443  ;;  %v1487_v30 = vmul.f32 %v2442_v1, %v3708_v0  ;;  %2445 = vrcp.f32 %v3728_v57  ;;  %vm1492_vm4 = vweird.f32 %v2442_v1  ;;  %1823 = vmatpush.msrb.mxu0 %v3579_v42  ;;  %1843 = vmatpush.msrb.mxu1 %v3581_v61  ;;  %vm1521_vm13 = vweird.f32 %v3728_v57 }
 0x46c   :  { %v1502_v63 = vmul.f32 %v2444_v25, %v3712_v12  ;;  %2447 = vtanh.f32 %v1472_v43  ;;  %vm1507_vm5 = vweird.f32 %v2444_v25  ;;  %vm1493_vm8 = vmor %vm1491_vm6, %vm1492_vm4  ;;  %1864 = vmatpush.msrb.mxu2 %v3595_v8  ;;  %1884 = vmatpush.msrb.mxu3 %v3599_v39 }
 0x46d   :  { %v1488_v2 = vsub.f32 1.0, %v1487_v30  ;;  %1824 = vmatpush.msrb.mxu0 %v3591_v5  ;;  %1844 = vmatpush.msrb.mxu1 %v3593_v7  ;;  %vm1508_vm9 = vmor %vm1506_vm7, %vm1507_vm5 }
 0x46e   :  { %v1503_v31 = vsub.f32 1.0, %v1502_v63  ;;  %v1510_v63 = vand.u32 2147483647, %v3712_v12  ;;  %1865 = vmatpush.msrb.mxu2 %v3607_v11  ;;  %1885 = vmatpush.msrb.mxu3 %v3611_v13 }
 0x46f   :  { %v1489_v17 = vmul.f32 %v2442_v1, %v1488_v2  ;;  %1825 = vmatpush.msrb.mxu0 %v3603_v37  ;;  %1845 = vmatpush.msrb.mxu1 %v3605_v10 }
 0x470   :  { %v1504_v30 = vmul.f32 %v2444_v25, %v1503_v31  ;;  %v1498_v31 = vor.u32 1.1754944e-38, %v1497_v24  ;;  %vm1511_vm11 = vcmp.eq.f32.partialorder %v1510_v63, 8.507059e+37  ;;  %1866 = vmatpush.msrb.mxu2 %v3619_v20  ;;  %1886 = vmatpush.msrb.mxu3 %v3623_v22  ;;  %v4188_v63 = vld [vmem:[#allocation43_spill] sm:$0xff] }
 0x471   :  { %v3754_v43 = vpop.eup %2445  ;;  %v1490_v53 = vadd.f32 %v2442_v1, %v1489_v17  ;;  %v1513_v17 = vor.u32 1.1754944e-38, %v1512_v44  ;;  %1826 = vmatpush.msrb.mxu0 %v3615_v18  ;;  %1846 = vmatpush.msrb.mxu1 %v3617_v19 }
 0x472   :  { %v1517_v2 = vmul.f32 %v3754_v43, %v3728_v57  ;;  %v1505_v16 = vadd.f32 %v2444_v25, %v1504_v30  ;;  %v2448_v12 = vpop.eup %2447  ;;  %1867 = vmatpush.msrb.mxu2 %v3631_v27  ;;  %1887 = vmatpush.msrb.mxu3 %v3637_v6  ;;  %vm1522_vm12 = vweird.f32 %v3754_v43 }
 0x473   :  { %v1494_v0 = vsel %vm1493_vm8, %v2442_v1, %v1490_v53  ;;  %1827 = vmatpush.msrb.mxu0 %v3627_v28  ;;  %1847 = vmatpush.msrb.mxu1 %v3629_v23  ;;  %v1525_v53 = vand.u32 2147483647, %v3728_v57  ;;  %vm1523_vm14 = vmor %vm1521_vm13, %vm1522_vm12 }
 0x474   :  { %v1518_v7 = vsub.f32 1.0, %v1517_v2  ;;  %v1499_v5 = vsel %vm1496_vm10, %v1498_v31, %v1494_v0  ;;  %v1509_v52 = vsel %vm1508_vm9, %v2444_v25, %v1505_v16  ;;  %1868 = vmatpush.msrb.mxu2 %v3645_v9  ;;  %1888 = vmatpush.msrb.mxu3 %v3649_v15  ;;  %v4189_v2 = vld [vmem:[#allocation29_spill] sm:$0xff]  ;;  %v4191_v31 = vld [vmem:[#allocation15_spill] sm:$0xff] }
 0x475   :  { %v1514_v24 = vsel %vm1511_vm11, %v1513_v17, %v1509_v52  ;;  %v1533_v30 = vmul.f32 %v2448_v12, %v1499_v5  ;;  %1828 = vmatpush.msrb.mxu0 %v3641_v35  ;;  %1848 = vmatpush.msrb.mxu1 %v3643_v41  ;;  %v4186_v52 = vld [vmem:[#allocation41_spill] sm:$0xff]  ;;  %v4187_v5 = vld [vmem:[#allocation42_spill] sm:$0xff]  ;;  %vm1526_vm15 = vcmp.eq.f32.partialorder %v1525_v53, 8.507059e+37  ;;  %v4192_v12 = vld [vmem:[#allocation47_spill] sm:$0xff] }
 0x476   :  { %v1519_v1 = vmul.f32 %v3754_v43, %v1518_v7  ;;  %v1532_v44 = vmul.f32 %v1514_v24, %v3510_v46  ;;  %v1527_v46 = vand.u32 2147483648, %v3728_v57  ;;  %1869 = vmatpush.msrb.mxu2 %v3657_v21  ;;  %1889 = vmatpush.msrb.mxu3 %v3661_v48  ;;  %v4190_v57 = vld [vmem:[#allocation14_spill] sm:$0xff]  ;;  %v4193_v24 = vld [vmem:[#allocation48_spill] sm:$0xff] }
 0x477   :  { %1829 = vmatpush.msrb.mxu0 %v3653_v4  ;;  %1849 = vmatpush.msrb.mxu1 %v3655_v40  ;;  %v4199_v53 = vld [vmem:[#allocation34_spill] sm:$0xff] }
 0x478   :  { %v3778_v25 = vadd.f32 %v1533_v30, %v1532_v44  ;;  %v1520_v45 = vadd.f32 %v3754_v43, %v1519_v1  ;;  %v1528_v7 = vor.u32 1.1754944e-38, %v1527_v46  ;;  %1870 = vmatpush.msrb.mxu2 %v4188_v63  ;;  %1890 = vmatpush.msrb.mxu3 %v4189_v2  ;;  %v4194_v30 = vld [vmem:[#allocation49_spill] sm:$0xff]  ;;  %v4195_v1 = vld [vmem:[#allocation50_spill] sm:$0xff]  ;;  %v4196_v44 = vld [vmem:[#allocation31_spill] sm:$0xff] }
 0x479   :  { %1830 = vmatpush.msrb.mxu0 %v4186_v52  ;;  %1850 = vmatpush.msrb.mxu1 %v4187_v5  ;;  %v4198_v46 = vld [vmem:[#allocation33_spill] sm:$0xff] }
 0x47a   :  { %2449 = vtanh.f32 %v3778_v25  ;;  %v1524_v16 = vsel %vm1523_vm14, %v3754_v43, %v1520_v45  ;;  %1871 = vmatpush.msrb.mxu2 %v3679_v34  ;;  %1891 = vmatpush.msrb.mxu3 %v3681_v51  ;;  %v4197_v45 = vld [vmem:[#allocation32_spill] sm:$0xff] }
 0x47b   :  { %1831 = vmatpush.msrb.mxu0 %v4190_v57  ;;  %1851 = vmatpush.msrb.mxu1 %v4191_v31  ;;  %v1529_v0 = vsel %vm1526_vm15, %v1528_v7, %v1524_v16 }
 0x47c   :  { %1872 = vmatpush.msrb.mxu2 %v3692_v56  ;;  %1892 = vmatpush.msrb.mxu3 %v3694_v55 }
 0x47d   :  { %1832 = vmatpush.msrb.mxu0 %v3686_v14  ;;  %1852 = vmatpush.msrb.mxu1 %v3688_v54 }
 0x47e   :  { %1873 = vmatpush.msrb.mxu2 %v3704_v26  ;;  %1893 = vmatpush.msrb.mxu3 %v3706_v33 }
 0x47f   :  { %1833 = vmatpush.msrb.mxu0 %v3698_v29  ;;  %1853 = vmatpush.msrb.mxu1 %v3700_v49 }
 0x480   :  { %v2450_v17 = vpop.eup %2449 }
 0x481   :  { %v3805_v43 = vmul.f32 %v2450_v17, %v1529_v0 }
 0x483   :  { %1622 = vmatmul.f32.vlgmr.msra.gmra.mxu0 %v3805_v43  ;;  %1642 = vmatmul.f32.vlgmr.msra.gmra.mxu1 %v3805_v43 }
 0x484   :  { %1662 = vmatmul.f32.vlgmr.msra.gmra.mxu2 %v3805_v43  ;;  %1682 = vmatmul.f32.vlgmr.msra.gmra.mxu3 %v3805_v43 }
 0x485   :  { %2030 = vmatpush.msra.mxu0 %v4192_v12  ;;  %2050 = vmatpush.msra.mxu1 %v4193_v24 }
 0x486   :  { %2070 = vmatpush.msra.mxu2 %v4194_v30  ;;  %2090 = vmatpush.msra.mxu3 %v3527_v3  ;;  %v4200_v3 = vld [vmem:[#allocation35_spill] sm:$0xff] }
 0x487   :  { %2031 = vmatpush.msra.mxu0 %v4195_v1  ;;  %2051 = vmatpush.msra.mxu1 %v4196_v44 }
 0x488   :  { %2071 = vmatpush.msra.mxu2 %v3535_v58  ;;  %2091 = vmatpush.msra.mxu3 %v3539_v59  ;;  %v4201_v58 = vld [vmem:[#allocation36_spill] sm:$0xff]  ;;  %v4202_v59 = vld [vmem:[#allocation37_spill] sm:$0xff] }
 0x489   :  { %2032 = vmatpush.msra.mxu0 %v3543_v60  ;;  %2052 = vmatpush.msra.mxu1 %v3545_v32  ;;  %v4203_v60 = vld [vmem:[#allocation38_spill] sm:$0xff]  ;;  %v4204_v32 = vld [vmem:[#allocation39_spill] sm:$0xff] }
 0x48a   :  { %2072 = vmatpush.msra.mxu2 %v3547_v62  ;;  %2092 = vmatpush.msra.mxu3 %v4197_v45  ;;  %v4205_v62 = vld [vmem:[#allocation40_spill] sm:$0xff] }
 0x48b   :  { %2033 = vmatpush.msra.mxu0 %v4198_v46  ;;  %2053 = vmatpush.msra.mxu1 %v4199_v53 }
 0x48c   :  { %2073 = vmatpush.msra.mxu2 %v4200_v3  ;;  %2093 = vmatpush.msra.mxu3 %v3563_v47 }
 0x48d   :  { %2034 = vmatpush.msra.mxu0 %v3567_v38  ;;  %2054 = vmatpush.msra.mxu1 %v3569_v50  ;;  %v4206_v50 = vld [vmem:[#allocation12_spill] sm:$0xff] }
 0x48e   :  { %2074 = vmatpush.msra.mxu2 %v3571_v36  ;;  %2094 = vmatpush.msra.mxu3 %v4201_v58  ;;  %v2211_v58 = vld [vmem:[%s4024_s4 + $0x70] sm:$0xff] }
 0x48f   :  { %2035 = vmatpush.msra.mxu0 %v3579_v42  ;;  %2055 = vmatpush.msra.mxu1 %v3581_v61  ;;  %v4207_v42 = vld [vmem:[#allocation21_spill] sm:$0xff] }
 0x490   :  { %2075 = vmatpush.msra.mxu2 %v4202_v59  ;;  %2095 = vmatpush.msra.mxu3 %v4203_v60  ;;  %v2210_v59 = vld [vmem:[%s4024_s4 + $0x68] sm:$0xff]  ;;  %v2209_v60 = vld [vmem:[%s4024_s4 + $0x60] sm:$0xff] }
 0x491   :  { %2036 = vmatpush.msra.mxu0 %v4204_v32  ;;  %2056 = vmatpush.msra.mxu1 %v4205_v62  ;;  %v2208_v32 = vld [vmem:[%s4024_s4 + $0x58] sm:$0xff] }
 0x492   :  { %2076 = vmatpush.msra.mxu2 %v3595_v8  ;;  %2096 = vmatpush.msra.mxu3 %v3599_v39 }
 0x493   :  { %2037 = vmatpush.msra.mxu0 %v3603_v37  ;;  %2057 = vmatpush.msra.mxu1 %v3605_v10 }
 0x494   :  { %2077 = vmatpush.msra.mxu2 %v3607_v11  ;;  %2097 = vmatpush.msra.mxu3 %v3611_v13 }
 0x495   :  { %2038 = vmatpush.msra.mxu0 %v3615_v18  ;;  %2058 = vmatpush.msra.mxu1 %v3617_v19 }
 0x496   :  { %2078 = vmatpush.msra.mxu2 %v3619_v20  ;;  %2098 = vmatpush.msra.mxu3 %v3623_v22 }
 0x497   :  { %2039 = vmatpush.msra.mxu0 %v3627_v28  ;;  %2059 = vmatpush.msra.mxu1 %v3629_v23  ;;  %v4209_v23 = vld [vmem:[#allocation27_spill] sm:$0xff] }
 0x498   :  { %2079 = vmatpush.msra.mxu2 %v3631_v27  ;;  %2099 = vmatpush.msra.mxu3 %v3637_v6 }
 0x499   :  { %2040 = vmatpush.msra.mxu0 %v3641_v35  ;;  %2060 = vmatpush.msra.mxu1 %v3643_v41 }
 0x49a   :  { %2080 = vmatpush.msra.mxu2 %v3645_v9  ;;  %2100 = vmatpush.msra.mxu3 %v3649_v15 }
 0x49b   :  { %2041 = vmatpush.msra.mxu0 %v3653_v4  ;;  %2061 = vmatpush.msra.mxu1 %v3655_v40 }
 0x49c   :  { %2081 = vmatpush.msra.mxu2 %v3657_v21  ;;  %2101 = vmatpush.msra.mxu3 %v3661_v48 }
 0x49d   :  { %2042 = vmatpush.msra.mxu0 %v4186_v52  ;;  %2062 = vmatpush.msra.mxu1 %v4187_v5 }
 0x49e   :  { %2082 = vmatpush.msra.mxu2 %v4188_v63  ;;  %2102 = vmatpush.msra.mxu3 %v4189_v2 }
 0x49f   :  { %2043 = vmatpush.msra.mxu0 %v4190_v57  ;;  %2063 = vmatpush.msra.mxu1 %v4191_v31 }
 0x4a0   :  { %2083 = vmatpush.msra.mxu2 %v3679_v34  ;;  %2103 = vmatpush.msra.mxu3 %v3681_v51 }
 0x4a1   :  { %2044 = vmatpush.msra.mxu0 %v3686_v14  ;;  %2064 = vmatpush.msra.mxu1 %v3688_v54 }
 0x4a2   :  { %2084 = vmatpush.msra.mxu2 %v3692_v56  ;;  %2104 = vmatpush.msra.mxu3 %v3694_v55  ;;  %v4208_v55 = vld [vmem:[#allocation23_spill] sm:$0xff] }
 0x4a3   :  { %2045 = vmatpush.msra.mxu0 %v3698_v29  ;;  %2065 = vmatpush.msra.mxu1 %v3700_v49 }
 0x4a4   :  { %2085 = vmatpush.msra.mxu2 %v3704_v26  ;;  %2105 = vmatpush.msra.mxu3 %v3706_v33 }
 0x500   :  { %v1623_v47 = vpop.f32.mrf.mxu0  ;;  %v1643_v38 = vpop.f32.mrf.mxu1 }
 0x501   :  { %v1624_v36 = vadd.f32 %v1623_v47, %v4206_v50  ;;  %v1644_v61 = vadd.f32 %v1643_v38, %v4207_v42  ;;  %v2207_v38 = vld [vmem:[%s4024_s4 + $0x50] sm:$0xff]  ;;  %v4210_v50 = vld [vmem:[#allocation13_spill] sm:$0xff] }
 0x502   :  { %v4211_v42 = vld [vmem:[#allocation24_spill] sm:$0xff] }
 0x503   :  { %v2331_v8 = vmul.f32 -1.442695, %v1624_v36  ;;  %v2332_v54 = vmul.f32 -1.442695, %v1644_v61 }
 0x505   :  { %2451 = vpow2.f32 %v2331_v8  ;;  %v2206_v8 = vld [vmem:[%s4024_s4 + $0x48] sm:$0xff] }
 0x506   :  { %2453 = vpow2.f32 %v2332_v54 }
 0x507   :  { %v1663_v56 = vpop.f32.mrf.mxu2  ;;  %v1683_v19 = vpop.f32.mrf.mxu3 }
 0x508   :  { %v1664_v39 = vadd.f32 %v1663_v56, %v4208_v55  ;;  %v1684_v27 = vadd.f32 %v1683_v19, %v4209_v23  ;;  %v2205_v55 = vld [vmem:[%s4024_s4 + $0x40] sm:$0xff] }
 0x50a   :  { %v2333_v37 = vmul.f32 -1.442695, %v1664_v39  ;;  %v2204_v39 = vld [vmem:[%s4024_s4 + $0x38] sm:$0xff] }
 0x50b   :  { %v2452_v10 = vpop.eup %2451 }
 0x50c   :  { %v2454_v11 = vpop.eup %2453  ;;  %v1695_v13 = vadd.f32 1.0, %v2452_v10  ;;  %2455 = vpow2.f32 %v2333_v37  ;;  %v2203_v37 = vld [vmem:[%s4024_s4 + $0x30] sm:$0xff] }
 0x50d   :  { %v1696_v18 = vadd.f32 1.0, %v2454_v11  ;;  %v4212_v11 = vld [vmem:[#allocation26_spill] sm:$0xff] }
 0x50e   :  { %2457 = vrcp.f32 %v1695_v13  ;;  %v1709_v4 = vand.u32 2147483648, %v1695_v13  ;;  %v1707_v48 = vand.u32 2147483647, %v1695_v13  ;;  %vm1703_vm3 = vweird.f32 %v1695_v13 }
 0x50f   :  { %2459 = vrcp.f32 %v1696_v18  ;;  %v1724_v40 = vand.u32 2147483648, %v1696_v18  ;;  %v1722_v33 = vand.u32 2147483647, %v1696_v18  ;;  %vm1718_vm4 = vweird.f32 %v1696_v18 }
 0x510   :  { %v1710_v29 = vor.u32 1.1754944e-38, %v1709_v4  ;;  %vm1708_vm7 = vcmp.eq.f32.partialorder %v1707_v48, 8.507059e+37  ;;  %v2197_v4 = vld [vmem:[%s4024_s4] sm:$0xff]  ;;  %v4213_v48 = vld [vmem:[#allocation28_spill] sm:$0xff] }
 0x511   :  { %v1725_v16 = vor.u32 1.1754944e-38, %v1724_v40  ;;  %vm1723_vm8 = vcmp.eq.f32.partialorder %v1722_v33, 8.507059e+37 }
 0x512   :  { %v2456_v20 = vpop.eup %2455 }
 0x513   :  { %v1697_v22 = vadd.f32 1.0, %v2456_v20  ;;  %v2201_v20 = vld [vmem:[%s4024_s4 + $0x20] sm:$0xff] }
 0x514   :  { %v2458_v28 = vpop.eup %2457 }
 0x515   :  { %v2460_v6 = vpop.eup %2459  ;;  %v1699_v35 = vmul.f32 %v2458_v28, %v1695_v13  ;;  %2461 = vrcp.f32 %v1697_v22  ;;  %vm1704_vm0 = vweird.f32 %v2458_v28  ;;  %v1739_v30 = vand.u32 2147483648, %v1697_v22 }
 0x516   :  { %v1714_v41 = vmul.f32 %v2460_v6, %v1696_v18  ;;  %2463 = vtanh.f32 %v1684_v27  ;;  %vm1719_vm1 = vweird.f32 %v2460_v6  ;;  %vm1705_vm5 = vmor %vm1703_vm3, %vm1704_vm0  ;;  %vm1733_vm10 = vweird.f32 %v1697_v22  ;;  %v2202_v18 = vld [vmem:[%s4024_s4 + $0x28] sm:$0xff] }
 0x517   :  { %v1700_v9 = vsub.f32 1.0, %v1699_v35  ;;  %vm1720_vm6 = vmor %vm1718_vm4, %vm1719_vm1  ;;  %v1737_v1 = vand.u32 2147483647, %v1697_v22  ;;  %v1740_v45 = vor.u32 1.1754944e-38, %v1739_v30  ;;  %v2199_v35 = vld [vmem:[%s4024_s4 + $0x10] sm:$0xff] }
 0x518   :  { %v1715_v15 = vsub.f32 1.0, %v1714_v41  ;;  %v2198_v41 = vld [vmem:[%s4024_s4 + $0x8] sm:$0xff] }
 0x519   :  { %v1701_v21 = vmul.f32 %v2458_v28, %v1700_v9  ;;  %vm1738_vm12 = vcmp.eq.f32.partialorder %v1737_v1, 8.507059e+37 }
 0x51a   :  { %v1716_v26 = vmul.f32 %v2460_v6, %v1715_v15 }
 0x51b   :  { %v2462_v34 = vpop.eup %2461  ;;  %v1702_v51 = vadd.f32 %v2458_v28, %v1701_v21 }
 0x51c   :  { %v1729_v14 = vmul.f32 %v2462_v34, %v1697_v22  ;;  %v1717_v49 = vadd.f32 %v2460_v6, %v1716_v26  ;;  %v2464_v5 = vpop.eup %2463  ;;  %vm1734_vm9 = vweird.f32 %v2462_v34 }
 0x51d   :  { %v1706_v52 = vsel %vm1705_vm5, %v2458_v28, %v1702_v51  ;;  %vm1735_vm11 = vmor %vm1733_vm10, %vm1734_vm9 }
 0x51e   :  { %v1730_v7 = vsub.f32 1.0, %v1729_v14  ;;  %v1711_v63 = vsel %vm1708_vm7, %v1710_v29, %v1706_v52  ;;  %v1721_v2 = vsel %vm1720_vm6, %v2460_v6, %v1717_v49  ;;  %v2200_v6 = vld [vmem:[%s4024_s4 + $0x18] sm:$0xff] }
 0x51f   :  { %v1726_v57 = vsel %vm1723_vm8, %v1725_v16, %v1721_v2  ;;  %v1745_v31 = vmul.f32 %v2464_v5, %v1711_v63 }
 0x520   :  { %v1731_v17 = vmul.f32 %v2462_v34, %v1730_v7  ;;  %v1744_v0 = vmul.f32 %v1726_v57, %v3778_v25  ;;  %v2212_v25 = vld [vmem:[%s4024_s4 + $0x78] sm:$0xff] }
 0x522   :  { %v3888_v12 = vadd.f32 %v1745_v31, %v1744_v0  ;;  %v1732_v24 = vadd.f32 %v2462_v34, %v1731_v17 }
 0x524   :  { %2465 = vtanh.f32 %v3888_v12  ;;  %v1736_v44 = vsel %vm1735_vm11, %v2462_v34, %v1732_v24 }
 0x525   :  { %v1741_v53 = vsel %vm1738_vm12, %v1740_v45, %v1736_v44 }
 0x52a   :  { %v2466_v46 = vpop.eup %2465 }
 0x52b   :  { %v3891_v3 = vmul.f32 %v2466_v46, %v1741_v53 }
 0x52d   :  { %1834 = vmatmul.f32.vlgmr.msrb.gmra.mxu0 %v3891_v3  ;;  %1854 = vmatmul.f32.vlgmr.msrb.gmra.mxu1 %v3891_v3 }
 0x52e   :  { %1874 = vmatmul.f32.vlgmr.msrb.gmra.mxu2 %v3891_v3  ;;  %1894 = vmatmul.f32.vlgmr.msrb.gmra.mxu3 %v3891_v3 }
 0x52f   :  { %2215 = vmatpush.msrb.mxu0 %v2212_v25 }
 0x531   :  { %2216 = vmatpush.msrb.mxu0 %v2211_v58 }
 0x533   :  { %2217 = vmatpush.msrb.mxu0 %v2210_v59 }
 0x535   :  { %2218 = vmatpush.msrb.mxu0 %v2209_v60 }
 0x537   :  { %2219 = vmatpush.msrb.mxu0 %v2208_v32 }
 0x539   :  { %2220 = vmatpush.msrb.mxu0 %v2207_v38 }
 0x53b   :  { %2221 = vmatpush.msrb.mxu0 %v2206_v8 }
 0x53d   :  { %2222 = vmatpush.msrb.mxu0 %v2205_v55  ;;  %v4216_v55 = vld [vmem:[#allocation45_spill] sm:$0xff] }
 0x53f   :  { %2223 = vmatpush.msrb.mxu0 %v2204_v39  ;;  %v4217_v39 = vld [vmem:[#allocation46_spill] sm:$0xff] }
 0x541   :  { %2224 = vmatpush.msrb.mxu0 %v2203_v37 }
 0x543   :  { %2225 = vmatpush.msrb.mxu0 %v2202_v18 }
 0x545   :  { %2226 = vmatpush.msrb.mxu0 %v2201_v20 }
 0x547   :  { %2227 = vmatpush.msrb.mxu0 %v2200_v6 }
 0x549   :  { %2228 = vmatpush.msrb.mxu0 %v2199_v35 }
 0x54b   :  { %2229 = vmatpush.msrb.mxu0 %v2198_v41 }
 0x54d   :  { %2230 = vmatpush.msrb.mxu0 %v2197_v4 }
 0x5aa   :  { %v1835_v62 = vpop.f32.mrf.mxu0  ;;  %v1855_v47 = vpop.f32.mrf.mxu1 }
 0x5ab   :  { %v1836_v36 = vadd.f32 %v1835_v62, %v4210_v50  ;;  %v1856_v61 = vadd.f32 %v1855_v47, %v4211_v42 }
 0x5ad   :  { %v2334_v54 = vmul.f32 -1.442695, %v1836_v36  ;;  %v2335_v56 = vmul.f32 -1.442695, %v1856_v61 }
 0x5af   :  { %2467 = vpow2.f32 %v2334_v54  ;;  %v4214_v54 = vld [vmem:[#allocation30_spill] sm:$0xff] }
 0x5b0   :  { %2469 = vpow2.f32 %v2335_v56  ;;  %v4215_v56 = vld [vmem:[#allocation44_spill] sm:$0xff] }
 0x5b1   :  { %v1875_v10 = vpop.f32.mrf.mxu2  ;;  %v1895_v9 = vpop.f32.mrf.mxu3 }
 0x5b2   :  { %v1876_v13 = vadd.f32 %v1875_v10, %v4212_v11  ;;  %v1896_v26 = vadd.f32 %v1895_v9, %v4213_v48 }
 0x5b4   :  { %v2336_v19 = vmul.f32 -1.442695, %v1876_v13 }
 0x5b5   :  { %v2468_v22 = vpop.eup %2467 }
 0x5b6   :  { %v2470_v28 = vpop.eup %2469  ;;  %v1907_v23 = vadd.f32 1.0, %v2468_v22  ;;  %2471 = vpow2.f32 %v2336_v19  ;;  %v3973_v22 = vld [vmem:[%s4024_s4 + $0x80] ss:$0 sm:$0xff] }
 0x5b7   :  { %v1908_v27 = vadd.f32 1.0, %v2470_v28 }
 0x5b8   :  { %2473 = vrcp.f32 %v1907_v23  ;;  %v1921_v49 = vand.u32 2147483648, %v1907_v23  ;;  %v1919_v5 = vand.u32 2147483647, %v1907_v23  ;;  %vm1915_vm15 = vweird.f32 %v1907_v23 }
 0x5b9   :  { %2475 = vrcp.f32 %v1908_v27  ;;  %v1936_v16 = vand.u32 2147483648, %v1908_v27  ;;  %v1934_v63 = vand.u32 2147483647, %v1908_v27  ;;  %vm1930_vm0 = vweird.f32 %v1908_v27 }
 0x5ba   :  { %v1922_v17 = vor.u32 1.1754944e-38, %v1921_v49  ;;  %vm1920_vm4 = vcmp.eq.f32.partialorder %v1919_v5, 8.507059e+37 }
 0x5bb   :  { %v1937_v24 = vor.u32 1.1754944e-38, %v1936_v16  ;;  %vm1935_vm5 = vcmp.eq.f32.partialorder %v1934_v63, 8.507059e+37 }
 0x5bc   :  { %v2472_v15 = vpop.eup %2471 }
 0x5bd   :  { %v1909_v40 = vadd.f32 1.0, %v2472_v15 }
 0x5be   :  { %v2474_v21 = vpop.eup %2473 }
 0x5bf   :  { %v2476_v33 = vpop.eup %2475  ;;  %v1911_v34 = vmul.f32 %v2474_v21, %v1907_v23  ;;  %2477 = vrcp.f32 %v1909_v40  ;;  %vm1916_vm13 = vweird.f32 %v2474_v21  ;;  %v1951_v62 = vand.u32 2147483648, %v1909_v40 }
 0x5c0   :  { %v1926_v51 = vmul.f32 %v2476_v33, %v1908_v27  ;;  %2479 = vtanh.f32 %v1896_v26  ;;  %vm1931_vm14 = vweird.f32 %v2476_v33  ;;  %vm1917_vm1 = vmor %vm1915_vm15, %vm1916_vm13  ;;  %vm1945_vm7 = vweird.f32 %v1909_v40 }
 0x5c1   :  { %v1912_v14 = vsub.f32 1.0, %v1911_v34  ;;  %vm1932_vm3 = vmor %vm1930_vm0, %vm1931_vm14  ;;  %v1949_v47 = vand.u32 2147483647, %v1909_v40  ;;  %v1952_v36 = vor.u32 1.1754944e-38, %v1951_v62 }
 0x5c2   :  { %v1927_v29 = vsub.f32 1.0, %v1926_v51 }
 0x5c3   :  { %v1913_v52 = vmul.f32 %v2474_v21, %v1912_v14  ;;  %vm1950_vm9 = vcmp.eq.f32.partialorder %v1949_v47, 8.507059e+37 }
 0x5c4   :  { %v1928_v7 = vmul.f32 %v2476_v33, %v1927_v29 }
 0x5c5   :  { %v2478_v2 = vpop.eup %2477  ;;  %v1914_v57 = vadd.f32 %v2474_v21, %v1913_v52 }
 0x5c6   :  { %v1941_v31 = vmul.f32 %v2478_v2, %v1909_v40  ;;  %v1929_v0 = vadd.f32 %v2476_v33, %v1928_v7  ;;  %v2480_v1 = vpop.eup %2479  ;;  %vm1946_vm6 = vweird.f32 %v2478_v2 }
 0x5c7   :  { %v1918_v30 = vsel %vm1917_vm1, %v2474_v21, %v1914_v57  ;;  %vm1947_vm8 = vmor %vm1945_vm7, %vm1946_vm6 }
 0x5c8   :  { %v1942_v44 = vsub.f32 1.0, %v1941_v31  ;;  %v1923_v45 = vsel %vm1920_vm4, %v1922_v17, %v1918_v30  ;;  %v1933_v46 = vsel %vm1932_vm3, %v2476_v33, %v1929_v0 }
 0x5c9   :  { %v1938_v53 = vsel %vm1935_vm5, %v1937_v24, %v1933_v46  ;;  %v1957_v25 = vmul.f32 %v2480_v1, %v1923_v45 }
 0x5ca   :  { %v1943_v58 = vmul.f32 %v2478_v2, %v1942_v44  ;;  %v1956_v59 = vmul.f32 %v1938_v53, %v3888_v12 }
 0x5cc   :  { %v3950_v60 = vadd.f32 %v1957_v25, %v1956_v59  ;;  %v1944_v32 = vadd.f32 %v2478_v2, %v1943_v58 }
 0x5ce   :  { %2481 = vtanh.f32 %v3950_v60  ;;  %2341 = vst.msk [vmem:[%s4026_s6 + $0x10] sm:$0xff] %vm315_vm2, %v3950_v60  ;;  %v1948_v38 = vsel %vm1947_vm8, %v2478_v2, %v1944_v32 }
 0x5cf   :  { %v1953_v61 = vsel %vm1950_vm9, %v1952_v36, %v1948_v38 }
 0x5d4   :  { %v2482_v12 = vpop.eup %2481 }
 0x5d5   :  { %v1960_v8 = vmul.f32 %v2482_v12, %v1953_v61 }
 0x5d7   :  { %2046 = vmatmul.f32.vlgmr.msra.gmra.mxu0 %v1960_v8  ;;  %2174 = vst.msk [vmem:[%s4026_s6] sm:$0xff] %vm315_vm2, %v1960_v8  ;;  %2066 = vmatmul.f32.vlgmr.msra.gmra.mxu1 %v1960_v8 }
 0x5d8   :  { %2086 = vmatmul.f32.vlgmr.msra.gmra.mxu2 %v1960_v8  ;;  %2106 = vmatmul.f32.vlgmr.msra.gmra.mxu3 %v1960_v8 }
 0x5df   :  { %2231 = vmatmul.f32.vlgmr.msrb.gmra.mxu0 %v4214_v54 }
 0x5e7   :  { %2234 = vmatmul.f32.gmra.mxu0 %v4215_v56 }
 0x5ef   :  { %2237 = vmatmul.f32.gmra.mxu0 %v4216_v55 }
 0x5f7   :  { %2240 = vmatmul.f32.gmra.mxu0 %v4217_v39 }
 0x5ff   :  { %2243 = vmatmul.f32.gmra.mxu0 %v3805_v43 }
 0x607   :  { %2246 = vmatmul.f32.gmra.mxu0 %v3891_v3 }
 0x60f   :  { %2249 = vmatmul.f32.gmra.mxu0 %v1960_v8 }
 0x654   :  { %v2047_v37 = vpop.f32.mrf.mxu0  ;;  %v2067_v10 = vpop.f32.mrf.mxu1 }
 0x655   :  { %v2048_v13 = vadd.f32 %v2047_v37, %v4210_v50  ;;  %v2068_v18 = vadd.f32 %v2067_v10, %v4211_v42 }
 0x657   :  { %v2337_v19 = vmul.f32 -1.442695, %v2048_v13  ;;  %v2338_v20 = vmul.f32 -1.442695, %v2068_v18 }
 0x659   :  { %2483 = vpow2.f32 %v2337_v19 }
 0x65a   :  { %2485 = vpow2.f32 %v2338_v20 }
 0x65b   :  { %v2087_v28 = vpop.f32.mrf.mxu2  ;;  %v2107_v9 = vpop.f32.mrf.mxu3 }
 0x65c   :  { %v2088_v43 = vadd.f32 %v2087_v28, %v4212_v11  ;;  %v2232_v3 = vpop.f32.mrf.mxu0  ;;  %v2108_v21 = vadd.f32 %v2107_v9, %v4213_v48 }
 0x65d   :  { %v2233_v23 = vadd.f32 %v3973_v22, %v2232_v3 }
 0x65e   :  { %v2339_v27 = vmul.f32 -1.442695, %v2088_v43 }
 0x65f   :  { %v2484_v6 = vpop.eup %2483  ;;  %2256 = vst [vmem:[%s4025_s5] sm:$0xff] %v2233_v23 }
 0x660   :  { %v2486_v50 = vpop.eup %2485  ;;  %v2119_v42 = vadd.f32 1.0, %v2484_v6  ;;  %2487 = vpow2.f32 %v2339_v27 }
 0x661   :  { %v2120_v35 = vadd.f32 1.0, %v2486_v50 }
 0x662   :  { %2489 = vrcp.f32 %v2119_v42  ;;  %v2131_v29 = vand.u32 2147483647, %v2119_v42  ;;  %v2133_v49 = vand.u32 2147483648, %v2119_v42  ;;  %vm2127_vm12 = vweird.f32 %v2119_v42 }
 0x663   :  { %2491 = vrcp.f32 %v2120_v35  ;;  %v2148_v52 = vand.u32 2147483648, %v2120_v35  ;;  %v2146_v2 = vand.u32 2147483647, %v2120_v35  ;;  %vm2142_vm13 = vweird.f32 %v2120_v35 }
 0x664   :  { %v2235_v41 = vpop.f32.mrf.mxu0  ;;  %v2134_v31 = vor.u32 1.1754944e-38, %v2133_v49  ;;  %vm2132_vm0 = vcmp.eq.f32.partialorder %v2131_v29, 8.507059e+37 }
 0x665   :  { %v2236_v15 = vadd.f32 %v3973_v22, %v2235_v41  ;;  %v2149_v24 = vor.u32 1.1754944e-38, %v2148_v52  ;;  %vm2147_vm1 = vcmp.eq.f32.partialorder %v2146_v2, 8.507059e+37 }
 0x666   :  { %v2488_v11 = vpop.eup %2487 }
 0x667   :  { %v2121_v4 = vadd.f32 1.0, %v2488_v11  ;;  %2257 = vst [vmem:[%s4025_s5 + $0x8] sm:$0xff] %v2236_v15 }
 0x668   :  { %v2490_v40 = vpop.eup %2489 }
 0x669   :  { %v2492_v26 = vpop.eup %2491  ;;  %v2123_v33 = vmul.f32 %v2490_v40, %v2119_v42  ;;  %2493 = vrcp.f32 %v2121_v4  ;;  %vm2128_vm10 = vweird.f32 %v2490_v40  ;;  %v2163_v36 = vand.u32 2147483648, %v2121_v4 }
 0x66a   :  { %v2138_v34 = vmul.f32 %v2492_v26, %v2120_v35  ;;  %2495 = vtanh.f32 %v2108_v21  ;;  %vm2143_vm11 = vweird.f32 %v2492_v26  ;;  %vm2129_vm14 = vmor %vm2127_vm12, %vm2128_vm10  ;;  %vm2157_vm4 = vweird.f32 %v2121_v4 }
 0x66b   :  { %v2124_v51 = vsub.f32 1.0, %v2123_v33  ;;  %vm2144_vm15 = vmor %vm2142_vm13, %vm2143_vm11  ;;  %v2161_v12 = vand.u32 2147483647, %v2121_v4  ;;  %v2164_v54 = vor.u32 1.1754944e-38, %v2163_v36 }
 0x66c   :  { %v2139_v14 = vsub.f32 1.0, %v2138_v34  ;;  %v2238_v16 = vpop.f32.mrf.mxu0 }
 0x66d   :  { %v2125_v5 = vmul.f32 %v2490_v40, %v2124_v51  ;;  %v2239_v7 = vadd.f32 %v3973_v22, %v2238_v16  ;;  %vm2162_vm6 = vcmp.eq.f32.partialorder %v2161_v12, 8.507059e+37 }
 0x66e   :  { %v2140_v63 = vmul.f32 %v2492_v26, %v2139_v14 }
 0x66f   :  { %v2494_v57 = vpop.eup %2493  ;;  %v2126_v48 = vadd.f32 %v2490_v40, %v2125_v5  ;;  %2258 = vst [vmem:[%s4025_s5 + $0x10] sm:$0xff] %v2239_v7 }
 0x670   :  { %v2141_v17 = vadd.f32 %v2492_v26, %v2140_v63  ;;  %v2153_v0 = vmul.f32 %v2494_v57, %v2121_v4  ;;  %v2496_v1 = vpop.eup %2495  ;;  %vm2158_vm3 = vweird.f32 %v2494_v57 }
 0x671   :  { %v2130_v30 = vsel %vm2129_vm14, %v2490_v40, %v2126_v48  ;;  %vm2159_vm5 = vmor %vm2157_vm4, %vm2158_vm3 }
 0x672   :  { %v2135_v44 = vsel %vm2132_vm0, %v2134_v31, %v2130_v30  ;;  %v2145_v45 = vsel %vm2144_vm15, %v2492_v26, %v2141_v17  ;;  %v2154_v46 = vsub.f32 1.0, %v2153_v0 }
 0x673   :  { %v2150_v53 = vsel %vm2147_vm1, %v2149_v24, %v2145_v45  ;;  %v2169_v25 = vmul.f32 %v2496_v1, %v2135_v44 }
 0x674   :  { %v2168_v58 = vmul.f32 %v2150_v53, %v3950_v60  ;;  %v2241_v59 = vpop.f32.mrf.mxu0  ;;  %v2155_v32 = vmul.f32 %v2494_v57, %v2154_v46 }
 0x675   :  { %v2242_v62 = vadd.f32 %v3973_v22, %v2241_v59 }
 0x676   :  { %v2170_v47 = vadd.f32 %v2169_v25, %v2168_v58  ;;  %v2156_v38 = vadd.f32 %v2494_v57, %v2155_v32 }
 0x677   :  { %2259 = vst [vmem:[%s4025_s5 + $0x18] sm:$0xff] %v2242_v62 }
 0x678   :  { %2497 = vtanh.f32 %v2170_v47  ;;  %v2160_v61 = vsel %vm2159_vm5, %v2494_v57, %v2156_v38 }
 0x679   :  { %v2165_v55 = vsel %vm2162_vm6, %v2164_v54, %v2160_v61 }
 0x67c   :  { %v2244_v8 = vpop.f32.mrf.mxu0 }
 0x67d   :  { %v2245_v60 = vadd.f32 %v3973_v22, %v2244_v8 }
 0x67e   :  { %v2498_v56 = vpop.eup %2497 }
 0x67f   :  { %2260 = vst [vmem:[%s4025_s5 + $0x20] sm:$0xff] %v2245_v60  ;;  %v2172_v39 = vmul.f32 %v2498_v56, %v2165_v55 }
 0x681   :  { %2176 = vrot.lane.b32.xlu1 %v2172_v39, %s2555_s3  ;;  %2252 = vmatmul.f32.gmra.mxu0 %v2172_v39 }
 0x684   :  { %v2247_v37 = vpop.f32.mrf.mxu0 }
 0x685   :  { %v2248_v10 = vadd.f32 %v3973_v22, %v2247_v37 }
 0x687   :  { %2261 = vst [vmem:[%s4025_s5 + $0x28] sm:$0xff] %v2248_v10 }
 0x689   :  { %2184 = vrot.lane.b32.xlu1 %v2170_v47, %s2555_s3 }
 0x68c   :  { %v2250_v13 = vpop.f32.mrf.mxu0 }
 0x68d   :  { %v2251_v18 = vadd.f32 %v3973_v22, %v2250_v13 }
 0x68f   :  { %2262 = vst [vmem:[%s4025_s5 + $0x30] sm:$0xff] %v2251_v18 }
 0x6f3   :  { %v2177_v19 = vpop.permute.xlu1 %2176 }
 0x6f4   :  { %2340 = vst.msk [vmem:[%s4026_s6 + $0x8] sm:$0xff] %vm315_vm2, %v2177_v19 }
 0x6fb   :  { %v2185_v20 = vpop.permute.xlu1 %2184 }
 0x6fc   :  { %2342 = vst.msk [vmem:[%s4026_s6 + $0x18] sm:$0xff] %vm315_vm2, %v2185_v20 }
 0x6fe   :  { %v2253_v28 = vpop.f32.mrf.mxu0 }
 0x6ff   :  { %v2254_v43 = vadd.f32 %v3973_v22, %v2253_v28 }
 0x701   :  { %2263 = vst [vmem:[%s4025_s5 + $0x38] sm:$0xff] %v2254_v43 }
 0x702   :  { %2272 = vsyncpa [#allocation5], 1 }
 0x703   :  { %2273 = vsyncpa [#allocation7], 1 }

</bundles_post_ra>
